<compile_context>
chip_gen: v5e
topology: v5e:2x2
jax: 0.10.0
libtpu: 0.0.40
codegen_flags: <defaults>
</compile_context>

<pallas_src>
import jax
import jax.numpy as jnp
from jax.experimental import pallas as pl
from jax.experimental.pallas import tpu as pltpu


# -----------------------------------------------------------------------------
# Fused MLP kernel.  Grid = (L,) over the 9 hidden layers.
#   x_ref     : (B, D)       input activation (read only at step 0)
#   w_ref     : (D, D)       bf16 weight slab for layer l (streamed per step)
#   scale_ref : (1, D)       folded BN scale for layer l
#   bias_ref  : (1, D)       folded BN/linear bias for layer l
#   wf_ref    : (D, NPAD)    bf16 classifier weight (zero-padded to 128 lanes)
#   bf_ref    : (1, NPAD)    classifier bias (zero-padded)
#   o_ref     : (B, NPAD)    padded logits (written only at the last step)
#   act_ref   : (B, D) f32   VMEM-resident activation carried across steps
# -----------------------------------------------------------------------------
def _mlp_kernel(x_ref, w_ref, scale_ref, bias_ref, wf_ref, bf_ref, o_ref,
                act_ref):
    l = pl.program_id(0)
    n_layers = pl.num_programs(0)

    # Step 0: bring the input into the VMEM-resident activation buffer.
    @pl.when(l == 0)
    def _():
        act_ref[...] = x_ref[...]

    # Linear (bf16 operands, f32 MXU accumulation) + folded eval-mode BN.
    h = act_ref[...]
    y = jnp.dot(h.astype(jnp.bfloat16), w_ref[...],
                preferred_element_type=jnp.float32)
    y = y * scale_ref[...] + bias_ref[...]

    # Stem (l == 0) is Linear + BN only; every block (l >= 1) ends with ReLU.
    @pl.when(l == 0)
    def _():
        act_ref[...] = y

    @pl.when(l > 0)
    def _():
        act_ref[...] = jnp.maximum(y, 0.0)

    # Last step: fused classifier Linear into a lane-dense padded output tile.
    @pl.when(l == n_layers - 1)
    def _():
        logits = jnp.dot(act_ref[...].astype(jnp.bfloat16), wf_ref[...],
                         preferred_element_type=jnp.float32)
        o_ref[...] = logits + bf_ref[...]


def dense_layer_order_forward(x, params):
    """x: (B, *input_shape) -> (B, n_classes) f32 logits."""
    w_stack = params["w_stack"]      # (L, D, D)   bf16, already (in, out)
    scale = params["scale"]          # (L, 1, D)   f32
    bias = params["bias"]            # (L, 1, D)   f32
    wf = params["wf"]                # (D, NPAD)   bf16
    bf = params["bf"]                # (1, NPAD)   f32
    n_classes = params["n_classes"]

    L, D, _ = w_stack.shape
    NPAD = wf.shape[-1]
    B = x.shape[0]
    x2 = x.reshape(B, D).astype(jnp.float32)   # PyTorch x.view(-1, n_dims_in)

    out_padded = pl.pallas_call(
        _mlp_kernel,
        out_shape=jax.ShapeDtypeStruct((B, NPAD), jnp.float32),
        grid_spec=pltpu.PrefetchScalarGridSpec(
            num_scalar_prefetch=0,
            grid=(L,),
            in_specs=[
                pl.BlockSpec((B, D), lambda l: (0, 0)),           # x
                pl.BlockSpec((None, D, D), lambda l: (l, 0, 0)),  # layer weight
                pl.BlockSpec((None, 1, D), lambda l: (l, 0, 0)),  # BN scale
                pl.BlockSpec((None, 1, D), lambda l: (l, 0, 0)),  # BN/lin bias
                pl.BlockSpec((D, NPAD), lambda l: (0, 0)),        # classifier W
                pl.BlockSpec((1, NPAD), lambda l: (0, 0)),        # classifier b
            ],
            out_specs=pl.BlockSpec((B, NPAD), lambda l: (0, 0)),
            scratch_shapes=[pltpu.VMEM((B, D), jnp.float32)],
        ),
        compiler_params=pltpu.CompilerParams(
            dimension_semantics=("arbitrary",),   # layer l depends on l-1
        ),
    )(x2, w_stack, scale, bias, wf, bf)
    return out_padded[:, :n_classes]


# -----------------------------------------------------------------------------
# Deterministic synthetic parameters (PyTorch-like uniform init, BN folded).
# -----------------------------------------------------------------------------
def make_params(key, d_in, d_hidden, n_classes, n_blocks, npad=128):
    assert d_in == d_hidden, "stacked-weight layout assumes d_in == d_hidden"
    eps = 1e-5
    bn_scale = 1.0 / float(jnp.sqrt(1.0 + eps))   # gamma=1, running_var=1
    L = 1 + n_blocks                              # stem + blocks
    keys = jax.random.split(key, 2 * L + 2)

    ws, scales, biases = [], [], []
    for i in range(L):
        kw, kb = keys[2 * i], keys[2 * i + 1]
        lim = 1.0 / float(jnp.sqrt(d_hidden))
        w = jax.random.uniform(kw, (d_hidden, d_hidden), jnp.float32, -lim, lim)
        b = jax.random.uniform(kb, (d_hidden,), jnp.float32, -lim, lim)
        ws.append(w.T)                             # (in, out) for x @ W^T
        scales.append(jnp.full((d_hidden,), bn_scale, jnp.float32))
        biases.append(b * bn_scale)                # BN(running stats) folded

    kwf, kbf = keys[-2], keys[-1]
    lim = 1.0 / float(jnp.sqrt(d_hidden))
    wf = jax.random.uniform(kwf, (n_classes, d_hidden), jnp.float32, -lim, lim)
    bff = jax.random.uniform(kbf, (n_classes,), jnp.float32, -lim, lim)
    wf_pad = jnp.zeros((d_hidden, npad), jnp.float32).at[:, :n_classes].set(wf.T)
    bf_pad = jnp.zeros((1, npad), jnp.float32).at[0, :n_classes].set(bff)

    return {
        "w_stack": jnp.stack(ws).astype(jnp.bfloat16),          # (L, D, D)
        "scale": jnp.stack(scales).reshape(L, 1, d_hidden),     # (L, 1, D)
        "bias": jnp.stack(biases).reshape(L, 1, d_hidden),      # (L, 1, D)
        "wf": wf_pad.astype(jnp.bfloat16),                      # (D, 128)
        "bf": bf_pad,                                           # (1, 128)
        "n_classes": n_classes,
    }


if __name__ == "__main__":
    # config['input_shape'] = (4, 16, 16) -> n_dims_in = 1024; batch = 2.
    B = 2
    input_shape = (4, 16, 16)
    d_in = 4 * 16 * 16          # 1024
    d_hidden = 1024
    n_classes = 10
    n_blocks = 8

    key = jax.random.PRNGKey(0)
    kx, kp = jax.random.split(key)
    x = jax.random.normal(kx, (B,) + input_shape, jnp.float32)
    params = make_params(kp, d_in, d_hidden, n_classes, n_blocks)

    out = dense_layer_order_forward(x, params)
    out = jax.block_until_ready(out)
    assert out.shape == (B, n_classes), out.shape
    assert out.dtype == jnp.float32
    assert bool(jnp.all(jnp.isfinite(out)))
    print("KERNEL_OK")
</pallas_src>

<mosaic_0001>
module attributes {stable_mosaic.version = 11 : i64} {
  func.func @_mlp_kernel(%arg0: i32, %arg1: memref<2x1024xf32, #tpu.memory_space<vmem>>, %arg2: memref<1x1024x1024xbf16, #tpu.memory_space<vmem>>, %arg3: memref<1x1x1024xf32, #tpu.memory_space<vmem>>, %arg4: memref<1x1x1024xf32, #tpu.memory_space<vmem>>, %arg5: memref<1024x128xbf16, #tpu.memory_space<vmem>>, %arg6: memref<1x128xf32, #tpu.memory_space<vmem>>, %arg7: memref<2x128xf32, #tpu.memory_space<vmem>>, %arg8: memref<2x1024xf32, #tpu.memory_space<vmem>>) attributes {dimension_semantics = [#tpu.dimension_semantics<arbitrary>], iteration_bounds = array<i64: 9>, scalar_prefetch = 0 : i64, scratch_operands = 1 : i64, tpu.core_type = #tpu.core_type<tc>, window_params = [{pipeline_mode = #tpu.pipeline_mode<synchronous>, transform_indices = @transform_0, window_bounds = array<i64: 2, 1024>}, {transform_indices = @transform_1, window_bounds = array<i64: 1, 1024, 1024>}, {transform_indices = @transform_2, window_bounds = array<i64: 1, 1, 1024>}, {transform_indices = @transform_3, window_bounds = array<i64: 1, 1, 1024>}, {pipeline_mode = #tpu.pipeline_mode<synchronous>, transform_indices = @transform_4, window_bounds = array<i64: 1024, 128>}, {pipeline_mode = #tpu.pipeline_mode<synchronous>, transform_indices = @transform_5, window_bounds = array<i64: 1, 128>}, {pipeline_mode = #tpu.pipeline_mode<synchronous>, transform_indices = @transform_6, window_bounds = array<i64: 2, 128>}]} {
    %c0_i32 = arith.constant 0 : i32
    %0 = arith.cmpi eq, %arg0, %c0_i32 : i32
    %1 = arith.extui %0 : i1 to i32
    %c0_i32_0 = arith.constant 0 : i32
    %2 = arith.cmpi ne, %1, %c0_i32_0 : i32
    scf.if %2 {
      %c0_16 = arith.constant 0 : index
      %c0_17 = arith.constant 0 : index
      %25 = vector.load %arg1[%c0_16, %c0_17] : memref<2x1024xf32, #tpu.memory_space<vmem>>, vector<2x1024xf32>
      %c0_18 = arith.constant 0 : index
      %c0_19 = arith.constant 0 : index
      %26 = vector.load %arg8[%c0_18, %c0_19] : memref<2x1024xf32, #tpu.memory_space<vmem>>, vector<2x1024xf32>
      tpu.vector_store %arg8[%c0_18, %c0_19], %25 {strides = array<i32>} : memref<2x1024xf32, #tpu.memory_space<vmem>>, vector<2x1024xf32>,
    } else {
    }
    %c0 = arith.constant 0 : index
    %c0_1 = arith.constant 0 : index
    %3 = vector.load %arg8[%c0, %c0_1] : memref<2x1024xf32, #tpu.memory_space<vmem>>, vector<2x1024xf32>
    %4 = arith.truncf %3 : vector<2x1024xf32> to vector<2x1024xbf16>
    %c0_2 = arith.constant 0 : index
    %c0_3 = arith.constant 0 : index
    %c0_4 = arith.constant 0 : index
    %5 = vector.load %arg2[%c0_2, %c0_3, %c0_4] : memref<1x1024x1024xbf16, #tpu.memory_space<vmem>>, vector<1x1024x1024xbf16>
    %6 = vector.shape_cast %5 : vector<1x1024x1024xbf16> to vector<1024x1024xbf16>
    %cst = arith.constant dense<0.000000e+00> : vector<2x1024xf32>
    %7 = tpu.matmul %4, %6, %cst {dimension_numbers = #tpu.dot_dimension_numbers<[1], [0], [0], [1], [0, 0, 1, 1], [], []>} : vector<2x1024xbf16>, vector<1024x1024xbf16>, vector<2x1024xf32> -> vector<2x1024xf32>
    %c0_5 = arith.constant 0 : index
    %c0_6 = arith.constant 0 : index
    %c0_7 = arith.constant 0 : index
    %8 = vector.load %arg3[%c0_5, %c0_6, %c0_7] : memref<1x1x1024xf32, #tpu.memory_space<vmem>>, vector<1x1x1024xf32>
    %9 = vector.shape_cast %8 : vector<1x1x1024xf32> to vector<1x1024xf32>
    %10 = vector.broadcast %9 : vector<1x1024xf32> to vector<2x1024xf32>
    %11 = arith.mulf %7, %10 : vector<2x1024xf32>
    %c0_8 = arith.constant 0 : index
    %c0_9 = arith.constant 0 : index
    %c0_10 = arith.constant 0 : index
    %12 = vector.load %arg4[%c0_8, %c0_9, %c0_10] : memref<1x1x1024xf32, #tpu.memory_space<vmem>>, vector<1x1x1024xf32>
    %13 = vector.shape_cast %12 : vector<1x1x1024xf32> to vector<1x1024xf32>
    %14 = vector.broadcast %13 : vector<1x1024xf32> to vector<2x1024xf32>
    %15 = arith.addf %11, %14 : vector<2x1024xf32>
    %c0_i32_11 = arith.constant 0 : i32
    %16 = arith.cmpi eq, %arg0, %c0_i32_11 : i32
    %17 = arith.extui %16 : i1 to i32
    %c0_i32_12 = arith.constant 0 : i32
    %18 = arith.cmpi ne, %17, %c0_i32_12 : i32
    scf.if %18 {
      %c0_16 = arith.constant 0 : index
      %c0_17 = arith.constant 0 : index
      %25 = vector.load %arg8[%c0_16, %c0_17] : memref<2x1024xf32, #tpu.memory_space<vmem>>, vector<2x1024xf32>
      tpu.vector_store %arg8[%c0_16, %c0_17], %15 {strides = array<i32>} : memref<2x1024xf32, #tpu.memory_space<vmem>>, vector<2x1024xf32>,
    } else {
    }
    %c0_i32_13 = arith.constant 0 : i32
    %19 = arith.cmpi sgt, %arg0, %c0_i32_13 : i32
    %20 = arith.extui %19 : i1 to i32
    %c0_i32_14 = arith.constant 0 : i32
    %21 = arith.cmpi ne, %20, %c0_i32_14 : i32
    scf.if %21 {
      %cst_16 = arith.constant 0.000000e+00 : f32
      %25 = vector.broadcast %cst_16 : f32 to vector<2x1024xf32>
      %26 = arith.maximumf %15, %25 : vector<2x1024xf32>
      %c0_17 = arith.constant 0 : index
      %c0_18 = arith.constant 0 : index
      %27 = vector.load %arg8[%c0_17, %c0_18] : memref<2x1024xf32, #tpu.memory_space<vmem>>, vector<2x1024xf32>
      tpu.vector_store %arg8[%c0_17, %c0_18], %26 {strides = array<i32>} : memref<2x1024xf32, #tpu.memory_space<vmem>>, vector<2x1024xf32>,
    } else {
    }
    %c8_i32 = arith.constant 8 : i32
    %22 = arith.cmpi eq, %arg0, %c8_i32 : i32
    %23 = arith.extui %22 : i1 to i32
    %c0_i32_15 = arith.constant 0 : i32
    %24 = arith.cmpi ne, %23, %c0_i32_15 : i32
    scf.if %24 {
      %c0_16 = arith.constant 0 : index
      %c0_17 = arith.constant 0 : index
      %25 = vector.load %arg8[%c0_16, %c0_17] : memref<2x1024xf32, #tpu.memory_space<vmem>>, vector<2x1024xf32>
      %26 = arith.truncf %25 : vector<2x1024xf32> to vector<2x1024xbf16>
      %c0_18 = arith.constant 0 : index
      %c0_19 = arith.constant 0 : index
      %27 = vector.load %arg5[%c0_18, %c0_19] : memref<1024x128xbf16, #tpu.memory_space<vmem>>, vector<1024x128xbf16>
      %cst_20 = arith.constant dense<0.000000e+00> : vector<2x128xf32>
      %28 = tpu.matmul %26, %27, %cst_20 {dimension_numbers = #tpu.dot_dimension_numbers<[1], [0], [0], [1], [0, 0, 1, 1], [], []>} : vector<2x1024xbf16>, vector<1024x128xbf16>, vector<2x128xf32> -> vector<2x128xf32>
      %c0_21 = arith.constant 0 : index
      %c0_22 = arith.constant 0 : index
      %29 = vector.load %arg6[%c0_21, %c0_22] : memref<1x128xf32, #tpu.memory_space<vmem>>, vector<1x128xf32>
      %30 = vector.broadcast %29 : vector<1x128xf32> to vector<2x128xf32>
      %31 = arith.addf %28, %30 : vector<2x128xf32>
      %c0_23 = arith.constant 0 : index
      %c0_24 = arith.constant 0 : index
      %32 = vector.load %arg7[%c0_23, %c0_24] : memref<2x128xf32, #tpu.memory_space<vmem>>, vector<2x128xf32>
      tpu.vector_store %arg7[%c0_23, %c0_24], %31 {strides = array<i32>} : memref<2x128xf32, #tpu.memory_space<vmem>>, vector<2x128xf32>,
    } else {
    }
    return
  }
  func.func @transform_0(%arg0: i32) -> (i32, i32) {
    %c0_i32 = arith.constant 0 : i32
    %c0_i32_0 = arith.constant 0 : i32
    %c0_i32_1 = arith.constant 0 : i32
    return %c0_i32, %c0_i32_0 : i32, i32
  }
  func.func @transform_1(%arg0: i32) -> (i32, i32, i32) {
    %c0_i32 = arith.constant 0 : i32
    %c0_i32_0 = arith.constant 0 : i32
    %c0_i32_1 = arith.constant 0 : i32
    return %arg0, %c0_i32, %c0_i32_0 : i32, i32, i32
  }
  func.func @transform_2(%arg0: i32) -> (i32, i32, i32) {
    %c0_i32 = arith.constant 0 : i32
    %c0_i32_0 = arith.constant 0 : i32
    %c0_i32_1 = arith.constant 0 : i32
    return %arg0, %c0_i32, %c0_i32_0 : i32, i32, i32
  }
  func.func @transform_3(%arg0: i32) -> (i32, i32, i32) {
    %c0_i32 = arith.constant 0 : i32
    %c0_i32_0 = arith.constant 0 : i32
    %c0_i32_1 = arith.constant 0 : i32
    return %arg0, %c0_i32, %c0_i32_0 : i32, i32, i32
  }
  func.func @transform_4(%arg0: i32) -> (i32, i32) {
    %c0_i32 = arith.constant 0 : i32
    %c0_i32_0 = arith.constant 0 : i32
    %c0_i32_1 = arith.constant 0 : i32
    return %c0_i32, %c0_i32_0 : i32, i32
  }
  func.func @transform_5(%arg0: i32) -> (i32, i32) {
    %c0_i32 = arith.constant 0 : i32
    %c0_i32_0 = arith.constant 0 : i32
    %c0_i32_1 = arith.constant 0 : i32
    return %c0_i32, %c0_i32_0 : i32, i32
  }
  func.func @transform_6(%arg0: i32) -> (i32, i32) {
    %c0_i32 = arith.constant 0 : i32
    %c0_i32_0 = arith.constant 0 : i32
    %c0_i32_1 = arith.constant 0 : i32
    return %c0_i32, %c0_i32_0 : i32, i32
  }
}

</mosaic_0001>

<bundles_post_ra>
// kernel: tpu_custom_call.1
= control target key start
LH: loop header
LB: loop body
LE: loop exit
PB: predicated region body
PF: predicated region fallthrough
CT: control target
= control target key end

     0   :  { %s9921_s0 = inlined_call_operand.hbm [shape: f32[2,1024], index: 0, kind: input, shape index: {}]   ;;  %s9922_s1 = inlined_call_operand.hbm [shape: bf16[9,1024,1024], index: 1, kind: input, shape index: {}]   ;;  %s9923_s2 = inlined_call_operand.hbm [shape: f32[9,1,1024], index: 2, kind: input, shape index: {}]   ;;  %s9924_s3 = inlined_call_operand.hbm [shape: f32[9,1,1024], index: 3, kind: input, shape index: {}]   ;;  %s9925_s4 = inlined_call_operand.hbm [shape: bf16[1024,128], index: 4, kind: input, shape index: {}]   ;;  %s9926_s5 = inlined_call_operand.hbm [shape: f32[1,128], index: 5, kind: input, shape index: {}]   ;;  %s9927_s6 = inlined_call_operand.hbm [shape: f32[2,128], index: 6, kind: output, shape index: {}]  }
   0x1   :  { %9930 = sst [smem:[#allocation21_spill]] %s9921_s0 }
   0x2   :  { %9931 = sst [smem:[#allocation22_spill]] %s9922_s1 }
   0x3   :  { %11 = vsyncpa [#allocation4], 0 }
   0x4   :  { %12 = vsyncpa [#allocation7], 0 }
   0x5   :  { %14 = vsyncpa [#allocation7 + $0x1], 0 }
   0x6   :  { %15 = vsyncpa [#allocation10], 0 }
   0x7   :  { %17 = vsyncpa [#allocation10 + $0x1], 0 }
   0x8   :  { %18 = vsyncpa [#allocation13], 0 }
   0x9   :  { %19 = vsyncpa [#allocation5], 0  ;;  %s8546_s21 = smov 0   ;;  %s8548_s22 = smov 0  }
   0xa   :  { %s8550_s23 = smov 0   ;;  %s8552_s24 = smov 0  }
   0xb LB: > { %s8565_s25 = sadd.s32 4294967295, %s8501_s24   ;;  %p66_p0 = scmp.ne.s32.totalorder %s8493_s22, %s8489_s21  ;;  %s8501_s24 = sphi %s8552_s24, %s9943_s24   ;;  %s8497_s23 = sphi %s8550_s23, %s9942_s23   ;;  %s8493_s22 = sphi %s8548_s22, %s9941_s22   ;;  %s8489_s21 = sphi %s8546_s21, %s9940_s21  }
   0xc   : > { %p67_p1 = scmp.eq.s32.totalorder %s8565_s25, 0  ;;  %p5235_p2 = scmp.ge.s32.totalorder %s8501_s24, 1 }
   0xd   : > { %p192_p3 = scmp.lt.s32.totalorder %s8501_s24, 10  ;;  %p5236_p4 = scmp.ne.s32.totalorder %s8565_s25, 0 }
   0xe   : > { %p8574_p5 = por %p67_p1, %p66_p0  ;;  %s215_s29 = sshll.u32 %s9925_s4, 4  ;;  %s216_s29 = int_to_ptr.hbm [resolvable:$true] %s215_s29 }
   0xf   : > { %p8581_p6 = pnand %p5235_p2, %p192_p3  ;;  %s8503_s7 = smov [#allocation11]  }
  0x10   : > { %s217_s8 = sshll.u32 %s8503_s7, 4  ;;  %s8594_s10 = sadd.s32 1, %s8501_s24   ;;  %s218_s8 = int_to_ptr.vmem [resolvable:$true] %s217_s8 }
  0x11   : > { %p8165_p7 = pneg %p8581_p6  ;;  %s8504_s11 = smov 64  }
  0x12   : > { %s8505_s12 = smov 4   ;;  %s50_s13 = ssub.s32 %s8501_s24, %s8594_s10 }
  0x13   : > { %p8589_p8 = pnand %p8165_p7, %p67_p1  ;;  %s53_s14 = sadd.s32 1, %s8497_s23 }
  0x14   : > { %p51_p9 = scmp.eq.s32.totalorder %s50_s13, 0  ;;  %p60_p10 = scmp.ne.s32.totalorder %s8497_s23, %s8493_s22 }
  0x15   : > { %8171 = dma.hbm_to_vmem [thread:$0]  (!%p8589_p8), %s216_s29, 8192, %s218_s8, [#allocation10], %s8504_s11, %s8504_s11, %s8505_s12  }
  0x16   : > { %p61_p11 = scmp.eq.s32.totalorder %s8501_s24, 0  ;;  %p8188_p12 = scmp.lt.s32.totalorder %s8501_s24, 9 }
  0x17   : > { %s8606_s15 = scalar_select %p51_p9, %s8497_s23, %s53_s14  }
  0x18   : > { %p62_p13 = por %p61_p11, %p60_p10  ;;  %s9928_s16 = sand.u32 1, %s8501_s24  }
  0x19   : > { %s9929_s17 = sand.u32 1, %s8497_s23   ;;  %s7566_s19 = sshll.u32 %s8501_s24, 12 }
  0x1a   : > { %s5240_s18 = sshll.u32 %s9929_s17, 12  ;;  %s9935_s1 = sld [smem:[#allocation22_spill]] }
  0x1b   : > { %s247_s29 = scalar_lea.vmem [#allocation6], %s5240_s18  ;;  %p8618_p0 = pnand %p8188_p12, %p62_p13 }
  0x1c   : > { %s255_s7 = sshll.u32 %s247_s29, 4  ;;  %s9937_s0 = sld [smem:[#allocation21_spill]]  ;;  %s256_s7 = int_to_ptr.vmem [resolvable:$true] %s255_s7 }
  0x1d   : > { %s8627_s14 = scalar_lea.sflag [#allocation7], %s9928_s16  ;;  %p8273_p3 = pneg %p8618_p0 }
  0x20   : > { %s252_s27 = scalar_lea.hbm %s9935_s1, %s7566_s19 }
  0x21   : > { %s253_s28 = sshll.u32 %s252_s27, 4  ;;  %s8276_s27 = scalar_lea.hbm %s9935_s1, 36864  ;;  %s254_s28 = int_to_ptr.hbm [resolvable:$true] %s253_s28 }
  0x22   : > { %s204_s13 = sshll.u32 %s9937_s0, 4  ;;  %s8269_s19 = sshra.s32 %s254_s28, 4  ;;  %s205_s13 = int_to_ptr.hbm [resolvable:$true] %s204_s13  ;;  %s8270_s19 = int_to_ptr.hbm [resolvable:$true] %s8269_s19 }
  0x23   : > { %s8271_s18 = scalar_lea.hbm %s8270_s19, 4096  ;;  %p8277_p10 = scmp.lt.s32.totalorder %s8270_s19, %s9935_s1 }
  0x24   : > { %p8272_p2 = scmp.ne.s32.totalorder %s8270_s19, %s8271_s18  ;;  %p8278_p11 = scmp.lt.s32.totalorder %s8276_s27, %s8271_s18 }
  0x26   : > { %p8274_p7 = pnand %p8273_p3, %p8272_p2  ;;  %p8279_p12 = por %p8278_p11, %p8277_p10 }
  0x28   : > { %p8275_p9 = pneg %p8274_p7 }
  0x2a   : > { %p8280_p13 = pnand %p8279_p12, %p8275_p9 }
  0x2c   : > { %8283 = shalt.err (!%p8280_p13)
}
  0x2d   : > { %s8506_s12 = smov 512   ;;  %s8507_s16 = smov 32  }
  0x2e   : > { %8178 = dma.hbm_to_vmem [thread:$0]  (!%p8618_p0), %s254_s28, 65536, %s256_s7, %s8627_s14, %s8506_s12, %s8506_s12, %s8507_s16  }
  0x2f   : > { %s230_s17 = sshll.u32 %s9926_s5, 4  ;;  %s8508_s29 = smov [#allocation3]   ;;  %s231_s17 = int_to_ptr.hbm [resolvable:$true] %s230_s17 }
  0x30   : > { %s206_s19 = sshll.u32 %s8508_s29, 4  ;;  %s8509_s18 = smov [#allocation12]   ;;  %s207_s19 = int_to_ptr.vmem [resolvable:$true] %s206_s19 }
  0x31   : > { %8168 = dma.hbm_to_vmem [thread:$0]  (!%p8589_p8), %s205_s13, 256, %s207_s19, [#allocation4]  }
  0x32   : > { %s232_s27 = sshll.u32 %s8509_s18, 4  ;;  %s9938_s11 = sand.u32 1, %s8497_s23   ;;  %s233_s27 = int_to_ptr.vmem [resolvable:$true] %s232_s27 }
  0x33   : > { %s5243_s0 = sshll.u32 %s9938_s11, 3  ;;  %s5244_s1 = sshll.u32 %s8501_s24, 3 }
  0x34   : > { %8174 = dma.hbm_to_vmem [thread:$0]  (!%p8589_p8), %s231_s17, 16, %s233_s27, [#allocation13]  }
  0x35   : > { %s269_s16 = scalar_lea.vmem [#allocation8], %s5243_s0  ;;  %s273_s20 = scalar_lea.hbm %s9923_s2, %s5244_s1 }
  0x36   : > { %s277_s28 = sshll.u32 %s269_s16, 4  ;;  %s275_s21 = sshll.u32 %s273_s20, 4  ;;  %s278_s28 = int_to_ptr.vmem [resolvable:$true] %s277_s28  ;;  %s276_s21 = int_to_ptr.hbm [resolvable:$true] %s275_s21 }
  0x37   : > { %s8359_s29 = sshra.s32 %s276_s21, 4  ;;  %s8366_s19 = scalar_lea.hbm %s9923_s2, 72  ;;  %s8360_s29 = int_to_ptr.hbm [resolvable:$true] %s8359_s29 }
  0x38   : > { %s8361_s13 = scalar_lea.hbm %s8360_s29, 8  ;;  %p8367_p8 = scmp.lt.s32.totalorder %s8360_s29, %s9923_s2 }
  0x39   : > { %p8362_p2 = scmp.ne.s32.totalorder %s8360_s29, %s8361_s13  ;;  %p8368_p10 = scmp.lt.s32.totalorder %s8366_s19, %s8361_s13 }
  0x3b   : > { %p8364_p7 = pnand %p8362_p2, %p8273_p3  ;;  %p8369_p11 = por %p8368_p10, %p8367_p8 }
  0x3d   : > { %p8365_p9 = pneg %p8364_p7 }
  0x3f   : > { %p8370_p12 = pnand %p8369_p11, %p8365_p9 }
  0x41   : > { %8373 = shalt.err (!%p8370_p12)
}
  0x42   : > { %8181 = dma.hbm_to_vmem [thread:$0]  (!%p8618_p0), %s276_s21, 128, %s278_s28, %s8627_s14  }
  0x43   : > { %s292_s7 = scalar_lea.hbm %s9924_s3, %s5244_s1  ;;  %s288_s12 = scalar_lea.vmem [#allocation9], %s5243_s0 }
  0x44   : > { %s296_s20 = sshll.u32 %s288_s12, 4  ;;  %s294_s9 = sshll.u32 %s292_s7, 4  ;;  %s297_s20 = int_to_ptr.vmem [resolvable:$true] %s296_s20  ;;  %s295_s9 = int_to_ptr.hbm [resolvable:$true] %s294_s9 }
  0x45   : > { %s9939_s29 = sand.u32 1, %s8501_s24   ;;  %s8389_s17 = sshra.s32 %s295_s9, 4  ;;  %s8390_s17 = int_to_ptr.hbm [resolvable:$true] %s8389_s17 }
  0x46   : > { %s285_s13 = scalar_lea.sflag [#allocation10], %s9939_s29  ;;  %s8391_s19 = scalar_lea.hbm %s8390_s17, 8 }
  0x47   : > { %p8392_p13 = scmp.ne.s32.totalorder %s8390_s17, %s8391_s19  ;;  %s8396_s21 = scalar_lea.hbm %s9924_s3, 72 }
  0x48   : > { %p8397_p9 = scmp.lt.s32.totalorder %s8390_s17, %s9924_s3  ;;  %p8398_p8 = scmp.lt.s32.totalorder %s8396_s21, %s8391_s19 }
  0x49   : > { %p8394_p2 = pnand %p8392_p13, %p8273_p3 }
  0x4a   : > { %p8399_p10 = por %p8398_p8, %p8397_p9 }
  0x4b   : > { %p8395_p7 = pneg %p8394_p2 }
  0x4d   : > { %p8400_p11 = pnand %p8399_p10, %p8395_p7 }
  0x4f   : > { %8403 = shalt.err (!%p8400_p11)
}
  0x50   : > { %8184 = dma.hbm_to_vmem [thread:$0]  (!%p8618_p0), %s295_s9, 128, %s297_s20, %s285_s13  }
  0x51   : > { %305 = sbr.rel (%p8581_p6) target bundleno = 1280 (0x500), region = 44 }
  0x56   : > { %8464 = dma.done.wait (%p67_p1), [#allocation4], 256  }
  0x57   : > { %8466 = vsyncadd (%p67_p1), [#allocation4], 4294967040  ;;  %s312_s24 = sand.u32 1, %s8565_s25   ;;  %s314_s18 = sand.u32 1, %s8493_s22  }
  0x58   : > { %s5249_s27 = sshll.u32 %s314_s18, 12  ;;  %s313_s11 = scalar_lea.sflag [#allocation7], %s312_s24 }
  0x59   : > { %s8692_s16 = scalar_lea.vmem [#allocation6], %s5249_s27 }
  0x5a   : > { %8468 = dma.done.wait (%p8574_p5), %s313_s11, 65664  }
  0x5b   : > { %8470 = vsyncadd (%p8574_p5), %s313_s11, 4294901632  ;;  %s5250_s30 = sshll.u32 %s314_s18, 3  ;;  %s333_s7 = scalar_lea.sflag [#allocation10], %s312_s24 }
  0x5c   : > { %s8698_s8 = scalar_lea.vmem [#allocation8], %s5250_s30  ;;  %s8700_s12 = scalar_lea.vmem [#allocation9], %s5250_s30 }
  0x5d   : > { %8472 = dma.done.wait (%p8574_p5), %s333_s7, 128  }
  0x5e   : > { %8474 = vsyncadd (%p8574_p5), %s333_s7, 4294967168 }
  0x5f   : > { %8476 = dma.done.wait (%p67_p1), [#allocation10], 8192  }
  0x60   : > { %8478 = vsyncadd (%p67_p1), [#allocation10], 4294959104 }
  0x61   : > { %8480 = dma.done.wait (%p67_p1), [#allocation13], 16  }
  0x62   : > { %8482 = vsyncadd (%p67_p1), [#allocation13], 4294967280  ;;  %384 = sbr.rel (%p5236_p4) target bundleno = 106 (0x6a), region = 72 }
  0x67   : > { %v385_v0 = vld [vmem:[#allocation3] sm:$0xff]  ;;  %v386_v1 = vld [vmem:[#allocation3 + $0x8] sm:$0xff] }
  0x68   : > { %387 = vst [vmem:[#allocation2] sm:$0xff] %v385_v0 }
  0x69   : > { %388 = vst [vmem:[#allocation2 + $0x8] sm:$0xff] %v386_v1 }
  0x6a PF: > { %v5481_v2 = vld [vmem:[%s8692_s16 + $0x1c0] sm:$0xf] }
  0x6b   : > { %v7627_v3 = vld [vmem:[%s8692_s16 + $0x1dc] sm:$0xf0] }
  0x6c   : > { %v5737_v4 = vld [vmem:[%s8692_s16 + $0x3c0] sm:$0xf]  ;;  %v5482_v5 = vor.u32 %v7627_v3, %v5481_v2 }
  0x6d   : > { %v7691_v6 = vld [vmem:[%s8692_s16 + $0x3dc] sm:$0xf0] }
  0x6e   : > { %v5993_v7 = vld [vmem:[%s8692_s16 + $0x5c0] sm:$0xf]  ;;  %v5738_v9 = vor.u32 %v7691_v6, %v5737_v4  ;;  %3492 = vmatpush.bf16.msra.mxu0 %v5482_v5 }
  0x6f   : > { %v7755_v8 = vld [vmem:[%s8692_s16 + $0x5dc] sm:$0xf0] }
  0x70   : > { %v5994_v10 = vor.u32 %v7755_v8, %v5993_v7  ;;  %v6249_v11 = vld [vmem:[%s8692_s16 + $0x7c0] sm:$0xf]  ;;  %3505 = vmatpush.bf16.msra.mxu1 %v5738_v9 }
  0x71   : > { %v7819_v12 = vld [vmem:[%s8692_s16 + $0x7dc] sm:$0xf0] }
  0x72   : > { %v5449_v13 = vld [vmem:[%s8692_s16 + $0x180] sm:$0xf]  ;;  %v6250_v14 = vor.u32 %v7819_v12, %v6249_v11  ;;  %3518 = vmatpush.bf16.msra.mxu2 %v5994_v10 }
  0x73   : > { %v7619_v15 = vld [vmem:[%s8692_s16 + $0x19c] sm:$0xf0] }
  0x74   : > { %v5705_v16 = vld [vmem:[%s8692_s16 + $0x380] sm:$0xf]  ;;  %v5450_v18 = vor.u32 %v7619_v15, %v5449_v13  ;;  %3531 = vmatpush.bf16.msra.mxu3 %v6250_v14 }
  0x75   : > { %v7683_v17 = vld [vmem:[%s8692_s16 + $0x39c] sm:$0xf0] }
  0x76   : > { %v5706_v19 = vor.u32 %v7683_v17, %v5705_v16  ;;  %v5961_v20 = vld [vmem:[%s8692_s16 + $0x580] sm:$0xf]  ;;  %3493 = vmatpush.bf16.msra.mxu0 %v5450_v18 }
  0x77   : > { %v7747_v21 = vld [vmem:[%s8692_s16 + $0x59c] sm:$0xf0] }
  0x78   : > { %v6217_v22 = vld [vmem:[%s8692_s16 + $0x780] sm:$0xf]  ;;  %v5962_v23 = vor.u32 %v7747_v21, %v5961_v20  ;;  %3506 = vmatpush.bf16.msra.mxu1 %v5706_v19 }
  0x79   : > { %v7811_v24 = vld [vmem:[%s8692_s16 + $0x79c] sm:$0xf0] }
  0x7a   : > { %v5417_v25 = vld [vmem:[%s8692_s16 + $0x140] sm:$0xf]  ;;  %v6218_v27 = vor.u32 %v7811_v24, %v6217_v22  ;;  %3519 = vmatpush.bf16.msra.mxu2 %v5962_v23 }
  0x7b   : > { %v7611_v26 = vld [vmem:[%s8692_s16 + $0x15c] sm:$0xf0] }
  0x7c   : > { %v5673_v28 = vld [vmem:[%s8692_s16 + $0x340] sm:$0xf]  ;;  %v5418_v31 = vor.u32 %v7611_v26, %v5417_v25  ;;  %3532 = vmatpush.bf16.msra.mxu3 %v6218_v27 }
  0x7d   : > { %v7675_v29 = vld [vmem:[%s8692_s16 + $0x35c] sm:$0xf0] }
  0x7e   : > { %v5929_v30 = vld [vmem:[%s8692_s16 + $0x540] sm:$0xf]  ;;  %v5674_v35 = vor.u32 %v7675_v29, %v5673_v28  ;;  %3494 = vmatpush.bf16.msra.mxu0 %v5418_v31 }
  0x7f   : > { %v7739_v32 = vld [vmem:[%s8692_s16 + $0x55c] sm:$0xf0] }
  0x80   : > { %v6185_v33 = vld [vmem:[%s8692_s16 + $0x740] sm:$0xf]  ;;  %v5930_v36 = vor.u32 %v7739_v32, %v5929_v30  ;;  %3507 = vmatpush.bf16.msra.mxu1 %v5674_v35 }
  0x81   : > { %v7803_v34 = vld [vmem:[%s8692_s16 + $0x75c] sm:$0xf0] }
  0x82   : > { %v5385_v37 = vld [vmem:[%s8692_s16 + $0x100] sm:$0xf]  ;;  %v6186_v40 = vor.u32 %v7803_v34, %v6185_v33  ;;  %3520 = vmatpush.bf16.msra.mxu2 %v5930_v36 }
  0x83   : > { %v7603_v38 = vld [vmem:[%s8692_s16 + $0x11c] sm:$0xf0] }
  0x84   : > { %v5641_v39 = vld [vmem:[%s8692_s16 + $0x300] sm:$0xf]  ;;  %v5386_v46 = vor.u32 %v7603_v38, %v5385_v37  ;;  %3533 = vmatpush.bf16.msra.mxu3 %v6186_v40 }
  0x85   : > { %v7667_v41 = vld [vmem:[%s8692_s16 + $0x31c] sm:$0xf0] }
  0x86   : > { %v5897_v42 = vld [vmem:[%s8692_s16 + $0x500] sm:$0xf]  ;;  %v5642_v47 = vor.u32 %v7667_v41, %v5641_v39  ;;  %3495 = vmatpush.bf16.msra.mxu0 %v5386_v46 }
  0x87   : > { %v7731_v43 = vld [vmem:[%s8692_s16 + $0x51c] sm:$0xf0] }
  0x88   : > { %v6153_v44 = vld [vmem:[%s8692_s16 + $0x700] sm:$0xf]  ;;  %v5898_v48 = vor.u32 %v7731_v43, %v5897_v42  ;;  %3508 = vmatpush.bf16.msra.mxu1 %v5642_v47 }
  0x89   : > { %v7795_v45 = vld [vmem:[%s8692_s16 + $0x71c] sm:$0xf0] }
  0x8a   : > { %v5353_v49 = vld [vmem:[%s8692_s16 + $0xc0] sm:$0xf]  ;;  %v6154_v52 = vor.u32 %v7795_v45, %v6153_v44  ;;  %3521 = vmatpush.bf16.msra.mxu2 %v5898_v48 }
  0x8b   : > { %v7595_v50 = vld [vmem:[%s8692_s16 + $0xdc] sm:$0xf0] }
  0x8c   : > { %v5609_v51 = vld [vmem:[%s8692_s16 + $0x2c0] sm:$0xf]  ;;  %v5354_v58 = vor.u32 %v7595_v50, %v5353_v49  ;;  %3534 = vmatpush.bf16.msra.mxu3 %v6154_v52 }
  0x8d   : > { %v7659_v53 = vld [vmem:[%s8692_s16 + $0x2dc] sm:$0xf0] }
  0x8e   : > { %v5865_v54 = vld [vmem:[%s8692_s16 + $0x4c0] sm:$0xf]  ;;  %v5610_v59 = vor.u32 %v7659_v53, %v5609_v51  ;;  %3496 = vmatpush.bf16.msra.mxu0 %v5354_v58 }
  0x8f   : > { %v7723_v55 = vld [vmem:[%s8692_s16 + $0x4dc] sm:$0xf0] }
  0x90   : > { %v6121_v56 = vld [vmem:[%s8692_s16 + $0x6c0] sm:$0xf]  ;;  %v5866_v60 = vor.u32 %v7723_v55, %v5865_v54  ;;  %3509 = vmatpush.bf16.msra.mxu1 %v5610_v59 }
  0x91   : > { %v7787_v57 = vld [vmem:[%s8692_s16 + $0x6dc] sm:$0xf0] }
  0x92   : > { %v5321_v61 = vld [vmem:[%s8692_s16 + $0x80] sm:$0xf]  ;;  %v6122_v0 = vor.u32 %v7787_v57, %v6121_v56  ;;  %3522 = vmatpush.bf16.msra.mxu2 %v5866_v60 }
  0x93   : > { %v7587_v62 = vld [vmem:[%s8692_s16 + $0x9c] sm:$0xf0] }
  0x94   : > { %v5577_v63 = vld [vmem:[%s8692_s16 + $0x280] sm:$0xf]  ;;  %v5322_v6 = vor.u32 %v7587_v62, %v5321_v61  ;;  %3535 = vmatpush.bf16.msra.mxu3 %v6122_v0 }
  0x95   : > { %v7651_v1 = vld [vmem:[%s8692_s16 + $0x29c] sm:$0xf0] }
  0x96   : > { %v5833_v2 = vld [vmem:[%s8692_s16 + $0x480] sm:$0xf]  ;;  %v5578_v7 = vor.u32 %v7651_v1, %v5577_v63  ;;  %3497 = vmatpush.bf16.msra.mxu0 %v5322_v6 }
  0x97   : > { %v7715_v3 = vld [vmem:[%s8692_s16 + $0x49c] sm:$0xf0] }
  0x98   : > { %v6089_v4 = vld [vmem:[%s8692_s16 + $0x680] sm:$0xf]  ;;  %v5834_v8 = vor.u32 %v7715_v3, %v5833_v2  ;;  %3510 = vmatpush.bf16.msra.mxu1 %v5578_v7 }
  0x99   : > { %v7779_v5 = vld [vmem:[%s8692_s16 + $0x69c] sm:$0xf0] }
  0x9a   : > { %v5289_v9 = vld [vmem:[%s8692_s16 + $0x40] sm:$0xf]  ;;  %v6090_v12 = vor.u32 %v7779_v5, %v6089_v4  ;;  %3523 = vmatpush.bf16.msra.mxu2 %v5834_v8 }
  0x9b   : > { %v7579_v10 = vld [vmem:[%s8692_s16 + $0x5c] sm:$0xf0] }
  0x9c   : > { %v5545_v11 = vld [vmem:[%s8692_s16 + $0x240] sm:$0xf]  ;;  %v5290_v18 = vor.u32 %v7579_v10, %v5289_v9  ;;  %3536 = vmatpush.bf16.msra.mxu3 %v6090_v12 }
  0x9d   : > { %v7643_v13 = vld [vmem:[%s8692_s16 + $0x25c] sm:$0xf0] }
  0x9e   : > { %v5801_v14 = vld [vmem:[%s8692_s16 + $0x440] sm:$0xf]  ;;  %v5546_v21 = vor.u32 %v7643_v13, %v5545_v11  ;;  %3498 = vmatpush.bf16.msra.mxu0 %v5290_v18 }
  0x9f   : > { %v7707_v15 = vld [vmem:[%s8692_s16 + $0x45c] sm:$0xf0] }
  0xa0   : > { %v6057_v16 = vld [vmem:[%s8692_s16 + $0x640] sm:$0xf]  ;;  %v5802_v22 = vor.u32 %v7707_v15, %v5801_v14  ;;  %3511 = vmatpush.bf16.msra.mxu1 %v5546_v21 }
  0xa1   : > { %v7771_v17 = vld [vmem:[%s8692_s16 + $0x65c] sm:$0xf0] }
  0xa2   : > { %v5257_v19 = vld [vmem:[%s8692_s16] sm:$0xf]  ;;  %v6058_v26 = vor.u32 %v7771_v17, %v6057_v16  ;;  %3524 = vmatpush.bf16.msra.mxu2 %v5802_v22 }
  0xa3   : > { %v7571_v20 = vld [vmem:[%s8692_s16 + $0x1c] sm:$0xf0] }
  0xa4   : > { %v5513_v23 = vld [vmem:[%s8692_s16 + $0x200] sm:$0xf]  ;;  %v5258_v33 = vor.u32 %v7571_v20, %v5257_v19  ;;  %3537 = vmatpush.bf16.msra.mxu3 %v6058_v26 }
  0xa5   : > { %v7635_v24 = vld [vmem:[%s8692_s16 + $0x21c] sm:$0xf0] }
  0xa6   : > { %v5769_v25 = vld [vmem:[%s8692_s16 + $0x400] sm:$0xf]  ;;  %v5514_v37 = vor.u32 %v7635_v24, %v5513_v23  ;;  %3499 = vmatpush.bf16.msra.mxu0 %v5258_v33 }
  0xa7   : > { %v7699_v27 = vld [vmem:[%s8692_s16 + $0x41c] sm:$0xf0] }
  0xa8   : > { %v6025_v28 = vld [vmem:[%s8692_s16 + $0x600] sm:$0xf]  ;;  %v5770_v38 = vor.u32 %v7699_v27, %v5769_v25  ;;  %3512 = vmatpush.bf16.msra.mxu1 %v5514_v37 }
  0xa9   : > { %v7763_v29 = vld [vmem:[%s8692_s16 + $0x61c] sm:$0xf0] }
  0xaa   : > { %v6505_v30 = vld [vmem:[%s8692_s16 + $0x9c0] sm:$0xf]  ;;  %v6026_v41 = vor.u32 %v7763_v29, %v6025_v28  ;;  %3525 = vmatpush.bf16.msra.mxu2 %v5770_v38 }
  0xab   : > { %v7883_v31 = vld [vmem:[%s8692_s16 + $0x9dc] sm:$0xf0] }
  0xac   : > { %v6761_v32 = vld [vmem:[%s8692_s16 + $0xbc0] sm:$0xf]  ;;  %v6506_v42 = vor.u32 %v7883_v31, %v6505_v30  ;;  %3538 = vmatpush.bf16.msra.mxu3 %v6026_v41 }
  0xad   : > { %v7947_v34 = vld [vmem:[%s8692_s16 + $0xbdc] sm:$0xf0] }
  0xae   : > { %v7017_v35 = vld [vmem:[%s8692_s16 + $0xdc0] sm:$0xf]  ;;  %v6762_v43 = vor.u32 %v7947_v34, %v6761_v32  ;;  %3544 = vmatpush.bf16.msrb.mxu0 %v6506_v42 }
  0xaf   : > { %v8011_v36 = vld [vmem:[%s8692_s16 + $0xddc] sm:$0xf0] }
  0xb0   : > { %v7273_v39 = vld [vmem:[%s8692_s16 + $0xfc0] sm:$0xf]  ;;  %v7018_v44 = vor.u32 %v8011_v36, %v7017_v35  ;;  %3557 = vmatpush.bf16.msrb.mxu1 %v6762_v43 }
  0xb1   : > { %v8075_v40 = vld [vmem:[%s8692_s16 + $0xfdc] sm:$0xf0] }
  0xb2   : > { %v6473_v45 = vld [vmem:[%s8692_s16 + $0x980] sm:$0xf]  ;;  %v7274_v48 = vor.u32 %v8075_v40, %v7273_v39  ;;  %3570 = vmatpush.bf16.msrb.mxu2 %v7018_v44 }
  0xb3   : > { %v7875_v46 = vld [vmem:[%s8692_s16 + $0x99c] sm:$0xf0] }
  0xb4   : > { %v6729_v47 = vld [vmem:[%s8692_s16 + $0xb80] sm:$0xf]  ;;  %v6474_v54 = vor.u32 %v7875_v46, %v6473_v45  ;;  %3583 = vmatpush.bf16.msrb.mxu3 %v7274_v48 }
  0xb5   : > { %v7939_v49 = vld [vmem:[%s8692_s16 + $0xb9c] sm:$0xf0] }
  0xb6   : > { %v6985_v50 = vld [vmem:[%s8692_s16 + $0xd80] sm:$0xf]  ;;  %v6730_v57 = vor.u32 %v7939_v49, %v6729_v47  ;;  %3545 = vmatpush.bf16.msrb.mxu0 %v6474_v54  ;;  %v390_v54 = vld [vmem:[#allocation2 + $0x8] sm:$0xff] }
  0xb7   : > { %v8003_v51 = vld [vmem:[%s8692_s16 + $0xd9c] sm:$0xf0]  ;;  %395 = vst [vmem:[#allocation1 + $0x20] ss:$4 sm:$0xff] %v390_v54  ;;  %v7799_v54 = vld [vmem:[%s8692_s16 + $0x744] sm:$0xf] }
  0xb8   : > { %v7241_v52 = vld [vmem:[%s8692_s16 + $0xf80] sm:$0xf]  ;;  %v6986_v58 = vor.u32 %v8003_v51, %v6985_v50  ;;  %3558 = vmatpush.bf16.msrb.mxu1 %v6730_v57 }
  0xb9   : > { %v8067_v53 = vld [vmem:[%s8692_s16 + $0xf9c] sm:$0xf0] }
  0xba   : > { %v6441_v55 = vld [vmem:[%s8692_s16 + $0x940] sm:$0xf]  ;;  %v7242_v62 = vor.u32 %v8067_v53, %v7241_v52  ;;  %3571 = vmatpush.bf16.msrb.mxu2 %v6986_v58 }
  0xbb   : > { %v7867_v56 = vld [vmem:[%s8692_s16 + $0x95c] sm:$0xf0] }
  0xbc   : > { %v6697_v59 = vld [vmem:[%s8692_s16 + $0xb40] sm:$0xf]  ;;  %v6442_v3 = vor.u32 %v7867_v56, %v6441_v55  ;;  %3584 = vmatpush.bf16.msrb.mxu3 %v7242_v62 }
  0xbd   : > { %v7931_v60 = vld [vmem:[%s8692_s16 + $0xb5c] sm:$0xf0] }
  0xbe   : > { %v389_v61 = vld [vmem:[#allocation2] sm:$0xff]  ;;  %v6698_v5 = vor.u32 %v7931_v60, %v6697_v59  ;;  %3546 = vmatpush.bf16.msrb.mxu0 %v6442_v3 }
  0xbf   : > { %v6953_v63 = vld [vmem:[%s8692_s16 + $0xd40] sm:$0xf]  ;;  %393 = vst [vmem:[#allocation1] ss:$4 sm:$0xff] %v389_v61 }
  0xc0   : > { %v7995_v0 = vld [vmem:[%s8692_s16 + $0xd5c] sm:$0xf0]  ;;  %3559 = vmatpush.bf16.msrb.mxu1 %v6698_v5 }
  0xc1   : > { %v7209_v1 = vld [vmem:[%s8692_s16 + $0xf40] sm:$0xf]  ;;  %v6954_v6 = vor.u32 %v7995_v0, %v6953_v63 }
  0xc2   : > { %v8059_v2 = vld [vmem:[%s8692_s16 + $0xf5c] sm:$0xf0] }
  0xc3   : > { %v6409_v4 = vld [vmem:[%s8692_s16 + $0x900] sm:$0xf]  ;;  %v7210_v10 = vor.u32 %v8059_v2, %v7209_v1  ;;  %3572 = vmatpush.bf16.msrb.mxu2 %v6954_v6 }
  0xc4   : > { %v7859_v7 = vld [vmem:[%s8692_s16 + $0x91c] sm:$0xf0] }
  0xc5   : > { %v6665_v8 = vld [vmem:[%s8692_s16 + $0xb00] sm:$0xf]  ;;  %v6410_v17 = vor.u32 %v7859_v7, %v6409_v4  ;;  %3585 = vmatpush.bf16.msrb.mxu3 %v7210_v10  ;;  %v7687_v10 = vld [vmem:[%s8692_s16 + $0x3c4] sm:$0xf] }
  0xc6   : > { %v7923_v9 = vld [vmem:[%s8692_s16 + $0xb1c] sm:$0xf0]  ;;  %v398_v24 = vld.sshfl [vmem:[#allocation1 + $0x10] sm:$0xff pattern:$0x73625140] }
  0xc7   : > { %v6921_v11 = vld [vmem:[%s8692_s16 + $0xd00] sm:$0xf]  ;;  %v6666_v22 = vor.u32 %v7923_v9, %v6665_v8  ;;  %v396_v25 = vld.sshfl [vmem:[#allocation1] sm:$0xff pattern:$0x73625140]  ;;  %v8818_v27 = vpack.c.bf16 %v398_v24, %v398_v24  ;;  %3547 = vmatpush.bf16.msrb.mxu0 %v6410_v17 }
  0xc8   : > { %v7987_v12 = vld [vmem:[%s8692_s16 + $0xd1c] sm:$0xf0]  ;;  %v8820_v28 = vpack.c.bf16 %v396_v25, %v396_v25  ;;  %v399_v29 = vld.sshfl [vmem:[#allocation1 + $0x18] sm:$0xff pattern:$0x73625140] }
  0xc9   : > { %v7177_v13 = vld [vmem:[%s8692_s16 + $0xf00] sm:$0xf]  ;;  %v6922_v23 = vor.u32 %v7987_v12, %v6921_v11  ;;  %v8824_v33 = vpack.c.bf16 %v399_v29, %v399_v29  ;;  %3526 = vmatmul.bf16.vlgmr.msra.gmra.mxu2 %v8818_v27  ;;  %3560 = vmatpush.bf16.msrb.mxu1 %v6666_v22  ;;  %v7623_v8 = vld [vmem:[%s8692_s16 + $0x1c4] sm:$0xf] }
  0xca   : > { %v8051_v14 = vld [vmem:[%s8692_s16 + $0xf1c] sm:$0xf0]  ;;  %3500 = vmatmul.bf16.vlgmr.msra.gmra.mxu0 %v8820_v28  ;;  %v5483_v9 = vld [vmem:[%s8692_s16 + $0x1e0] sm:$0xf0] }
  0xcb   : > { %v6377_v15 = vld [vmem:[%s8692_s16 + $0x8c0] sm:$0xf]  ;;  %v7178_v26 = vor.u32 %v8051_v14, %v7177_v13  ;;  %3573 = vmatpush.bf16.msrb.mxu2 %v6922_v23  ;;  %3539 = vmatmul.bf16.vlgmr.msra.gmra.mxu3 %v8824_v33  ;;  %v5739_v11 = vld [vmem:[%s8692_s16 + $0x3e0] sm:$0xf0]  ;;  %v5486_v23 = vor.u32 %v7623_v8, %v5483_v9 }
  0xcc   : > { %v7851_v16 = vld [vmem:[%s8692_s16 + $0x8dc] sm:$0xf0]  ;;  %v7751_v12 = vld [vmem:[%s8692_s16 + $0x5c4] sm:$0xf] }
  0xcd   : > { %v6633_v18 = vld [vmem:[%s8692_s16 + $0xac0] sm:$0xf]  ;;  %v6378_v35 = vor.u32 %v7851_v16, %v6377_v15  ;;  %3586 = vmatpush.bf16.msrb.mxu3 %v7178_v26  ;;  %v5995_v14 = vld [vmem:[%s8692_s16 + $0x5e0] sm:$0xf0]  ;;  %v5742_v26 = vor.u32 %v7687_v10, %v5739_v11 }
  0xce   : > { %v7915_v19 = vld [vmem:[%s8692_s16 + $0xadc] sm:$0xf0]  ;;  %v7815_v15 = vld [vmem:[%s8692_s16 + $0x7c4] sm:$0xf]  ;;  %v5998_v29 = vor.u32 %v7751_v12, %v5995_v14 }
  0xcf   : > { %v6889_v20 = vld [vmem:[%s8692_s16 + $0xcc0] sm:$0xf]  ;;  %v6634_v36 = vor.u32 %v7915_v19, %v6633_v18  ;;  %3548 = vmatpush.bf16.msrb.mxu0 %v6378_v35  ;;  %v6251_v16 = vld [vmem:[%s8692_s16 + $0x7e0] sm:$0xf0] }
  0xd0   : > { %v7979_v21 = vld [vmem:[%s8692_s16 + $0xcdc] sm:$0xf0]  ;;  %v7615_v19 = vld [vmem:[%s8692_s16 + $0x184] sm:$0xf] }
  0xd1   : > { %v397_v30 = vld.sshfl [vmem:[#allocation1 + $0x8] sm:$0xff pattern:$0x73625140]  ;;  %v6890_v37 = vor.u32 %v7979_v21, %v6889_v20  ;;  %3561 = vmatpush.bf16.msrb.mxu1 %v6634_v36  ;;  %v402_v21 = vld.sshfl [vmem:[#allocation1 + $0x30] sm:$0xff pattern:$0x73625140] }
  0xd2   : > { %v7145_v31 = vld [vmem:[%s8692_s16 + $0xec0] sm:$0xf]  ;;  %v8826_v34 = vpack.c.bf16 %v397_v30, %v397_v30  ;;  %v5451_v20 = vld [vmem:[%s8692_s16 + $0x1a0] sm:$0xf0] }
  0xd3   : > { %v8043_v32 = vld [vmem:[%s8692_s16 + $0xedc] sm:$0xf0]  ;;  %3574 = vmatpush.bf16.msrb.mxu2 %v6890_v37  ;;  %v400_v24 = vld.sshfl [vmem:[#allocation1 + $0x20] sm:$0xff pattern:$0x73625140] }
  0xd4   : > { %v6345_v38 = vld [vmem:[%s8692_s16 + $0x880] sm:$0xf]  ;;  %v7146_v41 = vor.u32 %v8043_v32, %v7145_v31  ;;  %3513 = vmatmul.bf16.vlgmr.msra.gmra.mxu1 %v8826_v34  ;;  %v403_v25 = vld.sshfl [vmem:[#allocation1 + $0x38] sm:$0xff pattern:$0x73625140]  ;;  %v6254_v32 = vor.u32 %v7815_v15, %v6251_v16 }
  0xd5   : > { %v7843_v39 = vld [vmem:[%s8692_s16 + $0x89c] sm:$0xf0]  ;;  %v7679_v30 = vld [vmem:[%s8692_s16 + $0x384] sm:$0xf] }
  0xd6   : > { %v6601_v40 = vld [vmem:[%s8692_s16 + $0xa80] sm:$0xf]  ;;  %v6346_v47 = vor.u32 %v7843_v39, %v6345_v38  ;;  %3587 = vmatpush.bf16.msrb.mxu3 %v7146_v41  ;;  %v5707_v35 = vld [vmem:[%s8692_s16 + $0x3a0] sm:$0xf0]  ;;  %v8870_v38 = vpack.c.bf16 %v402_v21, %v402_v21  ;;  %v8874_v41 = vpack.c.bf16 %v400_v24, %v400_v24 }
  0xd7   : > { %v7907_v42 = vld [vmem:[%s8692_s16 + $0xa9c] sm:$0xf0]  ;;  %v7743_v36 = vld [vmem:[%s8692_s16 + $0x584] sm:$0xf] }
  0xd8   : > { %v6857_v43 = vld [vmem:[%s8692_s16 + $0xc80] sm:$0xf]  ;;  %v6602_v50 = vor.u32 %v7907_v42, %v6601_v40  ;;  %3549 = vmatpush.bf16.msrb.mxu0 %v6346_v47  ;;  %v5963_v37 = vld [vmem:[%s8692_s16 + $0x5a0] sm:$0xf0]  ;;  %v8876_v42 = vpack.c.bf16 %v403_v25, %v403_v25 }
  0xd9   : > { %v7971_v44 = vld [vmem:[%s8692_s16 + $0xc9c] sm:$0xf0]  ;;  %v7807_v39 = vld [vmem:[%s8692_s16 + $0x784] sm:$0xf] }
  0xda   : > { %v7113_v45 = vld [vmem:[%s8692_s16 + $0xe80] sm:$0xf]  ;;  %v6858_v51 = vor.u32 %v7971_v44, %v6857_v43  ;;  %3562 = vmatpush.bf16.msrb.mxu1 %v6602_v50  ;;  %v6219_v40 = vld [vmem:[%s8692_s16 + $0x7a0] sm:$0xf0]  ;;  %v5454_v43 = vor.u32 %v7615_v19, %v5451_v20 }
  0xdb   : > { %v8035_v46 = vld [vmem:[%s8692_s16 + $0xe9c] sm:$0xf0]  ;;  %v7607_v47 = vld [vmem:[%s8692_s16 + $0x144] sm:$0xf]  ;;  %v6222_v50 = vor.u32 %v7807_v39, %v6219_v40 }
  0xdc   : > { %v6313_v48 = vld [vmem:[%s8692_s16 + $0x840] sm:$0xf]  ;;  %v7114_v55 = vor.u32 %v8035_v46, %v7113_v45  ;;  %3575 = vmatpush.bf16.msrb.mxu2 %v6858_v51  ;;  %v5710_v45 = vor.u32 %v7679_v30, %v5707_v35  ;;  %v5966_v46 = vor.u32 %v7743_v36, %v5963_v37  ;;  %v5675_v51 = vld [vmem:[%s8692_s16 + $0x360] sm:$0xf0] }
  0xdd   : > { %v7835_v49 = vld [vmem:[%s8692_s16 + $0x85c] sm:$0xf0]  ;;  %v5355_v8 = vld [vmem:[%s8692_s16 + $0xe0] sm:$0xf0] }
  0xde   : > { %v6569_v52 = vld [vmem:[%s8692_s16 + $0xa40] sm:$0xf]  ;;  %v6314_v61 = vor.u32 %v7835_v49, %v6313_v48  ;;  %3588 = vmatpush.bf16.msrb.mxu3 %v7114_v55  ;;  %v5419_v48 = vld [vmem:[%s8692_s16 + $0x160] sm:$0xf0] }
  0xdf   : > { %v7899_v53 = vld [vmem:[%s8692_s16 + $0xa5c] sm:$0xf0]  ;;  %v7671_v49 = vld [vmem:[%s8692_s16 + $0x344] sm:$0xf] }
  0xe0   : > { %v6825_v56 = vld [vmem:[%s8692_s16 + $0xc40] sm:$0xf]  ;;  %v6570_v1 = vor.u32 %v7899_v53, %v6569_v52  ;;  %3550 = vmatpush.bf16.msrb.mxu0 %v6314_v61  ;;  %v7735_v52 = vld [vmem:[%s8692_s16 + $0x544] sm:$0xf] }
  0xe1   : > { %v7963_v57 = vld [vmem:[%s8692_s16 + $0xc5c] sm:$0xf0]  ;;  %v5931_v53 = vld [vmem:[%s8692_s16 + $0x560] sm:$0xf0] }
  0xe2   : > { %v7081_v58 = vld [vmem:[%s8692_s16 + $0xe40] sm:$0xf]  ;;  %v6826_v2 = vor.u32 %v7963_v57, %v6825_v56  ;;  %3563 = vmatpush.bf16.msrb.mxu1 %v6570_v1  ;;  %v6187_v55 = vld [vmem:[%s8692_s16 + $0x760] sm:$0xf0]  ;;  %v5422_v56 = vor.u32 %v7607_v47, %v5419_v48  ;;  %v5678_v57 = vor.u32 %v7671_v49, %v5675_v51 }
  0xe3   : > { %v8027_v59 = vld [vmem:[%s8692_s16 + $0xe5c] sm:$0xf0]  ;;  %v7663_v61 = vld [vmem:[%s8692_s16 + $0x304] sm:$0xf] }
  0xe4   : > { %v6281_v60 = vld [vmem:[%s8692_s16 + $0x800] sm:$0xf]  ;;  %v7082_v6 = vor.u32 %v8027_v59, %v7081_v58  ;;  %3576 = vmatpush.bf16.msrb.mxu2 %v6826_v2  ;;  %v5934_v58 = vor.u32 %v7735_v52, %v5931_v53  ;;  %v7599_v59 = vld [vmem:[%s8692_s16 + $0x104] sm:$0xf] }
  0xe5   : > { %v7827_v62 = vld [vmem:[%s8692_s16 + $0x81c] sm:$0xf0]  ;;  %v5899_v1 = vld [vmem:[%s8692_s16 + $0x520] sm:$0xf0] }
  0xe6   : > { %v6537_v63 = vld [vmem:[%s8692_s16 + $0xa00] sm:$0xf]  ;;  %v6282_v13 = vor.u32 %v7827_v62, %v6281_v60  ;;  %3589 = vmatpush.bf16.msrb.mxu3 %v7082_v6  ;;  %v5387_v60 = vld [vmem:[%s8692_s16 + $0x120] sm:$0xf0]  ;;  %v6190_v62 = vor.u32 %v7799_v54, %v6187_v55 }
  0xe7   : > { %v7891_v0 = vld [vmem:[%s8692_s16 + $0xa1c] sm:$0xf0]  ;;  %v7791_v2 = vld [vmem:[%s8692_s16 + $0x704] sm:$0xf] }
  0xe8   : > { %v6793_v3 = vld [vmem:[%s8692_s16 + $0xc00] sm:$0xf]  ;;  %v6538_v17 = vor.u32 %v7891_v0, %v6537_v63  ;;  %3551 = vmatpush.bf16.msrb.mxu0 %v6282_v13  ;;  %v5643_v63 = vld [vmem:[%s8692_s16 + $0x320] sm:$0xf0] }
  0xe9   : > { %v7955_v4 = vld [vmem:[%s8692_s16 + $0xc1c] sm:$0xf0]  ;;  %v7727_v0 = vld [vmem:[%s8692_s16 + $0x504] sm:$0xf] }
  0xea   : > { %v7049_v5 = vld [vmem:[%s8692_s16 + $0xe00] sm:$0xf]  ;;  %v6794_v18 = vor.u32 %v7955_v4, %v6793_v3  ;;  %3564 = vmatpush.bf16.msrb.mxu1 %v6538_v17  ;;  %v6155_v3 = vld [vmem:[%s8692_s16 + $0x720] sm:$0xf0]  ;;  %v5390_v4 = vor.u32 %v7599_v59, %v5387_v60  ;;  %v5902_v6 = vor.u32 %v7727_v0, %v5899_v1 }
  0xeb   : > { %v8019_v7 = vld [vmem:[%s8692_s16 + $0xe1c] sm:$0xf0]  ;;  %3552 = vmatmul.bf16.vlgmr.msrb.gmra.mxu0 %v8874_v41  ;;  %v7655_v9 = vld [vmem:[%s8692_s16 + $0x2c4] sm:$0xf]  ;;  %v6158_v10 = vor.u32 %v7791_v2, %v6155_v3 }
  0xec   : > { %v7050_v22 = vor.u32 %v8019_v7, %v7049_v5  ;;  %v401_v31 = vld.sshfl [vmem:[#allocation1 + $0x28] sm:$0xff pattern:$0x73625140]  ;;  %3577 = vmatpush.bf16.msrb.mxu2 %v6794_v18  ;;  %3596 = vmatpush.bf16.msra.mxu0 %v5486_v23  ;;  %v5646_v5 = vor.u32 %v7663_v61, %v5643_v63 }
  0xed   : > { %v8878_v44 = vpack.c.bf16 %v401_v31, %v401_v31  ;;  %v7591_v7 = vld [vmem:[%s8692_s16 + $0xc4] sm:$0xf] }
  0xee   : > { %3590 = vmatpush.bf16.msrb.mxu3 %v7050_v22  ;;  %3609 = vmatpush.bf16.msra.mxu1 %v5742_v26  ;;  %v5611_v11 = vld [vmem:[%s8692_s16 + $0x2e0] sm:$0xf0]  ;;  %v5358_v16 = vor.u32 %v7591_v7, %v5355_v8 }
  0xef   : > { %3578 = vmatmul.bf16.vlgmr.msrb.gmra.mxu2 %v8870_v38  ;;  %3565 = vmatmul.bf16.vlgmr.msrb.gmra.mxu1 %v8878_v44  ;;  %v7719_v12 = vld [vmem:[%s8692_s16 + $0x4c4] sm:$0xf]  ;;  %v5614_v17 = vor.u32 %v7655_v9, %v5611_v11 }
  0xf0   : > { %3622 = vmatpush.bf16.msra.mxu2 %v5998_v29  ;;  %3597 = vmatpush.bf16.msra.mxu0 %v5454_v43  ;;  %v5867_v13 = vld [vmem:[%s8692_s16 + $0x4e0] sm:$0xf0] }
  0xf1   : > { %3591 = vmatmul.bf16.vlgmr.msrb.gmra.mxu3 %v8876_v42  ;;  %v7783_v14 = vld [vmem:[%s8692_s16 + $0x6c4] sm:$0xf]  ;;  %v5870_v18 = vor.u32 %v7719_v12, %v5867_v13 }
  0xf2   : > { %3635 = vmatpush.bf16.msra.mxu3 %v6254_v32  ;;  %3610 = vmatpush.bf16.msra.mxu1 %v5710_v45  ;;  %v6123_v15 = vld [vmem:[%s8692_s16 + $0x6e0] sm:$0xf0] }
  0xf3   : > { %v7583_v19 = vld [vmem:[%s8692_s16 + $0x84] sm:$0xf]  ;;  %v6126_v22 = vor.u32 %v7783_v14, %v6123_v15 }
  0xf4   : > { %3623 = vmatpush.bf16.msra.mxu2 %v5966_v46  ;;  %3598 = vmatpush.bf16.msra.mxu0 %v5422_v56  ;;  %v5323_v20 = vld [vmem:[%s8692_s16 + $0xa0] sm:$0xf0] }
  0xf5   : > { %v7647_v21 = vld [vmem:[%s8692_s16 + $0x284] sm:$0xf]  ;;  %v5326_v30 = vor.u32 %v7583_v19, %v5323_v20 }
  0xf6   : > { %3636 = vmatpush.bf16.msra.mxu3 %v6222_v50  ;;  %3611 = vmatpush.bf16.msra.mxu1 %v5678_v57  ;;  %v5579_v23 = vld [vmem:[%s8692_s16 + $0x2a0] sm:$0xf0] }
  0xf7   : > { %v7711_v24 = vld [vmem:[%s8692_s16 + $0x484] sm:$0xf]  ;;  %v5582_v31 = vor.u32 %v7647_v21, %v5579_v23 }
  0xf8   : > { %3624 = vmatpush.bf16.msra.mxu2 %v5934_v58  ;;  %3599 = vmatpush.bf16.msra.mxu0 %v5390_v4  ;;  %v5835_v25 = vld [vmem:[%s8692_s16 + $0x4a0] sm:$0xf0] }
  0xf9   : > { %v7775_v26 = vld [vmem:[%s8692_s16 + $0x684] sm:$0xf]  ;;  %v5838_v32 = vor.u32 %v7711_v24, %v5835_v25 }
  0xfa   : > { %3637 = vmatpush.bf16.msra.mxu3 %v6190_v62  ;;  %3612 = vmatpush.bf16.msra.mxu1 %v5646_v5  ;;  %v6091_v29 = vld [vmem:[%s8692_s16 + $0x6a0] sm:$0xf0] }
  0xfb   : > { %v7575_v35 = vld [vmem:[%s8692_s16 + $0x44] sm:$0xf]  ;;  %v6094_v39 = vor.u32 %v7775_v26, %v6091_v29 }
  0xfc   : > { %3625 = vmatpush.bf16.msra.mxu2 %v5902_v6  ;;  %3600 = vmatpush.bf16.msra.mxu0 %v5358_v16  ;;  %v5291_v36 = vld [vmem:[%s8692_s16 + $0x60] sm:$0xf0] }
  0xfd   : > { %v7639_v37 = vld [vmem:[%s8692_s16 + $0x244] sm:$0xf]  ;;  %v5294_v48 = vor.u32 %v7575_v35, %v5291_v36 }
  0xfe   : > { %3638 = vmatpush.bf16.msra.mxu3 %v6158_v10  ;;  %3613 = vmatpush.bf16.msra.mxu1 %v5614_v17  ;;  %v5547_v40 = vld [vmem:[%s8692_s16 + $0x260] sm:$0xf0] }
  0xff   : > { %v7703_v43 = vld [vmem:[%s8692_s16 + $0x444] sm:$0xf]  ;;  %v5550_v51 = vor.u32 %v7639_v37, %v5547_v40 }
 0x100   : > { %3626 = vmatpush.bf16.msra.mxu2 %v5870_v18  ;;  %v5803_v45 = vld [vmem:[%s8692_s16 + $0x460] sm:$0xf0]  ;;  %3601 = vmatpush.bf16.msra.mxu0 %v5326_v30 }
 0x101   : > { %v7767_v46 = vld [vmem:[%s8692_s16 + $0x644] sm:$0xf]  ;;  %v5806_v52 = vor.u32 %v7703_v43, %v5803_v45 }
 0x102   : > { %3639 = vmatpush.bf16.msra.mxu3 %v6126_v22  ;;  %v6059_v47 = vld [vmem:[%s8692_s16 + $0x660] sm:$0xf0]  ;;  %3614 = vmatpush.bf16.msra.mxu1 %v5582_v31 }
 0x103   : > { %v7567_v49 = vld [vmem:[%s8692_s16 + $0x4] sm:$0xf]  ;;  %v6062_v56 = vor.u32 %v7767_v46, %v6059_v47 }
 0x104   : > { %v5259_v50 = vld [vmem:[%s8692_s16 + $0x20] sm:$0xf0]  ;;  %3627 = vmatpush.bf16.msra.mxu2 %v5838_v32  ;;  %3602 = vmatpush.bf16.msra.mxu0 %v5294_v48 }
 0x105   : > { %v7631_v53 = vld [vmem:[%s8692_s16 + $0x204] sm:$0xf]  ;;  %v5262_v63 = vor.u32 %v7567_v49, %v5259_v50 }
 0x106   : > { %v5515_v54 = vld [vmem:[%s8692_s16 + $0x220] sm:$0xf0]  ;;  %3640 = vmatpush.bf16.msra.mxu3 %v6094_v39  ;;  %3615 = vmatpush.bf16.msra.mxu1 %v5550_v51 }
 0x107   : > { %v7695_v55 = vld [vmem:[%s8692_s16 + $0x404] sm:$0xf]  ;;  %v5518_v3 = vor.u32 %v7631_v53, %v5515_v54 }
 0x108   : > { %v5771_v57 = vld [vmem:[%s8692_s16 + $0x420] sm:$0xf0]  ;;  %3628 = vmatpush.bf16.msra.mxu2 %v5806_v52  ;;  %3603 = vmatpush.bf16.msra.mxu0 %v5262_v63 }
 0x109   : > { %v7759_v58 = vld [vmem:[%s8692_s16 + $0x604] sm:$0xf]  ;;  %v5774_v4 = vor.u32 %v7695_v55, %v5771_v57 }
 0x10a   : > { %v6027_v59 = vld [vmem:[%s8692_s16 + $0x620] sm:$0xf0]  ;;  %3641 = vmatpush.bf16.msra.mxu3 %v6062_v56  ;;  %3616 = vmatpush.bf16.msra.mxu1 %v5518_v3 }
 0x10b   : > { %v7879_v60 = vld [vmem:[%s8692_s16 + $0x9c4] sm:$0xf]  ;;  %v6030_v7 = vor.u32 %v7759_v58, %v6027_v59  ;;  %3604 = vmatmul.bf16.vlgmr.msra.gmra.mxu0 %v8820_v28 }
 0x10c   : > { %v6507_v61 = vld [vmem:[%s8692_s16 + $0x9e0] sm:$0xf0]  ;;  %3629 = vmatpush.bf16.msra.mxu2 %v5774_v4 }
 0x10d   : > { %v7943_v62 = vld [vmem:[%s8692_s16 + $0xbc4] sm:$0xf]  ;;  %v6510_v8 = vor.u32 %v7879_v60, %v6507_v61  ;;  %3617 = vmatmul.bf16.vlgmr.msra.gmra.mxu1 %v8826_v34 }
 0x10e   : > { %v6763_v0 = vld [vmem:[%s8692_s16 + $0xbe0] sm:$0xf0]  ;;  %3642 = vmatpush.bf16.msra.mxu3 %v6030_v7 }
 0x10f   : > { %v8007_v1 = vld [vmem:[%s8692_s16 + $0xdc4] sm:$0xf]  ;;  %v6766_v9 = vor.u32 %v7943_v62, %v6763_v0  ;;  %3648 = vmatpush.bf16.msrb.mxu0 %v6510_v8  ;;  %3630 = vmatmul.bf16.vlgmr.msra.gmra.mxu2 %v8818_v27 }
 0x110   : > { %v7019_v2 = vld [vmem:[%s8692_s16 + $0xde0] sm:$0xf0] }
 0x111   : > { %v8071_v5 = vld [vmem:[%s8692_s16 + $0xfc4] sm:$0xf]  ;;  %v7022_v10 = vor.u32 %v8007_v1, %v7019_v2  ;;  %3661 = vmatpush.bf16.msrb.mxu1 %v6766_v9  ;;  %3643 = vmatmul.bf16.vlgmr.msra.gmra.mxu3 %v8824_v33 }
 0x112   : > { %v7275_v6 = vld [vmem:[%s8692_s16 + $0xfe0] sm:$0xf0] }
 0x113   : > { %v7871_v11 = vld [vmem:[%s8692_s16 + $0x984] sm:$0xf]  ;;  %v7278_v14 = vor.u32 %v8071_v5, %v7275_v6  ;;  %3674 = vmatpush.bf16.msrb.mxu2 %v7022_v10 }
 0x114   : > { %v6475_v12 = vld [vmem:[%s8692_s16 + $0x9a0] sm:$0xf0] }
 0x115   : > { %v7935_v13 = vld [vmem:[%s8692_s16 + $0xb84] sm:$0xf]  ;;  %v6478_v20 = vor.u32 %v7871_v11, %v6475_v12  ;;  %3687 = vmatpush.bf16.msrb.mxu3 %v7278_v14 }
 0x116   : > { %v6731_v15 = vld [vmem:[%s8692_s16 + $0xba0] sm:$0xf0] }
 0x117   : > { %v7999_v16 = vld [vmem:[%s8692_s16 + $0xd84] sm:$0xf]  ;;  %v6734_v21 = vor.u32 %v7935_v13, %v6731_v15  ;;  %3649 = vmatpush.bf16.msrb.mxu0 %v6478_v20 }
 0x118   : > { %v6987_v17 = vld [vmem:[%s8692_s16 + $0xda0] sm:$0xf0] }
 0x119   : > { %v8063_v18 = vld [vmem:[%s8692_s16 + $0xf84] sm:$0xf]  ;;  %v6990_v22 = vor.u32 %v7999_v16, %v6987_v17  ;;  %3662 = vmatpush.bf16.msrb.mxu1 %v6734_v21 }
 0x11a   : > { %v7243_v19 = vld [vmem:[%s8692_s16 + $0xfa0] sm:$0xf0] }
 0x11b   : > { %v7863_v23 = vld [vmem:[%s8692_s16 + $0x944] sm:$0xf]  ;;  %v7246_v26 = vor.u32 %v8063_v18, %v7243_v19  ;;  %3675 = vmatpush.bf16.msrb.mxu2 %v6990_v22 }
 0x11c   : > { %v6443_v24 = vld [vmem:[%s8692_s16 + $0x960] sm:$0xf0] }
 0x11d   : > { %v7927_v25 = vld [vmem:[%s8692_s16 + $0xb44] sm:$0xf]  ;;  %v6446_v36 = vor.u32 %v7863_v23, %v6443_v24  ;;  %3688 = vmatpush.bf16.msrb.mxu3 %v7246_v26 }
 0x11e   : > { %v6699_v29 = vld [vmem:[%s8692_s16 + $0xb60] sm:$0xf0] }
 0x11f   : > { %v7991_v30 = vld [vmem:[%s8692_s16 + $0xd44] sm:$0xf]  ;;  %v6702_v37 = vor.u32 %v7927_v25, %v6699_v29  ;;  %3650 = vmatpush.bf16.msrb.mxu0 %v6446_v36 }
 0x120   : > { %v6955_v31 = vld [vmem:[%s8692_s16 + $0xd60] sm:$0xf0] }
 0x121   : > { %v8055_v32 = vld [vmem:[%s8692_s16 + $0xf44] sm:$0xf]  ;;  %v6958_v39 = vor.u32 %v7991_v30, %v6955_v31  ;;  %3663 = vmatpush.bf16.msrb.mxu1 %v6702_v37 }
 0x122   : > { %v7211_v35 = vld [vmem:[%s8692_s16 + $0xf60] sm:$0xf0] }
 0x123   : > { %v7855_v40 = vld [vmem:[%s8692_s16 + $0x904] sm:$0xf]  ;;  %v7214_v46 = vor.u32 %v8055_v32, %v7211_v35  ;;  %3676 = vmatpush.bf16.msrb.mxu2 %v6958_v39 }
 0x124   : > { %v6411_v43 = vld [vmem:[%s8692_s16 + $0x920] sm:$0xf0] }
 0x125   : > { %v7919_v45 = vld [vmem:[%s8692_s16 + $0xb04] sm:$0xf]  ;;  %v6414_v52 = vor.u32 %v7855_v40, %v6411_v43  ;;  %3689 = vmatpush.bf16.msrb.mxu3 %v7214_v46  ;;  %v5489_v43 = vld [vmem:[%s8692_s16 + $0x1c8] sm:$0xf] }
 0x126   : > { %v6667_v47 = vld [vmem:[%s8692_s16 + $0xb20] sm:$0xf0]  ;;  %v5745_v46 = vld [vmem:[%s8692_s16 + $0x3c8] sm:$0xf] }
 0x127   : > { %v7983_v48 = vld [vmem:[%s8692_s16 + $0xd04] sm:$0xf]  ;;  %v6670_v53 = vor.u32 %v7919_v45, %v6667_v47  ;;  %3651 = vmatpush.bf16.msrb.mxu0 %v6414_v52  ;;  %v7628_v45 = vld [vmem:[%s8692_s16 + $0x1e4] sm:$0xf0] }
 0x128   : > { %v6923_v49 = vld [vmem:[%s8692_s16 + $0xd20] sm:$0xf0] }
 0x129   : > { %v8047_v50 = vld [vmem:[%s8692_s16 + $0xf04] sm:$0xf]  ;;  %v6926_v54 = vor.u32 %v7983_v48, %v6923_v49  ;;  %3664 = vmatpush.bf16.msrb.mxu1 %v6670_v53  ;;  %v7692_v48 = vld [vmem:[%s8692_s16 + $0x3e4] sm:$0xf0] }
 0x12a   : > { %v7179_v51 = vld [vmem:[%s8692_s16 + $0xf20] sm:$0xf0]  ;;  %v6001_v49 = vld [vmem:[%s8692_s16 + $0x5c8] sm:$0xf] }
 0x12b   : > { %v7847_v55 = vld [vmem:[%s8692_s16 + $0x8c4] sm:$0xf]  ;;  %v7182_v58 = vor.u32 %v8047_v50, %v7179_v51  ;;  %3677 = vmatpush.bf16.msrb.mxu2 %v6926_v54  ;;  %v7756_v50 = vld [vmem:[%s8692_s16 + $0x5e4] sm:$0xf0] }
 0x12c   : > { %v6379_v56 = vld [vmem:[%s8692_s16 + $0x8e0] sm:$0xf0]  ;;  %v6257_v53 = vld [vmem:[%s8692_s16 + $0x7c8] sm:$0xf] }
 0x12d   : > { %v7911_v57 = vld [vmem:[%s8692_s16 + $0xac4] sm:$0xf]  ;;  %v6382_v0 = vor.u32 %v7847_v55, %v6379_v56  ;;  %3690 = vmatpush.bf16.msrb.mxu3 %v7182_v58  ;;  %v7820_v54 = vld [vmem:[%s8692_s16 + $0x7e4] sm:$0xf0]  ;;  %v5490_v56 = vor.u32 %v7628_v45, %v5489_v43  ;;  %v6002_v58 = vor.u32 %v7756_v50, %v6001_v49 }
 0x12e   : > { %v6635_v59 = vld [vmem:[%s8692_s16 + $0xae0] sm:$0xf0]  ;;  %v5873_v43 = vld [vmem:[%s8692_s16 + $0x4c8] sm:$0xf] }
 0x12f   : > { %v7975_v60 = vld [vmem:[%s8692_s16 + $0xcc4] sm:$0xf]  ;;  %v6638_v1 = vor.u32 %v7911_v57, %v6635_v59  ;;  %3652 = vmatpush.bf16.msrb.mxu0 %v6382_v0  ;;  %v5746_v57 = vor.u32 %v7692_v48, %v5745_v46  ;;  %v5457_v59 = vld [vmem:[%s8692_s16 + $0x188] sm:$0xf] }
 0x130   : > { %v6891_v61 = vld [vmem:[%s8692_s16 + $0xce0] sm:$0xf0]  ;;  %v5969_v0 = vld [vmem:[%s8692_s16 + $0x588] sm:$0xf] }
 0x131   : > { %v8039_v62 = vld [vmem:[%s8692_s16 + $0xec4] sm:$0xf]  ;;  %v6894_v2 = vor.u32 %v7975_v60, %v6891_v61  ;;  %3665 = vmatpush.bf16.msrb.mxu1 %v6638_v1  ;;  %v7620_v60 = vld [vmem:[%s8692_s16 + $0x1a4] sm:$0xf0] }
 0x132   : > { %v7147_v63 = vld [vmem:[%s8692_s16 + $0xee0] sm:$0xf0]  ;;  %v5713_v61 = vld [vmem:[%s8692_s16 + $0x388] sm:$0xf] }
 0x133   : > { %v7839_v3 = vld [vmem:[%s8692_s16 + $0x884] sm:$0xf]  ;;  %v7150_v6 = vor.u32 %v8039_v62, %v7147_v63  ;;  %3678 = vmatpush.bf16.msrb.mxu2 %v6894_v2  ;;  %v6258_v62 = vor.u32 %v7820_v54, %v6257_v53  ;;  %v7684_v63 = vld [vmem:[%s8692_s16 + $0x3a4] sm:$0xf0] }
 0x134   : > { %v6347_v4 = vld [vmem:[%s8692_s16 + $0x8a0] sm:$0xf0]  ;;  %v7748_v1 = vld [vmem:[%s8692_s16 + $0x5a4] sm:$0xf0] }
 0x135   : > { %v7903_v5 = vld [vmem:[%s8692_s16 + $0xa84] sm:$0xf]  ;;  %v6350_v12 = vor.u32 %v7839_v3, %v6347_v4  ;;  %3691 = vmatpush.bf16.msrb.mxu3 %v7150_v6  ;;  %v6225_v2 = vld [vmem:[%s8692_s16 + $0x788] sm:$0xf]  ;;  %v5458_v4 = vor.u32 %v7620_v60, %v5457_v59  ;;  %v5970_v6 = vor.u32 %v7748_v1, %v5969_v0 }
 0x136   : > { %v6603_v7 = vld [vmem:[%s8692_s16 + $0xaa0] sm:$0xf0]  ;;  %v7812_v3 = vld [vmem:[%s8692_s16 + $0x7a4] sm:$0xf0] }
 0x137   : > { %v7967_v8 = vld [vmem:[%s8692_s16 + $0xc84] sm:$0xf]  ;;  %v6606_v13 = vor.u32 %v7903_v5, %v6603_v7  ;;  %3653 = vmatpush.bf16.msrb.mxu0 %v6350_v12  ;;  %v5714_v5 = vor.u32 %v7684_v63, %v5713_v61  ;;  %v5425_v7 = vld [vmem:[%s8692_s16 + $0x148] sm:$0xf] }
 0x138   : > { %v6859_v9 = vld [vmem:[%s8692_s16 + $0xca0] sm:$0xf0]  ;;  %v5937_v12 = vld [vmem:[%s8692_s16 + $0x548] sm:$0xf] }
 0x139   : > { %v8031_v10 = vld [vmem:[%s8692_s16 + $0xe84] sm:$0xf]  ;;  %v6862_v14 = vor.u32 %v7967_v8, %v6859_v9  ;;  %3666 = vmatpush.bf16.msrb.mxu1 %v6606_v13  ;;  %v7612_v8 = vld [vmem:[%s8692_s16 + $0x164] sm:$0xf0] }
 0x13a   : > { %v7115_v11 = vld [vmem:[%s8692_s16 + $0xea0] sm:$0xf0]  ;;  %v5681_v9 = vld [vmem:[%s8692_s16 + $0x348] sm:$0xf] }
 0x13b   : > { %v7831_v15 = vld [vmem:[%s8692_s16 + $0x844] sm:$0xf]  ;;  %v7118_v18 = vor.u32 %v8031_v10, %v7115_v11  ;;  %3679 = vmatpush.bf16.msrb.mxu2 %v6862_v14  ;;  %v6226_v10 = vor.u32 %v7812_v3, %v6225_v2  ;;  %v7676_v11 = vld [vmem:[%s8692_s16 + $0x364] sm:$0xf0] }
 0x13c   : > { %v6315_v16 = vld [vmem:[%s8692_s16 + $0x860] sm:$0xf0]  ;;  %v7740_v13 = vld [vmem:[%s8692_s16 + $0x564] sm:$0xf0] }
 0x13d   : > { %v7895_v17 = vld [vmem:[%s8692_s16 + $0xa44] sm:$0xf]  ;;  %v6318_v24 = vor.u32 %v7831_v15, %v6315_v16  ;;  %3692 = vmatpush.bf16.msrb.mxu3 %v7118_v18  ;;  %v6193_v14 = vld [vmem:[%s8692_s16 + $0x748] sm:$0xf]  ;;  %v5426_v16 = vor.u32 %v7612_v8, %v5425_v7  ;;  %v5938_v18 = vor.u32 %v7740_v13, %v5937_v12 }
 0x13e   : > { %v6571_v19 = vld [vmem:[%s8692_s16 + $0xa60] sm:$0xf0]  ;;  %v7804_v15 = vld [vmem:[%s8692_s16 + $0x764] sm:$0xf0] }
 0x13f   : > { %v7959_v20 = vld [vmem:[%s8692_s16 + $0xc44] sm:$0xf]  ;;  %v6574_v29 = vor.u32 %v7895_v17, %v6571_v19  ;;  %3654 = vmatpush.bf16.msrb.mxu0 %v6318_v24  ;;  %v5682_v17 = vor.u32 %v7676_v11, %v5681_v9  ;;  %v5393_v19 = vld [vmem:[%s8692_s16 + $0x108] sm:$0xf] }
 0x140   : > { %v6827_v21 = vld [vmem:[%s8692_s16 + $0xc60] sm:$0xf0]  ;;  %v5905_v24 = vld [vmem:[%s8692_s16 + $0x508] sm:$0xf] }
 0x141   : > { %v8023_v22 = vld [vmem:[%s8692_s16 + $0xe44] sm:$0xf]  ;;  %v6830_v30 = vor.u32 %v7959_v20, %v6827_v21  ;;  %3667 = vmatpush.bf16.msrb.mxu1 %v6574_v29  ;;  %v7604_v20 = vld [vmem:[%s8692_s16 + $0x124] sm:$0xf0] }
 0x142   : > { %v7083_v23 = vld [vmem:[%s8692_s16 + $0xe60] sm:$0xf0]  ;;  %v5649_v21 = vld [vmem:[%s8692_s16 + $0x308] sm:$0xf] }
 0x143   : > { %v7823_v25 = vld [vmem:[%s8692_s16 + $0x804] sm:$0xf]  ;;  %v7086_v36 = vor.u32 %v8023_v22, %v7083_v23  ;;  %3680 = vmatpush.bf16.msrb.mxu2 %v6830_v30  ;;  %v6194_v22 = vor.u32 %v7804_v15, %v6193_v14  ;;  %v7668_v23 = vld [vmem:[%s8692_s16 + $0x324] sm:$0xf0]  ;;  %v5394_v30 = vor.u32 %v7604_v20, %v5393_v19 }
 0x144   : > { %v6283_v26 = vld [vmem:[%s8692_s16 + $0x820] sm:$0xf0]  ;;  %v7796_v29 = vld [vmem:[%s8692_s16 + $0x724] sm:$0xf0] }
 0x145   : > { %v7887_v31 = vld [vmem:[%s8692_s16 + $0xa04] sm:$0xf]  ;;  %v6286_v47 = vor.u32 %v7823_v25, %v6283_v26  ;;  %3693 = vmatpush.bf16.msrb.mxu3 %v7086_v36  ;;  %v7732_v25 = vld [vmem:[%s8692_s16 + $0x524] sm:$0xf0] }
 0x146   : > { %v6539_v32 = vld [vmem:[%s8692_s16 + $0xa20] sm:$0xf0]  ;;  %v6161_v26 = vld [vmem:[%s8692_s16 + $0x708] sm:$0xf] }
 0x147   : > { %v7951_v35 = vld [vmem:[%s8692_s16 + $0xc04] sm:$0xf]  ;;  %v6542_v51 = vor.u32 %v7887_v31, %v6539_v32  ;;  %3655 = vmatpush.bf16.msrb.mxu0 %v6286_v47  ;;  %v5650_v31 = vor.u32 %v7668_v23, %v5649_v21  ;;  %v5906_v32 = vor.u32 %v7732_v25, %v5905_v24  ;;  %v7596_v36 = vld [vmem:[%s8692_s16 + $0xe4] sm:$0xf0] }
 0x148   : > { %v6795_v37 = vld [vmem:[%s8692_s16 + $0xc20] sm:$0xf0]  ;;  %v7724_v45 = vld [vmem:[%s8692_s16 + $0x4e4] sm:$0xf0] }
 0x149   : > { %v8015_v39 = vld [vmem:[%s8692_s16 + $0xe04] sm:$0xf]  ;;  %v6798_v52 = vor.u32 %v7951_v35, %v6795_v37  ;;  %3668 = vmatpush.bf16.msrb.mxu1 %v6542_v51  ;;  %v5361_v35 = vld [vmem:[%s8692_s16 + $0xc8] sm:$0xf]  ;;  %v5874_v50 = vor.u32 %v7724_v45, %v5873_v43 }
 0x14a   : > { %v7051_v40 = vld [vmem:[%s8692_s16 + $0xe20] sm:$0xf0]  ;;  %3656 = vmatmul.bf16.vlgmr.msrb.gmra.mxu0 %v8874_v41  ;;  %v5617_v37 = vld [vmem:[%s8692_s16 + $0x2c8] sm:$0xf]  ;;  %v5362_v48 = vor.u32 %v7596_v36, %v5361_v35 }
 0x14b   : > { %v7054_v55 = vor.u32 %v8015_v39, %v7051_v40  ;;  %3681 = vmatpush.bf16.msrb.mxu2 %v6798_v52  ;;  %3700 = vmatpush.bf16.msra.mxu0 %v5490_v56  ;;  %v6162_v39 = vor.u32 %v7796_v29, %v6161_v26  ;;  %v7660_v40 = vld [vmem:[%s8692_s16 + $0x2e4] sm:$0xf0] }
 0x14c   : > { %3669 = vmatmul.bf16.vlgmr.msrb.gmra.mxu1 %v8878_v44  ;;  %v6129_v46 = vld [vmem:[%s8692_s16 + $0x6c8] sm:$0xf]  ;;  %v5618_v49 = vor.u32 %v7660_v40, %v5617_v37 }
 0x14d   : > { %3694 = vmatpush.bf16.msrb.mxu3 %v7054_v55  ;;  %3713 = vmatpush.bf16.msra.mxu1 %v5746_v57  ;;  %v7788_v47 = vld [vmem:[%s8692_s16 + $0x6e4] sm:$0xf0] }
 0x14e   : > { %3682 = vmatmul.bf16.vlgmr.msrb.gmra.mxu2 %v8870_v38  ;;  %v5329_v51 = vld [vmem:[%s8692_s16 + $0x88] sm:$0xf]  ;;  %v6130_v54 = vor.u32 %v7788_v47, %v6129_v46 }
 0x14f   : > { %3726 = vmatpush.bf16.msra.mxu2 %v6002_v58  ;;  %3701 = vmatpush.bf16.msra.mxu0 %v5458_v4  ;;  %v7588_v52 = vld [vmem:[%s8692_s16 + $0xa4] sm:$0xf0] }
 0x150   : > { %3695 = vmatmul.bf16.vlgmr.msrb.gmra.mxu3 %v8876_v42  ;;  %v5585_v53 = vld [vmem:[%s8692_s16 + $0x288] sm:$0xf]  ;;  %v5330_v60 = vor.u32 %v7588_v52, %v5329_v51 }
 0x151   : > { %3739 = vmatpush.bf16.msra.mxu3 %v6258_v62  ;;  %3714 = vmatpush.bf16.msra.mxu1 %v5714_v5  ;;  %v7652_v55 = vld [vmem:[%s8692_s16 + $0x2a4] sm:$0xf0] }
 0x152   : > { %v5841_v56 = vld [vmem:[%s8692_s16 + $0x488] sm:$0xf]  ;;  %v5586_v61 = vor.u32 %v7652_v55, %v5585_v53 }
 0x153   : > { %3727 = vmatpush.bf16.msra.mxu2 %v5970_v6  ;;  %3702 = vmatpush.bf16.msra.mxu0 %v5426_v16  ;;  %v7716_v57 = vld [vmem:[%s8692_s16 + $0x4a4] sm:$0xf0] }
 0x154   : > { %v6097_v58 = vld [vmem:[%s8692_s16 + $0x688] sm:$0xf]  ;;  %v5842_v62 = vor.u32 %v7716_v57, %v5841_v56 }
 0x155   : > { %3740 = vmatpush.bf16.msra.mxu3 %v6226_v10  ;;  %3715 = vmatpush.bf16.msra.mxu1 %v5682_v17  ;;  %v7780_v59 = vld [vmem:[%s8692_s16 + $0x6a4] sm:$0xf0] }
 0x156   : > { %v5297_v63 = vld [vmem:[%s8692_s16 + $0x48] sm:$0xf]  ;;  %v6098_v2 = vor.u32 %v7780_v59, %v6097_v58 }
 0x157   : > { %3728 = vmatpush.bf16.msra.mxu2 %v5938_v18  ;;  %3703 = vmatpush.bf16.msra.mxu0 %v5394_v30  ;;  %v7580_v0 = vld [vmem:[%s8692_s16 + $0x64] sm:$0xf0] }
 0x158   : > { %v5553_v1 = vld [vmem:[%s8692_s16 + $0x248] sm:$0xf]  ;;  %v5298_v8 = vor.u32 %v7580_v0, %v5297_v63 }
 0x159   : > { %3741 = vmatpush.bf16.msra.mxu3 %v6194_v22  ;;  %3716 = vmatpush.bf16.msra.mxu1 %v5650_v31  ;;  %v7644_v3 = vld [vmem:[%s8692_s16 + $0x264] sm:$0xf0] }
 0x15a   : > { %v5809_v4 = vld [vmem:[%s8692_s16 + $0x448] sm:$0xf]  ;;  %v5554_v11 = vor.u32 %v7644_v3, %v5553_v1 }
 0x15b   : > { %3729 = vmatpush.bf16.msra.mxu2 %v5906_v32  ;;  %3704 = vmatpush.bf16.msra.mxu0 %v5362_v48  ;;  %v7708_v5 = vld [vmem:[%s8692_s16 + $0x464] sm:$0xf0] }
 0x15c   : > { %v6065_v6 = vld [vmem:[%s8692_s16 + $0x648] sm:$0xf]  ;;  %v5810_v12 = vor.u32 %v7708_v5, %v5809_v4 }
 0x15d   : > { %3742 = vmatpush.bf16.msra.mxu3 %v6162_v39  ;;  %3717 = vmatpush.bf16.msra.mxu1 %v5618_v49  ;;  %v7772_v7 = vld [vmem:[%s8692_s16 + $0x664] sm:$0xf0] }
 0x15e   : > { %v5265_v9 = vld [vmem:[%s8692_s16 + $0x8] sm:$0xf]  ;;  %v6066_v16 = vor.u32 %v7772_v7, %v6065_v6 }
 0x15f   : > { %3730 = vmatpush.bf16.msra.mxu2 %v5874_v50  ;;  %3705 = vmatpush.bf16.msra.mxu0 %v5330_v60  ;;  %v7572_v10 = vld [vmem:[%s8692_s16 + $0x24] sm:$0xf0] }
 0x160   : > { %v5521_v13 = vld [vmem:[%s8692_s16 + $0x208] sm:$0xf]  ;;  %v5266_v23 = vor.u32 %v7572_v10, %v5265_v9 }
 0x161   : > { %3743 = vmatpush.bf16.msra.mxu3 %v6130_v54  ;;  %3718 = vmatpush.bf16.msra.mxu1 %v5586_v61  ;;  %v7636_v14 = vld [vmem:[%s8692_s16 + $0x224] sm:$0xf0] }
 0x162   : > { %v5777_v15 = vld [vmem:[%s8692_s16 + $0x408] sm:$0xf]  ;;  %v5522_v29 = vor.u32 %v7636_v14, %v5521_v13 }
 0x163   : > { %3731 = vmatpush.bf16.msra.mxu2 %v5842_v62  ;;  %v7700_v17 = vld [vmem:[%s8692_s16 + $0x424] sm:$0xf0]  ;;  %3706 = vmatpush.bf16.msra.mxu0 %v5298_v8 }
 0x164   : > { %v6033_v18 = vld [vmem:[%s8692_s16 + $0x608] sm:$0xf]  ;;  %v5778_v30 = vor.u32 %v7700_v17, %v5777_v15 }
 0x165   : > { %3744 = vmatpush.bf16.msra.mxu3 %v6098_v2  ;;  %v7764_v19 = vld [vmem:[%s8692_s16 + $0x624] sm:$0xf0]  ;;  %3719 = vmatpush.bf16.msra.mxu1 %v5554_v11 }
 0x166   : > { %v6513_v20 = vld [vmem:[%s8692_s16 + $0x9c8] sm:$0xf]  ;;  %v6034_v35 = vor.u32 %v7764_v19, %v6033_v18 }
 0x167   : > { %v7884_v21 = vld [vmem:[%s8692_s16 + $0x9e4] sm:$0xf0]  ;;  %3732 = vmatpush.bf16.msra.mxu2 %v5810_v12  ;;  %3707 = vmatpush.bf16.msra.mxu0 %v5266_v23 }
 0x168   : > { %v6769_v22 = vld [vmem:[%s8692_s16 + $0xbc8] sm:$0xf]  ;;  %v6514_v36 = vor.u32 %v7884_v21, %v6513_v20 }
 0x169   : > { %v7948_v24 = vld [vmem:[%s8692_s16 + $0xbe4] sm:$0xf0]  ;;  %3745 = vmatpush.bf16.msra.mxu3 %v6066_v16  ;;  %3720 = vmatpush.bf16.msra.mxu1 %v5522_v29 }
 0x16a   : > { %v7025_v25 = vld [vmem:[%s8692_s16 + $0xdc8] sm:$0xf]  ;;  %v6770_v37 = vor.u32 %v7948_v24, %v6769_v22  ;;  %3708 = vmatmul.bf16.vlgmr.msra.gmra.mxu0 %v8820_v28 }
 0x16b   : > { %v8012_v26 = vld [vmem:[%s8692_s16 + $0xde4] sm:$0xf0]  ;;  %3733 = vmatpush.bf16.msra.mxu2 %v5778_v30  ;;  %3752 = vmatpush.bf16.msrb.mxu0 %v6514_v36 }
 0x16c   : > { %v7281_v31 = vld [vmem:[%s8692_s16 + $0xfc8] sm:$0xf]  ;;  %v7026_v39 = vor.u32 %v8012_v26, %v7025_v25  ;;  %3721 = vmatmul.bf16.vlgmr.msra.gmra.mxu1 %v8826_v34 }
 0x16d   : > { %v8076_v32 = vld [vmem:[%s8692_s16 + $0xfe4] sm:$0xf0]  ;;  %3746 = vmatpush.bf16.msra.mxu3 %v6034_v35  ;;  %3765 = vmatpush.bf16.msrb.mxu1 %v6770_v37 }
 0x16e   : > { %v6481_v40 = vld [vmem:[%s8692_s16 + $0x988] sm:$0xf]  ;;  %v7282_v46 = vor.u32 %v8076_v32, %v7281_v31  ;;  %3734 = vmatmul.bf16.vlgmr.msra.gmra.mxu2 %v8818_v27 }
 0x16f   : > { %v7876_v43 = vld [vmem:[%s8692_s16 + $0x9a4] sm:$0xf0]  ;;  %3778 = vmatpush.bf16.msrb.mxu2 %v7026_v39 }
 0x170   : > { %v6737_v45 = vld [vmem:[%s8692_s16 + $0xb88] sm:$0xf]  ;;  %v6482_v52 = vor.u32 %v7876_v43, %v6481_v40  ;;  %3747 = vmatmul.bf16.vlgmr.msra.gmra.mxu3 %v8824_v33 }
 0x171   : > { %v7940_v47 = vld [vmem:[%s8692_s16 + $0xba4] sm:$0xf0]  ;;  %3791 = vmatpush.bf16.msrb.mxu3 %v7282_v46 }
 0x172   : > { %v6993_v48 = vld [vmem:[%s8692_s16 + $0xd88] sm:$0xf]  ;;  %v6738_v53 = vor.u32 %v7940_v47, %v6737_v45  ;;  %3753 = vmatpush.bf16.msrb.mxu0 %v6482_v52 }
 0x173   : > { %v8004_v49 = vld [vmem:[%s8692_s16 + $0xda4] sm:$0xf0] }
 0x174   : > { %v7249_v50 = vld [vmem:[%s8692_s16 + $0xf88] sm:$0xf]  ;;  %v6994_v54 = vor.u32 %v8004_v49, %v6993_v48  ;;  %3766 = vmatpush.bf16.msrb.mxu1 %v6738_v53 }
 0x175   : > { %v8068_v51 = vld [vmem:[%s8692_s16 + $0xfa4] sm:$0xf0] }
 0x176   : > { %v6449_v55 = vld [vmem:[%s8692_s16 + $0x948] sm:$0xf]  ;;  %v7250_v58 = vor.u32 %v8068_v51, %v7249_v50  ;;  %3779 = vmatpush.bf16.msrb.mxu2 %v6994_v54 }
 0x177   : > { %v7868_v56 = vld [vmem:[%s8692_s16 + $0x964] sm:$0xf0] }
 0x178   : > { %v6705_v57 = vld [vmem:[%s8692_s16 + $0xb48] sm:$0xf]  ;;  %v6450_v0 = vor.u32 %v7868_v56, %v6449_v55  ;;  %3792 = vmatpush.bf16.msrb.mxu3 %v7250_v58  ;;  %v3501_v56 = vpop.f32.mrf.mxu0 }
 0x179   : > { %v7932_v59 = vld [vmem:[%s8692_s16 + $0xb64] sm:$0xf0] }
 0x17a   : > { %v6961_v60 = vld [vmem:[%s8692_s16 + $0xd48] sm:$0xf]  ;;  %v6706_v1 = vor.u32 %v7932_v59, %v6705_v57  ;;  %3754 = vmatpush.bf16.msrb.mxu0 %v6450_v0 }
 0x17b   : > { %v7996_v61 = vld [vmem:[%s8692_s16 + $0xd64] sm:$0xf0] }
 0x17c   : > { %v7217_v62 = vld [vmem:[%s8692_s16 + $0xf48] sm:$0xf]  ;;  %v6962_v2 = vor.u32 %v7996_v61, %v6961_v60  ;;  %3767 = vmatpush.bf16.msrb.mxu1 %v6706_v1  ;;  %v3514_v60 = vpop.f32.mrf.mxu1 }
 0x17d   : > { %v8060_v63 = vld [vmem:[%s8692_s16 + $0xf64] sm:$0xf0] }
 0x17e   : > { %v6417_v3 = vld [vmem:[%s8692_s16 + $0x908] sm:$0xf]  ;;  %v7218_v6 = vor.u32 %v8060_v63, %v7217_v62  ;;  %3780 = vmatpush.bf16.msrb.mxu2 %v6962_v2  ;;  %v3515_v2 = vadd.f32 %v3514_v60, %v3501_v56  ;;  %v7800_v56 = vld [vmem:[%s8692_s16 + $0x74c] sm:$0xf] }
 0x17f   : > { %v7860_v4 = vld [vmem:[%s8692_s16 + $0x924] sm:$0xf0] }
 0x180   : > { %v6673_v5 = vld [vmem:[%s8692_s16 + $0xb08] sm:$0xf]  ;;  %v6418_v12 = vor.u32 %v7860_v4, %v6417_v3  ;;  %3793 = vmatpush.bf16.msrb.mxu3 %v7218_v6 }
 0x181   : > { %v7924_v7 = vld [vmem:[%s8692_s16 + $0xb24] sm:$0xf0] }
 0x182   : > { %v6929_v8 = vld [vmem:[%s8692_s16 + $0xd08] sm:$0xf]  ;;  %v6674_v13 = vor.u32 %v7924_v7, %v6673_v5  ;;  %3755 = vmatpush.bf16.msrb.mxu0 %v6418_v12  ;;  %v7624_v7 = vld [vmem:[%s8692_s16 + $0x1cc] sm:$0xf] }
 0x183   : > { %v7988_v9 = vld [vmem:[%s8692_s16 + $0xd24] sm:$0xf0]  ;;  %v5747_v12 = vld [vmem:[%s8692_s16 + $0x3e8] sm:$0xf0] }
 0x184   : > { %v7185_v10 = vld [vmem:[%s8692_s16 + $0xf08] sm:$0xf]  ;;  %v6930_v14 = vor.u32 %v7988_v9, %v6929_v8  ;;  %3768 = vmatpush.bf16.msrb.mxu1 %v6674_v13  ;;  %v5491_v8 = vld [vmem:[%s8692_s16 + $0x1e8] sm:$0xf0] }
 0x185   : > { %v8052_v11 = vld [vmem:[%s8692_s16 + $0xf24] sm:$0xf0]  ;;  %v7688_v9 = vld [vmem:[%s8692_s16 + $0x3cc] sm:$0xf] }
 0x186   : > { %v6385_v15 = vld [vmem:[%s8692_s16 + $0x8c8] sm:$0xf]  ;;  %v7186_v18 = vor.u32 %v8052_v11, %v7185_v10  ;;  %3781 = vmatpush.bf16.msrb.mxu2 %v6930_v14  ;;  %v3527_v10 = vpop.f32.mrf.mxu2  ;;  %v7752_v13 = vld [vmem:[%s8692_s16 + $0x5cc] sm:$0xf] }
 0x187   : > { %v7852_v16 = vld [vmem:[%s8692_s16 + $0x8e4] sm:$0xf0]  ;;  %v6003_v14 = vld [vmem:[%s8692_s16 + $0x5e8] sm:$0xf0] }
 0x188   : > { %v6641_v17 = vld [vmem:[%s8692_s16 + $0xac8] sm:$0xf]  ;;  %v6386_v24 = vor.u32 %v7852_v16, %v6385_v15  ;;  %3794 = vmatpush.bf16.msrb.mxu3 %v7186_v18  ;;  %v3528_v15 = vadd.f32 %v3527_v10, %v3515_v2  ;;  %v7816_v18 = vld [vmem:[%s8692_s16 + $0x7cc] sm:$0xf] }
 0x189   : > { %v7916_v19 = vld [vmem:[%s8692_s16 + $0xae4] sm:$0xf0]  ;;  %v5651_v2 = vld [vmem:[%s8692_s16 + $0x328] sm:$0xf0] }
 0x18a   : > { %v6897_v20 = vld [vmem:[%s8692_s16 + $0xcc8] sm:$0xf]  ;;  %v6642_v25 = vor.u32 %v7916_v19, %v6641_v17  ;;  %3756 = vmatpush.bf16.msrb.mxu0 %v6386_v24  ;;  %v6259_v19 = vld [vmem:[%s8692_s16 + $0x7e8] sm:$0xf0]  ;;  %v6006_v24 = vor.u32 %v7752_v13, %v6003_v14 }
 0x18b   : > { %v7980_v21 = vld [vmem:[%s8692_s16 + $0xce4] sm:$0xf0]  ;;  %v7656_v13 = vld [vmem:[%s8692_s16 + $0x2cc] sm:$0xf] }
 0x18c   : > { %v7153_v22 = vld [vmem:[%s8692_s16 + $0xec8] sm:$0xf]  ;;  %v6898_v26 = vor.u32 %v7980_v21, %v6897_v20  ;;  %3769 = vmatpush.bf16.msrb.mxu1 %v6642_v25  ;;  %v5494_v21 = vor.u32 %v7624_v7, %v5491_v8  ;;  %v7616_v25 = vld [vmem:[%s8692_s16 + $0x18c] sm:$0xf] }
 0x18d   : > { %v8044_v23 = vld [vmem:[%s8692_s16 + $0xee4] sm:$0xf0] }
 0x18e   : > { %v6353_v29 = vld [vmem:[%s8692_s16 + $0x888] sm:$0xf]  ;;  %v7154_v32 = vor.u32 %v8044_v23, %v7153_v22  ;;  %3782 = vmatpush.bf16.msrb.mxu2 %v6898_v26  ;;  %v3540_v22 = vpop.f32.mrf.mxu3  ;;  %v5750_v23 = vor.u32 %v7688_v9, %v5747_v12  ;;  %v5459_v26 = vld [vmem:[%s8692_s16 + $0x1a8] sm:$0xf0] }
 0x18f   : > { %v7844_v30 = vld [vmem:[%s8692_s16 + $0x8a4] sm:$0xf0]  ;;  %v5363_v12 = vld [vmem:[%s8692_s16 + $0xe8] sm:$0xf0] }
 0x190   : > { %v6609_v31 = vld [vmem:[%s8692_s16 + $0xa88] sm:$0xf]  ;;  %v6354_v43 = vor.u32 %v7844_v30, %v6353_v29  ;;  %3795 = vmatpush.bf16.msrb.mxu3 %v7154_v32  ;;  %v7680_v29 = vld [vmem:[%s8692_s16 + $0x38c] sm:$0xf]  ;;  %v3541_v30 = vadd.f32 %v3540_v22, %v3528_v15  ;;  %v6262_v32 = vor.u32 %v7816_v18, %v6259_v19 }
 0x191   : > { %v7908_v35 = vld [vmem:[%s8692_s16 + $0xaa4] sm:$0xf0]  ;;  %v7720_v18 = vld [vmem:[%s8692_s16 + $0x4cc] sm:$0xf] }
 0x192   : > { %v6865_v36 = vld [vmem:[%s8692_s16 + $0xc88] sm:$0xf]  ;;  %v6610_v45 = vor.u32 %v7908_v35, %v6609_v31  ;;  %3757 = vmatpush.bf16.msrb.mxu0 %v6354_v43  ;;  %v3503_v31 = vpop.f32.mrf.mxu0  ;;  %v5715_v35 = vld [vmem:[%s8692_s16 + $0x3a8] sm:$0xf0] }
 0x193   : > { %v7972_v37 = vld [vmem:[%s8692_s16 + $0xca4] sm:$0xf0]  ;;  %v6227_v43 = vld [vmem:[%s8692_s16 + $0x7a8] sm:$0xf0] }
 0x194   : > { %v7121_v39 = vld [vmem:[%s8692_s16 + $0xe88] sm:$0xf]  ;;  %v6866_v46 = vor.u32 %v7972_v37, %v6865_v36  ;;  %3770 = vmatpush.bf16.msrb.mxu1 %v6610_v45  ;;  %v7744_v36 = vld [vmem:[%s8692_s16 + $0x58c] sm:$0xf]  ;;  %v5462_v45 = vor.u32 %v7616_v25, %v5459_v26 }
 0x195   : > { %v8036_v40 = vld [vmem:[%s8692_s16 + $0xea4] sm:$0xf0]  ;;  %v5971_v37 = vld [vmem:[%s8692_s16 + $0x5a8] sm:$0xf0] }
 0x196   : > { %v6321_v47 = vld [vmem:[%s8692_s16 + $0x848] sm:$0xf]  ;;  %v7122_v50 = vor.u32 %v8036_v40, %v7121_v39  ;;  %3783 = vmatpush.bf16.msrb.mxu2 %v6866_v46  ;;  %v3516_v39 = vpop.f32.mrf.mxu1  ;;  %v7808_v40 = vld [vmem:[%s8692_s16 + $0x78c] sm:$0xf]  ;;  %v5718_v46 = vor.u32 %v7680_v29, %v5715_v35 }
 0x197   : > { %v7836_v48 = vld [vmem:[%s8692_s16 + $0x864] sm:$0xf0]  ;;  %v5875_v19 = vld [vmem:[%s8692_s16 + $0x4e8] sm:$0xf0] }
 0x198   : > { %v6577_v49 = vld [vmem:[%s8692_s16 + $0xa48] sm:$0xf]  ;;  %v6322_v57 = vor.u32 %v7836_v48, %v6321_v47  ;;  %3796 = vmatpush.bf16.msrb.mxu3 %v7122_v50  ;;  %v5974_v47 = vor.u32 %v7744_v36, %v5971_v37  ;;  %v7608_v48 = vld [vmem:[%s8692_s16 + $0x14c] sm:$0xf]  ;;  %v9188_v36 = vld [vmem:[%s8700_s12] sm:$0xff] }
 0x199   : > { %v7900_v51 = vld [vmem:[%s8692_s16 + $0xa64] sm:$0xf0]  ;;  %v7672_v50 = vld [vmem:[%s8692_s16 + $0x34c] sm:$0xf] }
 0x19a   : > { %v6833_v52 = vld [vmem:[%s8692_s16 + $0xc48] sm:$0xf]  ;;  %v6578_v61 = vor.u32 %v7900_v51, %v6577_v49  ;;  %3758 = vmatpush.bf16.msrb.mxu0 %v6322_v57  ;;  %v5427_v49 = vld [vmem:[%s8692_s16 + $0x168] sm:$0xf0]  ;;  %v3529_v51 = vpop.f32.mrf.mxu2  ;;  %v3553_v8 = vpop.f32.mrf.mxu0 }
 0x19b   : > { %v7964_v53 = vld [vmem:[%s8692_s16 + $0xc64] sm:$0xf0]  ;;  %v6195_v57 = vld [vmem:[%s8692_s16 + $0x768] sm:$0xf0]  ;;  %v3554_v14 = vadd.f32 %v3553_v8, %v3541_v30  ;;  %v5878_v30 = vor.u32 %v7720_v18, %v5875_v19  ;;  %v4352_v51 = vperm.slane %v9188_v36, 0 }
 0x19c   : > { %v7089_v54 = vld [vmem:[%s8692_s16 + $0xe48] sm:$0xf]  ;;  %v6834_v62 = vor.u32 %v7964_v53, %v6833_v52  ;;  %3771 = vmatpush.bf16.msrb.mxu1 %v6578_v61  ;;  %v6230_v52 = vor.u32 %v7808_v40, %v6227_v43  ;;  %v5683_v53 = vld [vmem:[%s8692_s16 + $0x368] sm:$0xf0] }
 0x19d   : > { %v8028_v55 = vld [vmem:[%s8692_s16 + $0xe64] sm:$0xf0]  ;;  %v5686_v60 = vor.u32 %v7672_v50, %v5683_v53  ;;  %v7584_v25 = vld [vmem:[%s8692_s16 + $0x8c] sm:$0xf] }
 0x19e   : > { %v6289_v58 = vld [vmem:[%s8692_s16 + $0x808] sm:$0xf]  ;;  %v7090_v3 = vor.u32 %v8028_v55, %v7089_v54  ;;  %3784 = vmatpush.bf16.msrb.mxu2 %v6834_v62  ;;  %v7736_v54 = vld [vmem:[%s8692_s16 + $0x54c] sm:$0xf]  ;;  %v3566_v15 = vpop.f32.mrf.mxu1 }
 0x19f   : > { %v7828_v59 = vld [vmem:[%s8692_s16 + $0x824] sm:$0xf0]  ;;  %v5939_v55 = vld [vmem:[%s8692_s16 + $0x568] sm:$0xf0]  ;;  %v3567_v22 = vadd.f32 %v3566_v15, %v3554_v14 }
 0x1a0   : > { %v6545_v63 = vld [vmem:[%s8692_s16 + $0xa08] sm:$0xf]  ;;  %v6290_v11 = vor.u32 %v7828_v59, %v6289_v58  ;;  %3797 = vmatpush.bf16.msrb.mxu3 %v7090_v3  ;;  %v5430_v58 = vor.u32 %v7608_v48, %v5427_v49  ;;  %v3542_v59 = vpop.f32.mrf.mxu3  ;;  %v5942_v61 = vor.u32 %v7736_v54, %v5939_v55  ;;  %v7600_v62 = vld [vmem:[%s8692_s16 + $0x10c] sm:$0xf] }
 0x1a1   : > { %v7892_v0 = vld [vmem:[%s8692_s16 + $0xa24] sm:$0xf0]  ;;  %v7728_v3 = vld [vmem:[%s8692_s16 + $0x50c] sm:$0xf] }
 0x1a2   : > { %v6801_v1 = vld [vmem:[%s8692_s16 + $0xc08] sm:$0xf]  ;;  %v6546_v16 = vor.u32 %v7892_v0, %v6545_v63  ;;  %3759 = vmatpush.bf16.msrb.mxu0 %v6290_v11  ;;  %v5395_v63 = vld [vmem:[%s8692_s16 + $0x128] sm:$0xf0]  ;;  %v3579_v35 = vpop.f32.mrf.mxu2 }
 0x1a3   : > { %v7956_v4 = vld [vmem:[%s8692_s16 + $0xc24] sm:$0xf0]  ;;  %v7664_v0 = vld [vmem:[%s8692_s16 + $0x30c] sm:$0xf]  ;;  %v5398_v7 = vor.u32 %v7600_v62, %v5395_v63  ;;  %v3580_v43 = vadd.f32 %v3579_v35, %v3567_v22 }
 0x1a4   : > { %v7057_v5 = vld [vmem:[%s8692_s16 + $0xe08] sm:$0xf]  ;;  %v6802_v17 = vor.u32 %v7956_v4, %v6801_v1  ;;  %3772 = vmatpush.bf16.msrb.mxu1 %v6546_v16  ;;  %v6198_v1 = vor.u32 %v7800_v56, %v6195_v57  ;;  %v5907_v4 = vld [vmem:[%s8692_s16 + $0x528] sm:$0xf0]  ;;  %v5654_v9 = vor.u32 %v7664_v0, %v5651_v2 }
 0x1a5   : > { %v8020_v6 = vld [vmem:[%s8692_s16 + $0xe24] sm:$0xf0]  ;;  %3760 = vmatmul.bf16.vlgmr.msrb.gmra.mxu0 %v8874_v41  ;;  %v5910_v10 = vor.u32 %v7728_v3, %v5907_v4  ;;  %v7592_v11 = vld [vmem:[%s8692_s16 + $0xcc] sm:$0xf] }
 0x1a6   : > { %v7058_v20 = vor.u32 %v8020_v6, %v7057_v5  ;;  %3785 = vmatpush.bf16.msrb.mxu2 %v6802_v17  ;;  %3804 = vmatpush.bf16.msra.mxu0 %v5494_v21  ;;  %v7792_v5 = vld [vmem:[%s8692_s16 + $0x70c] sm:$0xf] }
 0x1a7   : > { %3773 = vmatmul.bf16.vlgmr.msrb.gmra.mxu1 %v8878_v44  ;;  %v6163_v6 = vld [vmem:[%s8692_s16 + $0x728] sm:$0xf0] }
 0x1a8   : > { %3798 = vmatpush.bf16.msrb.mxu3 %v7058_v20  ;;  %3817 = vmatpush.bf16.msra.mxu1 %v5750_v23  ;;  %v6166_v16 = vor.u32 %v7792_v5, %v6163_v6  ;;  %v5619_v17 = vld [vmem:[%s8692_s16 + $0x2e8] sm:$0xf0] }
 0x1a9   : > { %3786 = vmatmul.bf16.vlgmr.msrb.gmra.mxu2 %v8870_v38  ;;  %v7784_v20 = vld [vmem:[%s8692_s16 + $0x6cc] sm:$0xf]  ;;  %v5622_v29 = vor.u32 %v7656_v13, %v5619_v17 }
 0x1aa   : > { %3830 = vmatpush.bf16.msra.mxu2 %v6006_v24  ;;  %3805 = vmatpush.bf16.msra.mxu0 %v5462_v45  ;;  %v6131_v21 = vld [vmem:[%s8692_s16 + $0x6e8] sm:$0xf0]  ;;  %v5366_v24 = vor.u32 %v7592_v11, %v5363_v12  ;;  %v3592_v45 = vpop.f32.mrf.mxu3  ;;  %v3581_v11 = vpop.f32.mrf.mxu2 }
 0x1ab   : > { %3799 = vmatmul.bf16.vlgmr.msrb.gmra.mxu3 %v8876_v42  ;;  %v9181_v23 = vld [vmem:[%s8698_s8] sm:$0xff]  ;;  %v6134_v37 = vor.u32 %v7784_v20, %v6131_v21  ;;  %v3593_v50 = vadd.f32 %v3592_v45, %v3580_v43 }
 0x1ac   : > { %3843 = vmatpush.bf16.msra.mxu3 %v6262_v32  ;;  %3818 = vmatpush.bf16.msra.mxu1 %v5718_v46  ;;  %v5331_v26 = vld [vmem:[%s8692_s16 + $0xa8] sm:$0xf0]  ;;  %v4326_v46 = vperm.slane %v9181_v23, 0 }
 0x1ad   : > { %v7648_v31 = vld [vmem:[%s8692_s16 + $0x28c] sm:$0xf]  ;;  %v5334_v49 = vor.u32 %v7584_v25, %v5331_v26 }
 0x1ae   : > { %3831 = vmatpush.bf16.msra.mxu2 %v5974_v47  ;;  %3806 = vmatpush.bf16.msra.mxu0 %v5430_v58  ;;  %v5587_v32 = vld [vmem:[%s8692_s16 + $0x2a8] sm:$0xf0]  ;;  %v3568_v58 = vpop.f32.mrf.mxu1 }
 0x1af   : > { %v7712_v39 = vld [vmem:[%s8692_s16 + $0x48c] sm:$0xf]  ;;  %v5590_v53 = vor.u32 %v7648_v31, %v5587_v32 }
 0x1b0   : > { %3844 = vmatpush.bf16.msra.mxu3 %v6230_v52  ;;  %3819 = vmatpush.bf16.msra.mxu1 %v5686_v60  ;;  %v5843_v40 = vld [vmem:[%s8692_s16 + $0x4a8] sm:$0xf0]  ;;  %v3555_v52 = vpop.f32.mrf.mxu0  ;;  %v4342_v60 = vmul.f32 %v4326_v46, %v3593_v50 }
 0x1b1   : > { %v7776_v47 = vld [vmem:[%s8692_s16 + $0x68c] sm:$0xf]  ;;  %v5846_v54 = vor.u32 %v7712_v39, %v5843_v40 }
 0x1b2   : > { %3832 = vmatpush.bf16.msra.mxu2 %v5942_v61  ;;  %3807 = vmatpush.bf16.msra.mxu0 %v5398_v7  ;;  %v6099_v48 = vld [vmem:[%s8692_s16 + $0x6a8] sm:$0xf0]  ;;  %v9204_v2 = vadd.f32 %v4352_v51, %v4342_v60 }
 0x1b3   : > { %v7576_v55 = vld [vmem:[%s8692_s16 + $0x4c] sm:$0xf]  ;;  %v6102_v59 = vor.u32 %v7776_v47, %v6099_v48 }
 0x1b4   : > { %3845 = vmatpush.bf16.msra.mxu3 %v6198_v1  ;;  %3820 = vmatpush.bf16.msra.mxu1 %v5654_v9  ;;  %v5299_v56 = vld [vmem:[%s8692_s16 + $0x68] sm:$0xf0] }
 0x1b5   : > { %v7640_v57 = vld [vmem:[%s8692_s16 + $0x24c] sm:$0xf]  ;;  %v5302_v3 = vor.u32 %v7576_v55, %v5299_v56 }
 0x1b6   : > { %3833 = vmatpush.bf16.msra.mxu2 %v5910_v10  ;;  %3808 = vmatpush.bf16.msra.mxu0 %v5366_v24  ;;  %v5555_v61 = vld [vmem:[%s8692_s16 + $0x268] sm:$0xf0] }
 0x1b7   : > { %v7704_v62 = vld [vmem:[%s8692_s16 + $0x44c] sm:$0xf]  ;;  %v5558_v6 = vor.u32 %v7640_v57, %v5555_v61 }
 0x1b8   : > { %3846 = vmatpush.bf16.msra.mxu3 %v6166_v16  ;;  %3821 = vmatpush.bf16.msra.mxu1 %v5622_v29  ;;  %v5811_v63 = vld [vmem:[%s8692_s16 + $0x468] sm:$0xf0]  ;;  %v3594_v16 = vpop.f32.mrf.mxu3 }
 0x1b9   : > { %v7768_v0 = vld [vmem:[%s8692_s16 + $0x64c] sm:$0xf]  ;;  %v5814_v7 = vor.u32 %v7704_v62, %v5811_v63 }
 0x1ba   : > { %3834 = vmatpush.bf16.msra.mxu2 %v5878_v30  ;;  %v6067_v1 = vld [vmem:[%s8692_s16 + $0x668] sm:$0xf0]  ;;  %3809 = vmatpush.bf16.msra.mxu0 %v5334_v49 }
 0x1bb   : > { %v7568_v4 = vld [vmem:[%s8692_s16 + $0xc] sm:$0xf]  ;;  %v6070_v12 = vor.u32 %v7768_v0, %v6067_v1 }
 0x1bc   : > { %3847 = vmatpush.bf16.msra.mxu3 %v6134_v37  ;;  %v5267_v5 = vld [vmem:[%s8692_s16 + $0x28] sm:$0xf0]  ;;  %3822 = vmatpush.bf16.msra.mxu1 %v5590_v53 }
 0x1bd   : > { %v7632_v8 = vld [vmem:[%s8692_s16 + $0x20c] sm:$0xf]  ;;  %v5270_v20 = vor.u32 %v7568_v4, %v5267_v5 }
 0x1be   : > { %3835 = vmatpush.bf16.msra.mxu2 %v5846_v54  ;;  %v5523_v9 = vld [vmem:[%s8692_s16 + $0x228] sm:$0xf0]  ;;  %3810 = vmatpush.bf16.msra.mxu0 %v5302_v3 }
 0x1bf   : > { %v7696_v10 = vld [vmem:[%s8692_s16 + $0x40c] sm:$0xf]  ;;  %v5526_v25 = vor.u32 %v7632_v8, %v5523_v9 }
 0x1c0   : > { %3848 = vmatpush.bf16.msra.mxu3 %v6102_v59  ;;  %v5779_v13 = vld [vmem:[%s8692_s16 + $0x428] sm:$0xf0]  ;;  %3823 = vmatpush.bf16.msra.mxu1 %v5558_v6 }
 0x1c1   : > { %v7760_v14 = vld [vmem:[%s8692_s16 + $0x60c] sm:$0xf]  ;;  %v5782_v26 = vor.u32 %v7696_v10, %v5779_v13  ;;  %v3605_v13 = vpop.f32.mrf.mxu0 }
 0x1c2   : > { %v6035_v15 = vld [vmem:[%s8692_s16 + $0x628] sm:$0xf0]  ;;  %3836 = vmatpush.bf16.msra.mxu2 %v5814_v7  ;;  %3811 = vmatpush.bf16.msra.mxu0 %v5270_v20 }
 0x1c3   : > { %v7880_v17 = vld [vmem:[%s8692_s16 + $0x9cc] sm:$0xf]  ;;  %v6038_v31 = vor.u32 %v7760_v14, %v6035_v15 }
 0x1c4   : > { %v6515_v18 = vld [vmem:[%s8692_s16 + $0x9e8] sm:$0xf0]  ;;  %3849 = vmatpush.bf16.msra.mxu3 %v6070_v12  ;;  %3824 = vmatpush.bf16.msra.mxu1 %v5526_v25 }
 0x1c5   : > { %v7944_v19 = vld [vmem:[%s8692_s16 + $0xbcc] sm:$0xf]  ;;  %v6518_v32 = vor.u32 %v7880_v17, %v6515_v18  ;;  %3812 = vmatmul.bf16.vlgmr.msra.gmra.mxu0 %v8820_v28 }
 0x1c6   : > { %v6771_v21 = vld [vmem:[%s8692_s16 + $0xbe8] sm:$0xf0]  ;;  %3837 = vmatpush.bf16.msra.mxu2 %v5782_v26 }
 0x1c7   : > { %v8008_v22 = vld [vmem:[%s8692_s16 + $0xdcc] sm:$0xf]  ;;  %v6774_v35 = vor.u32 %v7944_v19, %v6771_v21  ;;  %3856 = vmatpush.bf16.msrb.mxu0 %v6518_v32  ;;  %3825 = vmatmul.bf16.vlgmr.msra.gmra.mxu1 %v8826_v34  ;;  %v3618_v19 = vpop.f32.mrf.mxu1 }
 0x1c8   : > { %v7027_v24 = vld [vmem:[%s8692_s16 + $0xde8] sm:$0xf0]  ;;  %3850 = vmatpush.bf16.msra.mxu3 %v6038_v31  ;;  %v3619_v25 = vadd.f32 %v3618_v19, %v3605_v13  ;;  %v7629_v19 = vld [vmem:[%s8692_s16 + $0x1ec] sm:$0xf0] }
 0x1c9   : > { %v8072_v29 = vld [vmem:[%s8692_s16 + $0xfcc] sm:$0xf]  ;;  %v7030_v37 = vor.u32 %v8008_v22, %v7027_v24  ;;  %3869 = vmatpush.bf16.msrb.mxu1 %v6774_v35  ;;  %3838 = vmatmul.bf16.vlgmr.msra.gmra.mxu2 %v8818_v27 }
 0x1ca   : > { %v7283_v30 = vld [vmem:[%s8692_s16 + $0xfe8] sm:$0xf0] }
 0x1cb   : > { %v7872_v39 = vld [vmem:[%s8692_s16 + $0x98c] sm:$0xf]  ;;  %v7286_v45 = vor.u32 %v8072_v29, %v7283_v30  ;;  %3882 = vmatpush.bf16.msrb.mxu2 %v7030_v37  ;;  %3851 = vmatmul.bf16.vlgmr.msra.gmra.mxu3 %v8824_v33 }
 0x1cc   : > { %v6483_v40 = vld [vmem:[%s8692_s16 + $0x9a8] sm:$0xf0] }
 0x1cd   : > { %v7936_v43 = vld [vmem:[%s8692_s16 + $0xb8c] sm:$0xf]  ;;  %v6486_v51 = vor.u32 %v7872_v39, %v6483_v40  ;;  %3895 = vmatpush.bf16.msrb.mxu3 %v7286_v45  ;;  %v3631_v40 = vpop.f32.mrf.mxu2 }
 0x1ce   : > { %v6739_v46 = vld [vmem:[%s8692_s16 + $0xba8] sm:$0xf0] }
 0x1cf   : > { %v8000_v47 = vld [vmem:[%s8692_s16 + $0xd8c] sm:$0xf]  ;;  %v6742_v52 = vor.u32 %v7936_v43, %v6739_v46  ;;  %3857 = vmatpush.bf16.msrb.mxu0 %v6486_v51 }
 0x1d0   : > { %v6995_v48 = vld [vmem:[%s8692_s16 + $0xda8] sm:$0xf0] }
 0x1d1   : > { %v8064_v49 = vld [vmem:[%s8692_s16 + $0xf8c] sm:$0xf]  ;;  %v6998_v53 = vor.u32 %v8000_v47, %v6995_v48  ;;  %3870 = vmatpush.bf16.msrb.mxu1 %v6742_v52  ;;  %v3632_v48 = vadd.f32 %v3631_v40, %v3619_v25  ;;  %v7757_v25 = vld [vmem:[%s8692_s16 + $0x5ec] sm:$0xf0] }
 0x1d2   : > { %v7251_v50 = vld [vmem:[%s8692_s16 + $0xfa8] sm:$0xf0]  ;;  %v5465_v40 = vld [vmem:[%s8692_s16 + $0x190] sm:$0xf] }
 0x1d3   : > { %v7864_v54 = vld [vmem:[%s8692_s16 + $0x94c] sm:$0xf]  ;;  %v7254_v57 = vor.u32 %v8064_v49, %v7251_v50  ;;  %3883 = vmatpush.bf16.msrb.mxu2 %v6998_v53  ;;  %v3644_v49 = vpop.f32.mrf.mxu3 }
 0x1d4   : > { %v6451_v55 = vld [vmem:[%s8692_s16 + $0x968] sm:$0xf0]  ;;  %v9266_v53 = vadd.f32 %v3644_v49, %v3632_v48  ;;  %v5977_v48 = vld [vmem:[%s8692_s16 + $0x590] sm:$0xf] }
 0x1d5   : > { %v7928_v56 = vld [vmem:[%s8692_s16 + $0xb4c] sm:$0xf]  ;;  %v6454_v63 = vor.u32 %v7864_v54, %v6451_v55  ;;  %3896 = vmatpush.bf16.msrb.mxu3 %v7254_v57  ;;  %v3607_v54 = vpop.f32.mrf.mxu0  ;;  %v7749_v49 = vld [vmem:[%s8692_s16 + $0x5ac] sm:$0xf0] }
 0x1d6   : > { %v6707_v58 = vld [vmem:[%s8692_s16 + $0xb68] sm:$0xf0] }
 0x1d7   : > { %v7992_v59 = vld [vmem:[%s8692_s16 + $0xd4c] sm:$0xf]  ;;  %v6710_v0 = vor.u32 %v7928_v56, %v6707_v58  ;;  %3858 = vmatpush.bf16.msrb.mxu0 %v6454_v63 }
 0x1d8   : > { %v6963_v60 = vld [vmem:[%s8692_s16 + $0xd68] sm:$0xf0] }
 0x1d9   : > { %v8056_v61 = vld [vmem:[%s8692_s16 + $0xf4c] sm:$0xf]  ;;  %v6966_v1 = vor.u32 %v7992_v59, %v6963_v60  ;;  %3871 = vmatpush.bf16.msrb.mxu1 %v6710_v0  ;;  %v3620_v60 = vpop.f32.mrf.mxu1 }
 0x1da   : > { %v7219_v62 = vld [vmem:[%s8692_s16 + $0xf68] sm:$0xf0]  ;;  %v7677_v60 = vld [vmem:[%s8692_s16 + $0x36c] sm:$0xf0] }
 0x1db   : > { %v7856_v3 = vld [vmem:[%s8692_s16 + $0x90c] sm:$0xf]  ;;  %v7222_v6 = vor.u32 %v8056_v61, %v7219_v62  ;;  %3884 = vmatpush.bf16.msrb.mxu2 %v6966_v1 }
 0x1dc   : > { %v6419_v4 = vld [vmem:[%s8692_s16 + $0x928] sm:$0xf0] }
 0x1dd   : > { %v7920_v5 = vld [vmem:[%s8692_s16 + $0xb0c] sm:$0xf]  ;;  %v6422_v12 = vor.u32 %v7856_v3, %v6419_v4  ;;  %3897 = vmatpush.bf16.msrb.mxu3 %v7222_v6 }
 0x1de   : > { %v6675_v7 = vld [vmem:[%s8692_s16 + $0xb28] sm:$0xf0] }
 0x1df   : > { %v7984_v8 = vld [vmem:[%s8692_s16 + $0xd0c] sm:$0xf]  ;;  %v6678_v14 = vor.u32 %v7920_v5, %v6675_v7  ;;  %3859 = vmatpush.bf16.msrb.mxu0 %v6422_v12  ;;  %v3633_v12 = vpop.f32.mrf.mxu2 }
 0x1e0   : > { %v6931_v9 = vld [vmem:[%s8692_s16 + $0xd28] sm:$0xf0]  ;;  %v6169_v12 = vld [vmem:[%s8692_s16 + $0x710] sm:$0xf] }
 0x1e1   : > { %v8048_v10 = vld [vmem:[%s8692_s16 + $0xf0c] sm:$0xf]  ;;  %v6934_v15 = vor.u32 %v7984_v8, %v6931_v9  ;;  %3872 = vmatpush.bf16.msrb.mxu1 %v6678_v14 }
 0x1e2   : > { %v7187_v11 = vld [vmem:[%s8692_s16 + $0xf28] sm:$0xf0] }
 0x1e3   : > { %v7848_v16 = vld [vmem:[%s8692_s16 + $0x8cc] sm:$0xf]  ;;  %v7190_v20 = vor.u32 %v8048_v10, %v7187_v11  ;;  %3885 = vmatpush.bf16.msrb.mxu2 %v6934_v15 }
 0x1e4   : > { %v6387_v17 = vld [vmem:[%s8692_s16 + $0x8e8] sm:$0xf0] }
 0x1e5   : > { %v7912_v18 = vld [vmem:[%s8692_s16 + $0xacc] sm:$0xf]  ;;  %v6390_v30 = vor.u32 %v7848_v16, %v6387_v17  ;;  %3898 = vmatpush.bf16.msrb.mxu3 %v7190_v20  ;;  %v3646_v17 = vpop.f32.mrf.mxu3  ;;  %v5753_v20 = vld [vmem:[%s8692_s16 + $0x3d0] sm:$0xf] }
 0x1e6   : > { %v6643_v21 = vld [vmem:[%s8692_s16 + $0xae8] sm:$0xf0] }
 0x1e7   : > { %v7976_v22 = vld [vmem:[%s8692_s16 + $0xccc] sm:$0xf]  ;;  %v6646_v31 = vor.u32 %v7912_v18, %v6643_v21  ;;  %3860 = vmatpush.bf16.msrb.mxu0 %v6390_v30  ;;  %v5497_v18 = vld [vmem:[%s8692_s16 + $0x1d0] sm:$0xf] }
 0x1e8   : > { %v6899_v24 = vld [vmem:[%s8692_s16 + $0xce8] sm:$0xf0]  ;;  %v6265_v30 = vld [vmem:[%s8692_s16 + $0x7d0] sm:$0xf] }
 0x1e9   : > { %v8040_v26 = vld [vmem:[%s8692_s16 + $0xecc] sm:$0xf]  ;;  %v6902_v32 = vor.u32 %v7976_v22, %v6899_v24  ;;  %3873 = vmatpush.bf16.msrb.mxu1 %v6646_v31  ;;  %v7693_v22 = vld [vmem:[%s8692_s16 + $0x3ec] sm:$0xf0] }
 0x1ea   : > { %v7155_v29 = vld [vmem:[%s8692_s16 + $0xee8] sm:$0xf0]  ;;  %v6009_v24 = vld [vmem:[%s8692_s16 + $0x5d0] sm:$0xf] }
 0x1eb   : > { %v7840_v35 = vld [vmem:[%s8692_s16 + $0x88c] sm:$0xf]  ;;  %v7158_v43 = vor.u32 %v8040_v26, %v7155_v29  ;;  %3886 = vmatpush.bf16.msrb.mxu2 %v6902_v32  ;;  %v7821_v31 = vld [vmem:[%s8692_s16 + $0x7ec] sm:$0xf0] }
 0x1ec   : > { %v6355_v37 = vld [vmem:[%s8692_s16 + $0x8a8] sm:$0xf0] }
 0x1ed   : > { %v7904_v39 = vld [vmem:[%s8692_s16 + $0xa8c] sm:$0xf]  ;;  %v6358_v52 = vor.u32 %v7840_v35, %v6355_v37  ;;  %3899 = vmatpush.bf16.msrb.mxu3 %v7158_v43  ;;  %v5498_v35 = vor.u32 %v7629_v19, %v5497_v18  ;;  %v5754_v37 = vor.u32 %v7693_v22, %v5753_v20  ;;  %v7621_v43 = vld [vmem:[%s8692_s16 + $0x1ac] sm:$0xf0]  ;;  %v3670_v22 = vpop.f32.mrf.mxu1 }
 0x1ee   : > { %v6611_v45 = vld [vmem:[%s8692_s16 + $0xaa8] sm:$0xf0]  ;;  %v5369_v18 = vld [vmem:[%s8692_s16 + $0xd0] sm:$0xf] }
 0x1ef   : > { %v7968_v46 = vld [vmem:[%s8692_s16 + $0xc8c] sm:$0xf]  ;;  %v6614_v55 = vor.u32 %v7904_v39, %v6611_v45  ;;  %3861 = vmatpush.bf16.msrb.mxu0 %v6358_v52  ;;  %v6010_v39 = vor.u32 %v7757_v25, %v6009_v24  ;;  %v5721_v45 = vld [vmem:[%s8692_s16 + $0x390] sm:$0xf]  ;;  %v5466_v52 = vor.u32 %v7621_v43, %v5465_v40 }
 0x1f0   : > { %v6867_v47 = vld [vmem:[%s8692_s16 + $0xca8] sm:$0xf0]  ;;  %v7597_v19 = vld [vmem:[%s8692_s16 + $0xec] sm:$0xf0] }
 0x1f1   : > { %v8032_v50 = vld [vmem:[%s8692_s16 + $0xe8c] sm:$0xf]  ;;  %v6870_v56 = vor.u32 %v7968_v46, %v6867_v47  ;;  %3874 = vmatpush.bf16.msrb.mxu1 %v6614_v55  ;;  %v6266_v46 = vor.u32 %v7821_v31, %v6265_v30  ;;  %v7685_v47 = vld [vmem:[%s8692_s16 + $0x3ac] sm:$0xf0]  ;;  %v5978_v55 = vor.u32 %v7749_v49, %v5977_v48 }
 0x1f2   : > { %v7123_v51 = vld [vmem:[%s8692_s16 + $0xea8] sm:$0xf0]  ;;  %v5722_v54 = vor.u32 %v7685_v47, %v5721_v45  ;;  %v5625_v20 = vld [vmem:[%s8692_s16 + $0x2d0] sm:$0xf] }
 0x1f3   : > { %v7832_v57 = vld [vmem:[%s8692_s16 + $0x84c] sm:$0xf]  ;;  %v7126_v61 = vor.u32 %v8032_v50, %v7123_v51  ;;  %3887 = vmatpush.bf16.msrb.mxu2 %v6870_v56  ;;  %v6233_v50 = vld [vmem:[%s8692_s16 + $0x790] sm:$0xf] }
 0x1f4   : > { %v6323_v58 = vld [vmem:[%s8692_s16 + $0x868] sm:$0xf0]  ;;  %v7813_v51 = vld [vmem:[%s8692_s16 + $0x7ac] sm:$0xf0] }
 0x1f5   : > { %v7896_v59 = vld [vmem:[%s8692_s16 + $0xa4c] sm:$0xf]  ;;  %v6326_v4 = vor.u32 %v7832_v57, %v6323_v58  ;;  %3900 = vmatpush.bf16.msrb.mxu3 %v7126_v61  ;;  %v5433_v56 = vld [vmem:[%s8692_s16 + $0x150] sm:$0xf] }
 0x1f6   : > { %v6579_v62 = vld [vmem:[%s8692_s16 + $0xa68] sm:$0xf0]  ;;  %v7613_v57 = vld [vmem:[%s8692_s16 + $0x16c] sm:$0xf0] }
 0x1f7   : > { %v7960_v63 = vld [vmem:[%s8692_s16 + $0xc4c] sm:$0xf]  ;;  %v6582_v7 = vor.u32 %v7896_v59, %v6579_v62  ;;  %3862 = vmatpush.bf16.msrb.mxu0 %v6326_v4  ;;  %v5689_v58 = vld [vmem:[%s8692_s16 + $0x350] sm:$0xf]  ;;  %v6234_v59 = vor.u32 %v7813_v51, %v6233_v50  ;;  %v3696_v51 = vpop.f32.mrf.mxu3 }
 0x1f8   : > { %v6835_v0 = vld [vmem:[%s8692_s16 + $0xc68] sm:$0xf0]  ;;  %v5945_v61 = vld [vmem:[%s8692_s16 + $0x550] sm:$0xf] }
 0x1f9   : > { %v8024_v1 = vld [vmem:[%s8692_s16 + $0xe4c] sm:$0xf]  ;;  %v6838_v8 = vor.u32 %v7960_v63, %v6835_v0  ;;  %3875 = vmatpush.bf16.msrb.mxu1 %v6582_v7  ;;  %v7741_v62 = vld [vmem:[%s8692_s16 + $0x56c] sm:$0xf0] }
 0x1fa   : > { %v7091_v3 = vld [vmem:[%s8692_s16 + $0xe68] sm:$0xf0]  ;;  %v6201_v63 = vld [vmem:[%s8692_s16 + $0x750] sm:$0xf]  ;;  %v5946_v4 = vor.u32 %v7741_v62, %v5945_v61 }
 0x1fb   : > { %v7824_v5 = vld [vmem:[%s8692_s16 + $0x80c] sm:$0xf]  ;;  %v7094_v13 = vor.u32 %v8024_v1, %v7091_v3  ;;  %3888 = vmatpush.bf16.msrb.mxu2 %v6838_v8  ;;  %v7805_v0 = vld [vmem:[%s8692_s16 + $0x76c] sm:$0xf0]  ;;  %v5434_v1 = vor.u32 %v7613_v57, %v5433_v56  ;;  %v5690_v3 = vor.u32 %v7677_v60, %v5689_v58  ;;  %v4353_v58 = vperm.slane %v9188_v36, 1 }
 0x1fc   : > { %v6291_v6 = vld [vmem:[%s8692_s16 + $0x828] sm:$0xf0]  ;;  %v5657_v7 = vld [vmem:[%s8692_s16 + $0x310] sm:$0xf]  ;;  %v6202_v8 = vor.u32 %v7805_v0, %v6201_v63  ;;  %v3672_v0 = vpop.f32.mrf.mxu1 }
 0x1fd   : > { %v7888_v9 = vld [vmem:[%s8692_s16 + $0xa0c] sm:$0xf]  ;;  %v6294_v21 = vor.u32 %v7824_v5, %v6291_v6  ;;  %3901 = vmatpush.bf16.msrb.mxu3 %v7094_v13  ;;  %v5401_v5 = vld [vmem:[%s8692_s16 + $0x110] sm:$0xf] }
 0x1fe   : > { %v6547_v10 = vld [vmem:[%s8692_s16 + $0xa28] sm:$0xf0]  ;;  %v7605_v6 = vld [vmem:[%s8692_s16 + $0x12c] sm:$0xf0] }
 0x1ff   : > { %v7952_v11 = vld [vmem:[%s8692_s16 + $0xc0c] sm:$0xf]  ;;  %v6550_v26 = vor.u32 %v7888_v9, %v6547_v10  ;;  %3863 = vmatpush.bf16.msrb.mxu0 %v6294_v21  ;;  %v7669_v9 = vld [vmem:[%s8692_s16 + $0x32c] sm:$0xf0] }
 0x200   : > { %v6803_v14 = vld [vmem:[%s8692_s16 + $0xc28] sm:$0xf0]  ;;  %v5913_v10 = vld [vmem:[%s8692_s16 + $0x510] sm:$0xf] }
 0x201   : > { %v8016_v15 = vld [vmem:[%s8692_s16 + $0xe0c] sm:$0xf]  ;;  %v6806_v29 = vor.u32 %v7952_v11, %v6803_v14  ;;  %3876 = vmatpush.bf16.msrb.mxu1 %v6550_v26  ;;  %v7733_v11 = vld [vmem:[%s8692_s16 + $0x52c] sm:$0xf0]  ;;  %v5402_v14 = vor.u32 %v7605_v6, %v5401_v5 }
 0x202   : > { %v7059_v16 = vld [vmem:[%s8692_s16 + $0xe28] sm:$0xf0]  ;;  %3864 = vmatmul.bf16.vlgmr.msrb.gmra.mxu0 %v8874_v41  ;;  %v7797_v13 = vld [vmem:[%s8692_s16 + $0x72c] sm:$0xf0]  ;;  %v5914_v17 = vor.u32 %v7733_v11, %v5913_v10 }
 0x203   : > { %v7062_v32 = vor.u32 %v8016_v15, %v7059_v16  ;;  %3889 = vmatpush.bf16.msrb.mxu2 %v6806_v29  ;;  %3908 = vmatpush.bf16.msra.mxu0 %v5498_v35  ;;  %v3657_v15 = vpop.f32.mrf.mxu0  ;;  %v5658_v16 = vor.u32 %v7669_v9, %v5657_v7  ;;  %v6170_v24 = vor.u32 %v7797_v13, %v6169_v12  ;;  %v7661_v25 = vld [vmem:[%s8692_s16 + $0x2ec] sm:$0xf0] }
 0x204   : > { %3877 = vmatmul.bf16.vlgmr.msrb.gmra.mxu1 %v8878_v44  ;;  %v3658_v21 = vadd.f32 %v3657_v15, %v9266_v53  ;;  %v5881_v26 = vld [vmem:[%s8692_s16 + $0x4d0] sm:$0xf]  ;;  %v5370_v35 = vor.u32 %v7597_v19, %v5369_v18  ;;  %v5626_v53 = vor.u32 %v7661_v25, %v5625_v20 }
 0x205   : > { %3902 = vmatpush.bf16.msrb.mxu3 %v7062_v32  ;;  %3921 = vmatpush.bf16.msra.mxu1 %v5754_v37  ;;  %v7725_v29 = vld [vmem:[%s8692_s16 + $0x4ec] sm:$0xf0] }
 0x206   : > { %3890 = vmatmul.bf16.vlgmr.msrb.gmra.mxu2 %v8870_v38  ;;  %v6137_v30 = vld [vmem:[%s8692_s16 + $0x6d0] sm:$0xf]  ;;  %v3671_v32 = vadd.f32 %v3670_v22, %v3658_v21  ;;  %v3698_v22 = vpop.f32.mrf.mxu3 }
 0x207   : > { %3934 = vmatpush.bf16.msra.mxu2 %v6010_v39  ;;  %3909 = vmatpush.bf16.msra.mxu0 %v5466_v52  ;;  %v7789_v31 = vld [vmem:[%s8692_s16 + $0x6ec] sm:$0xf0]  ;;  %v5882_v39 = vor.u32 %v7725_v29, %v5881_v26  ;;  %v4327_v52 = vperm.slane %v9181_v23, 1 }
 0x208   : > { %3903 = vmatmul.bf16.vlgmr.msrb.gmra.mxu3 %v8876_v42  ;;  %v5337_v37 = vld [vmem:[%s8692_s16 + $0x90] sm:$0xf]  ;;  %v6138_v47 = vor.u32 %v7789_v31, %v6137_v30 }
 0x209   : > { %3947 = vmatpush.bf16.msra.mxu3 %v6266_v46  ;;  %3922 = vmatpush.bf16.msra.mxu1 %v5722_v54  ;;  %v7589_v40 = vld [vmem:[%s8692_s16 + $0xac] sm:$0xf0]  ;;  %v3683_v46 = vpop.f32.mrf.mxu2 }
 0x20a   : > { %v5593_v43 = vld [vmem:[%s8692_s16 + $0x290] sm:$0xf]  ;;  %v3684_v50 = vadd.f32 %v3683_v46, %v3671_v32  ;;  %v5338_v56 = vor.u32 %v7589_v40, %v5337_v37 }
 0x20b   : > { %3935 = vmatpush.bf16.msra.mxu2 %v5978_v55  ;;  %3910 = vmatpush.bf16.msra.mxu0 %v5434_v1  ;;  %v7653_v45 = vld [vmem:[%s8692_s16 + $0x2ac] sm:$0xf0] }
 0x20c   : > { %v5849_v48 = vld [vmem:[%s8692_s16 + $0x490] sm:$0xf]  ;;  %v3697_v57 = vadd.f32 %v3696_v51, %v3684_v50  ;;  %v5594_v60 = vor.u32 %v7653_v45, %v5593_v43 }
 0x20d   : > { %3948 = vmatpush.bf16.msra.mxu3 %v6234_v59  ;;  %3923 = vmatpush.bf16.msra.mxu1 %v5690_v3  ;;  %v7717_v49 = vld [vmem:[%s8692_s16 + $0x4ac] sm:$0xf0]  ;;  %v3659_v59 = vpop.f32.mrf.mxu0 }
 0x20e   : > { %v6105_v54 = vld [vmem:[%s8692_s16 + $0x690] sm:$0xf]  ;;  %v5850_v61 = vor.u32 %v7717_v49, %v5849_v48  ;;  %v4343_v3 = vmul.f32 %v4327_v52, %v3697_v57 }
 0x20f   : > { %3936 = vmatpush.bf16.msra.mxu2 %v5946_v4  ;;  %3911 = vmatpush.bf16.msra.mxu0 %v5402_v14  ;;  %v7781_v55 = vld [vmem:[%s8692_s16 + $0x6ac] sm:$0xf0] }
 0x210   : > { %v5305_v62 = vld [vmem:[%s8692_s16 + $0x50] sm:$0xf]  ;;  %v6106_v1 = vor.u32 %v7781_v55, %v6105_v54 }
 0x211   : > { %3949 = vmatpush.bf16.msra.mxu3 %v6202_v8  ;;  %3924 = vmatpush.bf16.msra.mxu1 %v5658_v16  ;;  %v7581_v23 = vld [vmem:[%s8692_s16 + $0x6c] sm:$0xf0]  ;;  %v9347_v8 = vadd.f32 %v4353_v58, %v4343_v3 }
 0x212   : > { %v5561_v63 = vld [vmem:[%s8692_s16 + $0x250] sm:$0xf]  ;;  %v5306_v9 = vor.u32 %v7581_v23, %v5305_v62 }
 0x213   : > { %3937 = vmatpush.bf16.msra.mxu2 %v5914_v17  ;;  %3912 = vmatpush.bf16.msra.mxu0 %v5370_v35  ;;  %v7645_v4 = vld [vmem:[%s8692_s16 + $0x26c] sm:$0xf0]  ;;  %v3685_v17 = vpop.f32.mrf.mxu2 }
 0x214   : > { %v5817_v36 = vld [vmem:[%s8692_s16 + $0x450] sm:$0xf]  ;;  %v5562_v12 = vor.u32 %v7645_v4, %v5561_v63 }
 0x215   : > { %3950 = vmatpush.bf16.msra.mxu3 %v6170_v24  ;;  %3925 = vmatpush.bf16.msra.mxu1 %v5626_v53  ;;  %v7709_v5 = vld [vmem:[%s8692_s16 + $0x46c] sm:$0xf0] }
 0x216   : > { %v6073_v6 = vld [vmem:[%s8692_s16 + $0x650] sm:$0xf]  ;;  %v5818_v13 = vor.u32 %v7709_v5, %v5817_v36 }
 0x217   : > { %3938 = vmatpush.bf16.msra.mxu2 %v5882_v39  ;;  %v7773_v7 = vld [vmem:[%s8692_s16 + $0x66c] sm:$0xf0]  ;;  %3913 = vmatpush.bf16.msra.mxu0 %v5338_v56 }
 0x218   : > { %v5273_v10 = vld [vmem:[%s8692_s16 + $0x10] sm:$0xf]  ;;  %v6074_v18 = vor.u32 %v7773_v7, %v6073_v6 }
 0x219   : > { %3951 = vmatpush.bf16.msra.mxu3 %v6138_v47  ;;  %v7573_v11 = vld [vmem:[%s8692_s16 + $0x2c] sm:$0xf0]  ;;  %3926 = vmatpush.bf16.msra.mxu1 %v5594_v60 }
 0x21a   : > { %v5529_v14 = vld [vmem:[%s8692_s16 + $0x210] sm:$0xf]  ;;  %v5274_v29 = vor.u32 %v7573_v11, %v5273_v10 }
 0x21b   : > { %3939 = vmatpush.bf16.msra.mxu2 %v5850_v61  ;;  %v7637_v15 = vld [vmem:[%s8692_s16 + $0x22c] sm:$0xf0]  ;;  %3914 = vmatpush.bf16.msra.mxu0 %v5306_v9 }
 0x21c   : > { %v5785_v16 = vld [vmem:[%s8692_s16 + $0x410] sm:$0xf]  ;;  %v5530_v35 = vor.u32 %v7637_v15, %v5529_v14 }
 0x21d   : > { %3952 = vmatpush.bf16.msra.mxu3 %v6106_v1  ;;  %v7701_v19 = vld [vmem:[%s8692_s16 + $0x42c] sm:$0xf0]  ;;  %3927 = vmatpush.bf16.msra.mxu1 %v5562_v12 }
 0x21e   : > { %v6041_v20 = vld [vmem:[%s8692_s16 + $0x610] sm:$0xf]  ;;  %v5786_v37 = vor.u32 %v7701_v19, %v5785_v16 }
 0x21f   : > { %v7765_v21 = vld [vmem:[%s8692_s16 + $0x62c] sm:$0xf0]  ;;  %3940 = vmatpush.bf16.msra.mxu2 %v5818_v13  ;;  %3915 = vmatpush.bf16.msra.mxu0 %v5274_v29 }
 0x220   : > { %v6521_v24 = vld [vmem:[%s8692_s16 + $0x9d0] sm:$0xf]  ;;  %v6042_v40 = vor.u32 %v7765_v21, %v6041_v20 }
 0x221   : > { %v7885_v25 = vld [vmem:[%s8692_s16 + $0x9ec] sm:$0xf0]  ;;  %3953 = vmatpush.bf16.msra.mxu3 %v6074_v18  ;;  %3928 = vmatpush.bf16.msra.mxu1 %v5530_v35  ;;  %v3709_v18 = vpop.f32.mrf.mxu0 }
 0x222   : > { %v6777_v26 = vld [vmem:[%s8692_s16 + $0xbd0] sm:$0xf]  ;;  %v6522_v43 = vor.u32 %v7885_v25, %v6521_v24  ;;  %3916 = vmatmul.bf16.vlgmr.msra.gmra.mxu0 %v8820_v28  ;;  %v3722_v25 = vpop.f32.mrf.mxu1 }
 0x223   : > { %v7949_v30 = vld [vmem:[%s8692_s16 + $0xbec] sm:$0xf0]  ;;  %3941 = vmatpush.bf16.msra.mxu2 %v5786_v37 }
 0x224   : > { %v7033_v31 = vld [vmem:[%s8692_s16 + $0xdd0] sm:$0xf]  ;;  %v6778_v45 = vor.u32 %v7949_v30, %v6777_v26  ;;  %3960 = vmatpush.bf16.msrb.mxu0 %v6522_v43  ;;  %3929 = vmatmul.bf16.vlgmr.msra.gmra.mxu1 %v8826_v34 }
 0x225   : > { %v8013_v32 = vld [vmem:[%s8692_s16 + $0xdec] sm:$0xf0]  ;;  %3954 = vmatpush.bf16.msra.mxu3 %v6042_v40 }
 0x226   : > { %v7289_v53 = vld [vmem:[%s8692_s16 + $0xfd0] sm:$0xf]  ;;  %v7034_v46 = vor.u32 %v8013_v32, %v7033_v31  ;;  %3973 = vmatpush.bf16.msrb.mxu1 %v6778_v45  ;;  %3942 = vmatmul.bf16.vlgmr.msra.gmra.mxu2 %v8818_v27  ;;  %v3723_v32 = vadd.f32 %v3722_v25, %v3709_v18  ;;  %v7689_v25 = vld [vmem:[%s8692_s16 + $0x3d4] sm:$0xf] }
 0x227   : > { %v8077_v39 = vld [vmem:[%s8692_s16 + $0xfec] sm:$0xf0] }
 0x228   : > { %v6489_v47 = vld [vmem:[%s8692_s16 + $0x990] sm:$0xf]  ;;  %v7290_v50 = vor.u32 %v8077_v39, %v7289_v53  ;;  %3986 = vmatpush.bf16.msrb.mxu2 %v7034_v46  ;;  %3955 = vmatmul.bf16.vlgmr.msra.gmra.mxu3 %v8824_v33 }
 0x229   : > { %v7877_v48 = vld [vmem:[%s8692_s16 + $0x9ac] sm:$0xf0] }
 0x22a   : > { %v6745_v49 = vld [vmem:[%s8692_s16 + $0xb90] sm:$0xf]  ;;  %v6490_v57 = vor.u32 %v7877_v48, %v6489_v47  ;;  %3999 = vmatpush.bf16.msrb.mxu3 %v7290_v50  ;;  %v3735_v47 = vpop.f32.mrf.mxu2 }
 0x22b   : > { %v7941_v51 = vld [vmem:[%s8692_s16 + $0xbac] sm:$0xf0] }
 0x22c   : > { %v7001_v52 = vld [vmem:[%s8692_s16 + $0xd90] sm:$0xf]  ;;  %v6746_v58 = vor.u32 %v7941_v51, %v6745_v49  ;;  %3961 = vmatpush.bf16.msrb.mxu0 %v6490_v57 }
 0x22d   : > { %v8005_v54 = vld [vmem:[%s8692_s16 + $0xdac] sm:$0xf0] }
 0x22e   : > { %v7257_v55 = vld [vmem:[%s8692_s16 + $0xf90] sm:$0xf]  ;;  %v7002_v59 = vor.u32 %v8005_v54, %v7001_v52  ;;  %3974 = vmatpush.bf16.msrb.mxu1 %v6746_v58  ;;  %v3736_v52 = vadd.f32 %v3735_v47, %v3723_v32  ;;  %v3748_v54 = vpop.f32.mrf.mxu3  ;;  %v5467_v47 = vld [vmem:[%s8692_s16 + $0x1b0] sm:$0xf0] }
 0x22f   : > { %v8069_v56 = vld [vmem:[%s8692_s16 + $0xfac] sm:$0xf0] }
 0x230   : > { %v6457_v60 = vld [vmem:[%s8692_s16 + $0x950] sm:$0xf]  ;;  %v7258_v23 = vor.u32 %v8069_v56, %v7257_v55  ;;  %3987 = vmatpush.bf16.msrb.mxu2 %v7002_v59  ;;  %v9409_v58 = vadd.f32 %v3748_v54, %v3736_v52  ;;  %v3711_v59 = vpop.f32.mrf.mxu0  ;;  %v5979_v52 = vld [vmem:[%s8692_s16 + $0x5b0] sm:$0xf0] }
 0x231   : > { %v7869_v61 = vld [vmem:[%s8692_s16 + $0x96c] sm:$0xf0]  ;;  %v7809_v54 = vld [vmem:[%s8692_s16 + $0x794] sm:$0xf] }
 0x232   : > { %v6713_v62 = vld [vmem:[%s8692_s16 + $0xb50] sm:$0xf]  ;;  %v6458_v36 = vor.u32 %v7869_v61, %v6457_v60  ;;  %4000 = vmatpush.bf16.msrb.mxu3 %v7258_v23 }
 0x233   : > { %v7933_v63 = vld [vmem:[%s8692_s16 + $0xb6c] sm:$0xf0] }
 0x234   : > { %v6969_v0 = vld [vmem:[%s8692_s16 + $0xd50] sm:$0xf]  ;;  %v6714_v5 = vor.u32 %v7933_v63, %v6713_v62  ;;  %3962 = vmatpush.bf16.msrb.mxu0 %v6458_v36 }
 0x235   : > { %v7997_v1 = vld [vmem:[%s8692_s16 + $0xd6c] sm:$0xf0] }
 0x236   : > { %v7225_v3 = vld [vmem:[%s8692_s16 + $0xf50] sm:$0xf]  ;;  %v6970_v6 = vor.u32 %v7997_v1, %v6969_v0  ;;  %3975 = vmatpush.bf16.msrb.mxu1 %v6714_v5  ;;  %v3724_v0 = vpop.f32.mrf.mxu1 }
 0x237   : > { %v8061_v4 = vld [vmem:[%s8692_s16 + $0xf6c] sm:$0xf0]  ;;  %v7737_v0 = vld [vmem:[%s8692_s16 + $0x554] sm:$0xf] }
 0x238   : > { %v6425_v7 = vld [vmem:[%s8692_s16 + $0x910] sm:$0xf]  ;;  %v7226_v11 = vor.u32 %v8061_v4, %v7225_v3  ;;  %3988 = vmatpush.bf16.msrb.mxu2 %v6970_v6 }
 0x239   : > { %v7861_v9 = vld [vmem:[%s8692_s16 + $0x92c] sm:$0xf0] }
 0x23a   : > { %v6681_v10 = vld [vmem:[%s8692_s16 + $0xb10] sm:$0xf]  ;;  %v6426_v17 = vor.u32 %v7861_v9, %v6425_v7  ;;  %4001 = vmatpush.bf16.msrb.mxu3 %v7226_v11 }
 0x23b   : > { %v7925_v12 = vld [vmem:[%s8692_s16 + $0xb2c] sm:$0xf0] }
 0x23c   : > { %v6937_v13 = vld [vmem:[%s8692_s16 + $0xd10] sm:$0xf]  ;;  %v6682_v19 = vor.u32 %v7925_v12, %v6681_v10  ;;  %3963 = vmatpush.bf16.msrb.mxu0 %v6426_v17 }
 0x23d   : > { %v7989_v14 = vld [vmem:[%s8692_s16 + $0xd2c] sm:$0xf0] }
 0x23e   : > { %v7193_v15 = vld [vmem:[%s8692_s16 + $0xf10] sm:$0xf]  ;;  %v6938_v20 = vor.u32 %v7989_v14, %v6937_v13  ;;  %3976 = vmatpush.bf16.msrb.mxu1 %v6682_v19 }
 0x23f   : > { %v8053_v16 = vld [vmem:[%s8692_s16 + $0xf2c] sm:$0xf0] }
 0x240   : > { %v6393_v21 = vld [vmem:[%s8692_s16 + $0x8d0] sm:$0xf]  ;;  %v7194_v26 = vor.u32 %v8053_v16, %v7193_v15  ;;  %3989 = vmatpush.bf16.msrb.mxu2 %v6938_v20  ;;  %v3737_v16 = vpop.f32.mrf.mxu2 }
 0x241   : > { %v7853_v22 = vld [vmem:[%s8692_s16 + $0x8ec] sm:$0xf0]  ;;  %v6171_v16 = vld [vmem:[%s8692_s16 + $0x730] sm:$0xf0] }
 0x242   : > { %v6649_v24 = vld [vmem:[%s8692_s16 + $0xad0] sm:$0xf]  ;;  %v6394_v53 = vor.u32 %v7853_v22, %v6393_v21  ;;  %4002 = vmatpush.bf16.msrb.mxu3 %v7194_v26  ;;  %v3750_v21 = vpop.f32.mrf.mxu3  ;;  %v7625_v22 = vld [vmem:[%s8692_s16 + $0x1d4] sm:$0xf] }
 0x243   : > { %v7917_v29 = vld [vmem:[%s8692_s16 + $0xaec] sm:$0xf0]  ;;  %v7593_v21 = vld [vmem:[%s8692_s16 + $0xd4] sm:$0xf] }
 0x244   : > { %v6905_v30 = vld [vmem:[%s8692_s16 + $0xcd0] sm:$0xf]  ;;  %v6650_v39 = vor.u32 %v7917_v29, %v6649_v24  ;;  %3964 = vmatpush.bf16.msrb.mxu0 %v6394_v53  ;;  %v5499_v24 = vld [vmem:[%s8692_s16 + $0x1f0] sm:$0xf0] }
 0x245   : > { %v7981_v31 = vld [vmem:[%s8692_s16 + $0xcec] sm:$0xf0]  ;;  %v5755_v29 = vld [vmem:[%s8692_s16 + $0x3f0] sm:$0xf0] }
 0x246   : > { %v7161_v35 = vld [vmem:[%s8692_s16 + $0xed0] sm:$0xf]  ;;  %v6906_v40 = vor.u32 %v7981_v31, %v6905_v30  ;;  %3977 = vmatpush.bf16.msrb.mxu1 %v6650_v39  ;;  %v7753_v30 = vld [vmem:[%s8692_s16 + $0x5d4] sm:$0xf] }
 0x247   : > { %v8045_v37 = vld [vmem:[%s8692_s16 + $0xeec] sm:$0xf0]  ;;  %v6011_v31 = vld [vmem:[%s8692_s16 + $0x5f0] sm:$0xf0] }
 0x248   : > { %v6361_v43 = vld [vmem:[%s8692_s16 + $0x890] sm:$0xf]  ;;  %v7162_v48 = vor.u32 %v8045_v37, %v7161_v35  ;;  %3990 = vmatpush.bf16.msrb.mxu2 %v6906_v40  ;;  %v7817_v37 = vld [vmem:[%s8692_s16 + $0x7d4] sm:$0xf]  ;;  %v5502_v40 = vor.u32 %v7625_v22, %v5499_v24 }
 0x249   : > { %v7845_v45 = vld [vmem:[%s8692_s16 + $0x8ac] sm:$0xf0]  ;;  %v6267_v53 = vld [vmem:[%s8692_s16 + $0x7f0] sm:$0xf0] }
 0x24a   : > { %v6617_v46 = vld [vmem:[%s8692_s16 + $0xa90] sm:$0xf]  ;;  %v6362_v57 = vor.u32 %v7845_v45, %v6361_v43  ;;  %4003 = vmatpush.bf16.msrb.mxu3 %v7162_v48  ;;  %v5758_v43 = vor.u32 %v7689_v25, %v5755_v29  ;;  %v6014_v45 = vor.u32 %v7753_v30, %v6011_v31  ;;  %v7681_v48 = vld [vmem:[%s8692_s16 + $0x394] sm:$0xf] }
 0x24b   : > { %v7909_v49 = vld [vmem:[%s8692_s16 + $0xaac] sm:$0xf0]  ;;  %v5371_v22 = vld [vmem:[%s8692_s16 + $0xf0] sm:$0xf0] }
 0x24c   : > { %v6873_v50 = vld [vmem:[%s8692_s16 + $0xc90] sm:$0xf]  ;;  %v6618_v60 = vor.u32 %v7909_v49, %v6617_v46  ;;  %3965 = vmatpush.bf16.msrb.mxu0 %v6362_v57  ;;  %v7617_v46 = vld [vmem:[%s8692_s16 + $0x194] sm:$0xf]  ;;  %v6270_v49 = vor.u32 %v7817_v37, %v6267_v53 }
 0x24d   : > { %v7973_v51 = vld [vmem:[%s8692_s16 + $0xcac] sm:$0xf0]  ;;  %v7657_v24 = vld [vmem:[%s8692_s16 + $0x2d4] sm:$0xf] }
 0x24e   : > { %v7129_v55 = vld [vmem:[%s8692_s16 + $0xe90] sm:$0xf]  ;;  %v6874_v61 = vor.u32 %v7973_v51, %v6873_v50  ;;  %3978 = vmatpush.bf16.msrb.mxu1 %v6618_v60  ;;  %v5723_v50 = vld [vmem:[%s8692_s16 + $0x3b0] sm:$0xf0] }
 0x24f   : > { %v8037_v56 = vld [vmem:[%s8692_s16 + $0xeac] sm:$0xf0]  ;;  %v7745_v51 = vld [vmem:[%s8692_s16 + $0x594] sm:$0xf]  ;;  %v5726_v57 = vor.u32 %v7681_v48, %v5723_v50  ;;  %v3787_v48 = vpop.f32.mrf.mxu2 }
 0x250   : > { %v6329_v62 = vld [vmem:[%s8692_s16 + $0x850] sm:$0xf]  ;;  %v7130_v1 = vor.u32 %v8037_v56, %v7129_v55  ;;  %3991 = vmatpush.bf16.msrb.mxu2 %v6874_v61  ;;  %v6235_v55 = vld [vmem:[%s8692_s16 + $0x7b0] sm:$0xf0]  ;;  %v5470_v56 = vor.u32 %v7617_v46, %v5467_v47  ;;  %v5982_v59 = vor.u32 %v7745_v51, %v5979_v52 }
 0x251   : > { %v7837_v23 = vld [vmem:[%s8692_s16 + $0x86c] sm:$0xf0]  ;;  %v7609_v60 = vld [vmem:[%s8692_s16 + $0x154] sm:$0xf] }
 0x252   : > { %v6585_v63 = vld [vmem:[%s8692_s16 + $0xa50] sm:$0xf]  ;;  %v6330_v7 = vor.u32 %v7837_v23, %v6329_v62  ;;  %4004 = vmatpush.bf16.msrb.mxu3 %v7130_v1  ;;  %v5435_v61 = vld [vmem:[%s8692_s16 + $0x170] sm:$0xf0]  ;;  %v6238_v23 = vor.u32 %v7809_v54, %v6235_v55  ;;  %v3800_v54 = vpop.f32.mrf.mxu3  ;;  %v9479_v55 = vld [vmem:[%s8698_s8] sm:$0xff] }
 0x253   : > { %v7901_v3 = vld [vmem:[%s8692_s16 + $0xa6c] sm:$0xf0]  ;;  %v7673_v62 = vld [vmem:[%s8692_s16 + $0x354] sm:$0xf] }
 0x254   : > { %v6841_v4 = vld [vmem:[%s8692_s16 + $0xc50] sm:$0xf]  ;;  %v6586_v11 = vor.u32 %v7901_v3, %v6585_v63  ;;  %3966 = vmatpush.bf16.msrb.mxu0 %v6330_v7  ;;  %v5691_v63 = vld [vmem:[%s8692_s16 + $0x370] sm:$0xf0] }
 0x255   : > { %v7965_v36 = vld [vmem:[%s8692_s16 + $0xc6c] sm:$0xf0]  ;;  %v5947_v1 = vld [vmem:[%s8692_s16 + $0x570] sm:$0xf0] }
 0x256   : > { %v7097_v5 = vld [vmem:[%s8692_s16 + $0xe50] sm:$0xf]  ;;  %v6842_v12 = vor.u32 %v7965_v36, %v6841_v4  ;;  %3979 = vmatpush.bf16.msrb.mxu1 %v6586_v11  ;;  %v7801_v3 = vld [vmem:[%s8692_s16 + $0x754] sm:$0xf]  ;;  %v5438_v36 = vor.u32 %v7609_v60, %v5435_v61 }
 0x257   : > { %v8029_v6 = vld [vmem:[%s8692_s16 + $0xe6c] sm:$0xf0]  ;;  %v6203_v4 = vld [vmem:[%s8692_s16 + $0x770] sm:$0xf0] }
 0x258   : > { %v6297_v9 = vld [vmem:[%s8692_s16 + $0x810] sm:$0xf]  ;;  %v7098_v17 = vor.u32 %v8029_v6, %v7097_v5  ;;  %3992 = vmatpush.bf16.msrb.mxu2 %v6842_v12  ;;  %v5694_v5 = vor.u32 %v7673_v62, %v5691_v63  ;;  %v5950_v6 = vor.u32 %v7737_v0, %v5947_v1  ;;  %v7601_v7 = vld [vmem:[%s8692_s16 + $0x114] sm:$0xf]  ;;  %v6206_v11 = vor.u32 %v7801_v3, %v6203_v4 }
 0x259   : > { %v7829_v10 = vld [vmem:[%s8692_s16 + $0x82c] sm:$0xf0]  ;;  %v5659_v12 = vld [vmem:[%s8692_s16 + $0x330] sm:$0xf0] }
 0x25a   : > { %v6553_v13 = vld [vmem:[%s8692_s16 + $0xa10] sm:$0xf]  ;;  %v6298_v26 = vor.u32 %v7829_v10, %v6297_v9  ;;  %4005 = vmatpush.bf16.msrb.mxu3 %v7098_v17  ;;  %v5403_v9 = vld [vmem:[%s8692_s16 + $0x130] sm:$0xf0] }
 0x25b   : > { %v7893_v14 = vld [vmem:[%s8692_s16 + $0xa2c] sm:$0xf0]  ;;  %v7665_v10 = vld [vmem:[%s8692_s16 + $0x314] sm:$0xf]  ;;  %v5406_v17 = vor.u32 %v7601_v7, %v5403_v9 }
 0x25c   : > { %v6809_v15 = vld [vmem:[%s8692_s16 + $0xc10] sm:$0xf]  ;;  %v6554_v32 = vor.u32 %v7893_v14, %v6553_v13  ;;  %3967 = vmatpush.bf16.msrb.mxu0 %v6298_v26  ;;  %v7729_v13 = vld [vmem:[%s8692_s16 + $0x514] sm:$0xf]  ;;  %v3774_v26 = vpop.f32.mrf.mxu1 }
 0x25d   : > { %v7957_v18 = vld [vmem:[%s8692_s16 + $0xc2c] sm:$0xf0]  ;;  %v5915_v14 = vld [vmem:[%s8692_s16 + $0x530] sm:$0xf0] }
 0x25e   : > { %v7065_v19 = vld [vmem:[%s8692_s16 + $0xe10] sm:$0xf]  ;;  %v6810_v35 = vor.u32 %v7957_v18, %v6809_v15  ;;  %3980 = vmatpush.bf16.msrb.mxu1 %v6554_v32  ;;  %v7793_v15 = vld [vmem:[%s8692_s16 + $0x714] sm:$0xf]  ;;  %v3761_v18 = vpop.f32.mrf.mxu0 }
 0x25f   : > { %v8021_v20 = vld [vmem:[%s8692_s16 + $0xe2c] sm:$0xf0]  ;;  %3968 = vmatmul.bf16.vlgmr.msrb.gmra.mxu0 %v8874_v41  ;;  %v3762_v25 = vadd.f32 %v3761_v18, %v9409_v58  ;;  %v6174_v29 = vor.u32 %v7793_v15, %v6171_v16  ;;  %v5627_v30 = vld [vmem:[%s8692_s16 + $0x2f0] sm:$0xf0] }
 0x260   : > { %v7066_v39 = vor.u32 %v8021_v20, %v7065_v19  ;;  %3993 = vmatpush.bf16.msrb.mxu2 %v6810_v35  ;;  %4012 = vmatpush.bf16.msra.mxu0 %v5502_v40  ;;  %v5662_v19 = vor.u32 %v7665_v10, %v5659_v12  ;;  %v5918_v20 = vor.u32 %v7729_v13, %v5915_v14  ;;  %v7721_v31 = vld [vmem:[%s8692_s16 + $0x4d4] sm:$0xf] }
 0x261   : > { %3981 = vmatmul.bf16.vlgmr.msrb.gmra.mxu1 %v8878_v44  ;;  %v5883_v32 = vld [vmem:[%s8692_s16 + $0x4f0] sm:$0xf0]  ;;  %v3775_v53 = vadd.f32 %v3774_v26, %v3762_v25  ;;  %v5630_v58 = vor.u32 %v7657_v24, %v5627_v30  ;;  %v3789_v24 = vpop.f32.mrf.mxu2 }
 0x262   : > { %4006 = vmatpush.bf16.msrb.mxu3 %v7066_v39  ;;  %4025 = vmatpush.bf16.msra.mxu1 %v5758_v43  ;;  %v7785_v35 = vld [vmem:[%s8692_s16 + $0x6d4] sm:$0xf]  ;;  %v5374_v39 = vor.u32 %v7593_v21, %v5371_v22  ;;  %v5886_v43 = vor.u32 %v7721_v31, %v5883_v32  ;;  %v3802_v31 = vpop.f32.mrf.mxu3 }
 0x263   : > { %3994 = vmatmul.bf16.vlgmr.msrb.gmra.mxu2 %v8870_v38  ;;  %v6139_v37 = vld [vmem:[%s8692_s16 + $0x6f0] sm:$0xf0]  ;;  %v3788_v52 = vadd.f32 %v3787_v48, %v3775_v53 }
 0x264   : > { %4038 = vmatpush.bf16.msra.mxu2 %v6014_v45  ;;  %4013 = vmatpush.bf16.msra.mxu0 %v5470_v56  ;;  %v7585_v40 = vld [vmem:[%s8692_s16 + $0x94] sm:$0xf]  ;;  %v4328_v56 = vperm.slane %v9479_v55, 2 }
 0x265   : > { %4007 = vmatmul.bf16.vlgmr.msrb.gmra.mxu3 %v8876_v42  ;;  %v5339_v45 = vld [vmem:[%s8692_s16 + $0xb0] sm:$0xf0]  ;;  %v3801_v61 = vadd.f32 %v3800_v54, %v3788_v52 }
 0x266   : > { %4051 = vmatpush.bf16.msra.mxu3 %v6270_v49  ;;  %4026 = vmatpush.bf16.msra.mxu1 %v5726_v57  ;;  %v7649_v46 = vld [vmem:[%s8692_s16 + $0x294] sm:$0xf]  ;;  %v6142_v49 = vor.u32 %v7785_v35, %v6139_v37  ;;  %v5342_v60 = vor.u32 %v7585_v40, %v5339_v45  ;;  %v3763_v63 = vpop.f32.mrf.mxu0 }
 0x267   : > { %v5595_v47 = vld [vmem:[%s8692_s16 + $0x2b0] sm:$0xf0]  ;;  %v4344_v7 = vmul.f32 %v4328_v56, %v3801_v61 }
 0x268   : > { %4039 = vmatpush.bf16.msra.mxu2 %v5982_v59  ;;  %4014 = vmatpush.bf16.msra.mxu0 %v5438_v36  ;;  %v7713_v50 = vld [vmem:[%s8692_s16 + $0x494] sm:$0xf]  ;;  %v5598_v0 = vor.u32 %v7649_v46, %v5595_v47 }
 0x269   : > { %v5851_v51 = vld [vmem:[%s8692_s16 + $0x4b0] sm:$0xf0] }
 0x26a   : > { %4052 = vmatpush.bf16.msra.mxu3 %v6238_v23  ;;  %4027 = vmatpush.bf16.msra.mxu1 %v5694_v5  ;;  %v7777_v57 = vld [vmem:[%s8692_s16 + $0x694] sm:$0xf]  ;;  %v5854_v1 = vor.u32 %v7713_v50, %v5851_v51  ;;  %v3776_v5 = vpop.f32.mrf.mxu1 }
 0x26b   : > { %v6107_v59 = vld [vmem:[%s8692_s16 + $0x6b0] sm:$0xf0] }
 0x26c   : > { %4040 = vmatpush.bf16.msra.mxu2 %v5950_v6  ;;  %4015 = vmatpush.bf16.msra.mxu0 %v5406_v17  ;;  %v9485_v62 = vld [vmem:[%s8700_s12] sm:$0xff]  ;;  %v6110_v6 = vor.u32 %v7777_v57, %v6107_v59 }
 0x26d   : > { %v4354_v23 = vperm.slane %v9485_v62, 2  ;;  %v7577_v3 = vld [vmem:[%s8692_s16 + $0x54] sm:$0xf] }
 0x26e   : > { %4053 = vmatpush.bf16.msra.mxu3 %v6206_v11  ;;  %4028 = vmatpush.bf16.msra.mxu1 %v5662_v19  ;;  %v5307_v4 = vld [vmem:[%s8692_s16 + $0x70] sm:$0xf0] }
 0x26f   : > { %v7641_v36 = vld [vmem:[%s8692_s16 + $0x254] sm:$0xf]  ;;  %v9496_v14 = vadd.f32 %v4354_v23, %v4344_v7  ;;  %v5310_v15 = vor.u32 %v7577_v3, %v5307_v4 }
 0x270   : > { %4041 = vmatpush.bf16.msra.mxu2 %v5918_v20  ;;  %4016 = vmatpush.bf16.msra.mxu0 %v5374_v39  ;;  %v5563_v9 = vld [vmem:[%s8692_s16 + $0x270] sm:$0xf0] }
 0x271   : > { %v7705_v10 = vld [vmem:[%s8692_s16 + $0x454] sm:$0xf]  ;;  %v5566_v18 = vor.u32 %v7641_v36, %v5563_v9 }
 0x272   : > { %4054 = vmatpush.bf16.msra.mxu3 %v6174_v29  ;;  %4029 = vmatpush.bf16.msra.mxu1 %v5630_v58  ;;  %v5819_v11 = vld [vmem:[%s8692_s16 + $0x470] sm:$0xf0] }
 0x273   : > { %v7769_v12 = vld [vmem:[%s8692_s16 + $0x654] sm:$0xf]  ;;  %v5822_v19 = vor.u32 %v7705_v10, %v5819_v11 }
 0x274   : > { %4042 = vmatpush.bf16.msra.mxu2 %v5886_v43  ;;  %v6075_v13 = vld [vmem:[%s8692_s16 + $0x670] sm:$0xf0]  ;;  %4017 = vmatpush.bf16.msra.mxu0 %v5342_v60 }
 0x275   : > { %v7569_v16 = vld [vmem:[%s8692_s16 + $0x14] sm:$0xf]  ;;  %v6078_v25 = vor.u32 %v7769_v12, %v6075_v13 }
 0x276   : > { %4055 = vmatpush.bf16.msra.mxu3 %v6142_v49  ;;  %v5275_v17 = vld [vmem:[%s8692_s16 + $0x30] sm:$0xf0]  ;;  %4030 = vmatpush.bf16.msra.mxu1 %v5598_v0 }
 0x277   : > { %v7633_v20 = vld [vmem:[%s8692_s16 + $0x214] sm:$0xf]  ;;  %v5278_v53 = vor.u32 %v7569_v16, %v5275_v17 }
 0x278   : > { %4043 = vmatpush.bf16.msra.mxu2 %v5854_v1  ;;  %v5531_v21 = vld [vmem:[%s8692_s16 + $0x230] sm:$0xf0]  ;;  %4018 = vmatpush.bf16.msra.mxu0 %v5310_v15 }
 0x279   : > { %v7697_v22 = vld [vmem:[%s8692_s16 + $0x414] sm:$0xf]  ;;  %v5534_v43 = vor.u32 %v7633_v20, %v5531_v21 }
 0x27a   : > { %4056 = vmatpush.bf16.msra.mxu3 %v6110_v6  ;;  %v5787_v26 = vld [vmem:[%s8692_s16 + $0x430] sm:$0xf0]  ;;  %4031 = vmatpush.bf16.msra.mxu1 %v5566_v18 }
 0x27b   : > { %v7761_v29 = vld [vmem:[%s8692_s16 + $0x614] sm:$0xf]  ;;  %v5790_v45 = vor.u32 %v7697_v22, %v5787_v26 }
 0x27c   : > { %v6043_v30 = vld [vmem:[%s8692_s16 + $0x630] sm:$0xf0]  ;;  %4044 = vmatpush.bf16.msra.mxu2 %v5822_v19  ;;  %4019 = vmatpush.bf16.msra.mxu0 %v5278_v53 }
 0x27d   : > { %v7881_v32 = vld [vmem:[%s8692_s16 + $0x9d4] sm:$0xf]  ;;  %v6046_v48 = vor.u32 %v7761_v29, %v6043_v30  ;;  %v3813_v30 = vpop.f32.mrf.mxu0 }
 0x27e   : > { %v6523_v35 = vld [vmem:[%s8692_s16 + $0x9f0] sm:$0xf0]  ;;  %4057 = vmatpush.bf16.msra.mxu3 %v6078_v25  ;;  %4032 = vmatpush.bf16.msra.mxu1 %v5534_v43 }
 0x27f   : > { %v7945_v37 = vld [vmem:[%s8692_s16 + $0xbd4] sm:$0xf]  ;;  %v6526_v49 = vor.u32 %v7881_v32, %v6523_v35  ;;  %4020 = vmatmul.bf16.vlgmr.msra.gmra.mxu0 %v8820_v28 }
 0x280   : > { %v6779_v39 = vld [vmem:[%s8692_s16 + $0xbf0] sm:$0xf0]  ;;  %4045 = vmatpush.bf16.msra.mxu2 %v5790_v45 }
 0x281   : > { %v8009_v40 = vld [vmem:[%s8692_s16 + $0xdd4] sm:$0xf]  ;;  %v6782_v50 = vor.u32 %v7945_v37, %v6779_v39  ;;  %4064 = vmatpush.bf16.msrb.mxu0 %v6526_v49  ;;  %4033 = vmatmul.bf16.vlgmr.msra.gmra.mxu1 %v8826_v34  ;;  %v3826_v39 = vpop.f32.mrf.mxu1 }
 0x282   : > { %v7035_v58 = vld [vmem:[%s8692_s16 + $0xdf0] sm:$0xf0]  ;;  %4058 = vmatpush.bf16.msra.mxu3 %v6046_v48 }
 0x283   : > { %v8073_v46 = vld [vmem:[%s8692_s16 + $0xfd4] sm:$0xf]  ;;  %v7038_v51 = vor.u32 %v8009_v40, %v7035_v58  ;;  %4077 = vmatpush.bf16.msrb.mxu1 %v6782_v50  ;;  %4046 = vmatmul.bf16.vlgmr.msra.gmra.mxu2 %v8818_v27 }
 0x284   : > { %v7291_v47 = vld [vmem:[%s8692_s16 + $0xff0] sm:$0xf0] }
 0x285   : > { %v7873_v52 = vld [vmem:[%s8692_s16 + $0x994] sm:$0xf]  ;;  %v7294_v57 = vor.u32 %v8073_v46, %v7291_v47  ;;  %4090 = vmatpush.bf16.msrb.mxu2 %v7038_v51  ;;  %4059 = vmatmul.bf16.vlgmr.msra.gmra.mxu3 %v8824_v33  ;;  %v3827_v46 = vadd.f32 %v3826_v39, %v3813_v30 }
 0x286   : > { %v6491_v54 = vld [vmem:[%s8692_s16 + $0x9b0] sm:$0xf0] }
 0x287   : > { %v7937_v56 = vld [vmem:[%s8692_s16 + $0xb94] sm:$0xf]  ;;  %v6494_v0 = vor.u32 %v7873_v52, %v6491_v54  ;;  %4103 = vmatpush.bf16.msrb.mxu3 %v7294_v57  ;;  %v3839_v57 = vpop.f32.mrf.mxu2 }
 0x288   : > { %v6747_v59 = vld [vmem:[%s8692_s16 + $0xbb0] sm:$0xf0] }
 0x289   : > { %v8001_v60 = vld [vmem:[%s8692_s16 + $0xd94] sm:$0xf]  ;;  %v6750_v1 = vor.u32 %v7937_v56, %v6747_v59  ;;  %4065 = vmatpush.bf16.msrb.mxu0 %v6494_v0  ;;  %v3852_v0 = vpop.f32.mrf.mxu3 }
 0x28a   : > { %v7003_v61 = vld [vmem:[%s8692_s16 + $0xdb0] sm:$0xf0] }
 0x28b   : > { %v8065_v23 = vld [vmem:[%s8692_s16 + $0xf94] sm:$0xf]  ;;  %v7006_v3 = vor.u32 %v8001_v60, %v7003_v61  ;;  %4078 = vmatpush.bf16.msrb.mxu1 %v6750_v1 }
 0x28c   : > { %v7259_v63 = vld [vmem:[%s8692_s16 + $0xfb0] sm:$0xf0] }
 0x28d   : > { %v7865_v4 = vld [vmem:[%s8692_s16 + $0x954] sm:$0xf]  ;;  %v7262_v6 = vor.u32 %v8065_v23, %v7259_v63  ;;  %4091 = vmatpush.bf16.msrb.mxu2 %v7006_v3  ;;  %v3840_v63 = vadd.f32 %v3839_v57, %v3827_v46  ;;  %v7694_v46 = vld [vmem:[%s8692_s16 + $0x3f4] sm:$0xf0] }
 0x28e   : > { %v6459_v36 = vld [vmem:[%s8692_s16 + $0x970] sm:$0xf0] }
 0x28f   : > { %v7929_v5 = vld [vmem:[%s8692_s16 + $0xb54] sm:$0xf]  ;;  %v6462_v13 = vor.u32 %v7865_v4, %v6459_v36  ;;  %4104 = vmatpush.bf16.msrb.mxu3 %v7262_v6  ;;  %v9558_v36 = vadd.f32 %v3852_v0, %v3840_v63  ;;  %v7686_v0 = vld [vmem:[%s8692_s16 + $0x3b4] sm:$0xf0] }
 0x290   : > { %v6715_v7 = vld [vmem:[%s8692_s16 + $0xb70] sm:$0xf0] }
 0x291   : > { %v7993_v9 = vld [vmem:[%s8692_s16 + $0xd54] sm:$0xf]  ;;  %v6718_v15 = vor.u32 %v7929_v5, %v6715_v7  ;;  %4066 = vmatpush.bf16.msrb.mxu0 %v6462_v13  ;;  %v3815_v5 = vpop.f32.mrf.mxu0  ;;  %v3854_v39 = vpop.f32.mrf.mxu3 }
 0x292   : > { %v6971_v10 = vld [vmem:[%s8692_s16 + $0xd70] sm:$0xf0]  ;;  %v7814_v5 = vld [vmem:[%s8692_s16 + $0x7b4] sm:$0xf0] }
 0x293   : > { %v8057_v11 = vld [vmem:[%s8692_s16 + $0xf54] sm:$0xf]  ;;  %v6974_v16 = vor.u32 %v7993_v9, %v6971_v10  ;;  %4079 = vmatpush.bf16.msrb.mxu1 %v6718_v15 }
 0x294   : > { %v7227_v12 = vld [vmem:[%s8692_s16 + $0xf70] sm:$0xf0] }
 0x295   : > { %v7857_v17 = vld [vmem:[%s8692_s16 + $0x914] sm:$0xf]  ;;  %v7230_v20 = vor.u32 %v8057_v11, %v7227_v12  ;;  %4092 = vmatpush.bf16.msrb.mxu2 %v6974_v16  ;;  %v3828_v12 = vpop.f32.mrf.mxu1 }
 0x296   : > { %v6427_v18 = vld [vmem:[%s8692_s16 + $0x930] sm:$0xf0]  ;;  %v5697_v12 = vld [vmem:[%s8692_s16 + $0x358] sm:$0xf] }
 0x297   : > { %v7921_v19 = vld [vmem:[%s8692_s16 + $0xb14] sm:$0xf]  ;;  %v6430_v29 = vor.u32 %v7857_v17, %v6427_v18  ;;  %4105 = vmatpush.bf16.msrb.mxu3 %v7230_v20 }
 0x298   : > { %v6683_v21 = vld [vmem:[%s8692_s16 + $0xb30] sm:$0xf0] }
 0x299   : > { %v7985_v22 = vld [vmem:[%s8692_s16 + $0xd14] sm:$0xf]  ;;  %v6686_v31 = vor.u32 %v7921_v19, %v6683_v21  ;;  %4067 = vmatpush.bf16.msrb.mxu0 %v6430_v29  ;;  %v3865_v39 = vpop.f32.mrf.mxu0 }
 0x29a   : > { %v6939_v24 = vld [vmem:[%s8692_s16 + $0xd30] sm:$0xf0] }
 0x29b   : > { %v8049_v25 = vld [vmem:[%s8692_s16 + $0xf14] sm:$0xf]  ;;  %v6942_v32 = vor.u32 %v7985_v22, %v6939_v24  ;;  %4080 = vmatpush.bf16.msrb.mxu1 %v6686_v31  ;;  %v3841_v31 = vpop.f32.mrf.mxu2 }
 0x29c   : > { %v7195_v26 = vld [vmem:[%s8692_s16 + $0xf30] sm:$0xf0]  ;;  %v5921_v31 = vld [vmem:[%s8692_s16 + $0x518] sm:$0xf] }
 0x29d   : > { %v7849_v35 = vld [vmem:[%s8692_s16 + $0x8d4] sm:$0xf]  ;;  %v7198_v40 = vor.u32 %v8049_v25, %v7195_v26  ;;  %4093 = vmatpush.bf16.msrb.mxu2 %v6942_v32 }
 0x29e   : > { %v6395_v37 = vld [vmem:[%s8692_s16 + $0x8f0] sm:$0xf0] }
 0x29f   : > { %v7913_v53 = vld [vmem:[%s8692_s16 + $0xad4] sm:$0xf]  ;;  %v6398_v49 = vor.u32 %v7849_v35, %v6395_v37  ;;  %4106 = vmatpush.bf16.msrb.mxu3 %v7198_v40  ;;  %v5505_v40 = vld [vmem:[%s8692_s16 + $0x1d8] sm:$0xf] }
 0x2a0   : > { %v6651_v58 = vld [vmem:[%s8692_s16 + $0xaf0] sm:$0xf0] }
 0x2a1   : > { %v7977_v43 = vld [vmem:[%s8692_s16 + $0xcd4] sm:$0xf]  ;;  %v6654_v50 = vor.u32 %v7913_v53, %v6651_v58  ;;  %4068 = vmatpush.bf16.msrb.mxu0 %v6398_v49  ;;  %v7630_v58 = vld [vmem:[%s8692_s16 + $0x1f4] sm:$0xf0] }
 0x2a2   : > { %v6907_v45 = vld [vmem:[%s8692_s16 + $0xcf0] sm:$0xf0] }
 0x2a3   : > { %v8041_v47 = vld [vmem:[%s8692_s16 + $0xed4] sm:$0xf]  ;;  %v6910_v51 = vor.u32 %v7977_v43, %v6907_v45  ;;  %4081 = vmatpush.bf16.msrb.mxu1 %v6654_v50  ;;  %v5761_v43 = vld [vmem:[%s8692_s16 + $0x3d8] sm:$0xf] }
 0x2a4   : > { %v7163_v48 = vld [vmem:[%s8692_s16 + $0xef0] sm:$0xf0]  ;;  %v5762_v57 = vor.u32 %v7694_v46, %v5761_v43  ;;  %v5377_v43 = vld [vmem:[%s8692_s16 + $0xd8] sm:$0xf] }
 0x2a5   : > { %v7841_v52 = vld [vmem:[%s8692_s16 + $0x894] sm:$0xf]  ;;  %v7166_v59 = vor.u32 %v8041_v47, %v7163_v48  ;;  %4094 = vmatpush.bf16.msrb.mxu2 %v6910_v51  ;;  %v6017_v47 = vld [vmem:[%s8692_s16 + $0x5d8] sm:$0xf] }
 0x2a6   : > { %v6363_v54 = vld [vmem:[%s8692_s16 + $0x8b0] sm:$0xf0]  ;;  %v7758_v48 = vld [vmem:[%s8692_s16 + $0x5f4] sm:$0xf0] }
 0x2a7   : > { %v7905_v56 = vld [vmem:[%s8692_s16 + $0xa94] sm:$0xf]  ;;  %v6366_v4 = vor.u32 %v7841_v52, %v6363_v54  ;;  %4107 = vmatpush.bf16.msrb.mxu3 %v7166_v59  ;;  %v6273_v51 = vld [vmem:[%s8692_s16 + $0x7d8] sm:$0xf]  ;;  %v6018_v59 = vor.u32 %v7758_v48, %v6017_v47  ;;  %v3866_v47 = vadd.f32 %v3865_v39, %v9558_v36  ;;  %v3878_v48 = vpop.f32.mrf.mxu1 }
 0x2a8   : > { %v6619_v60 = vld [vmem:[%s8692_s16 + $0xab0] sm:$0xf0]  ;;  %v7822_v52 = vld [vmem:[%s8692_s16 + $0x7f4] sm:$0xf0] }
 0x2a9   : > { %v7969_v61 = vld [vmem:[%s8692_s16 + $0xc94] sm:$0xf]  ;;  %v6622_v6 = vor.u32 %v7905_v56, %v6619_v60  ;;  %4069 = vmatpush.bf16.msrb.mxu0 %v6366_v4  ;;  %v5506_v56 = vor.u32 %v7630_v58, %v5505_v40  ;;  %v5473_v60 = vld [vmem:[%s8692_s16 + $0x198] sm:$0xf]  ;;  %v6274_v63 = vor.u32 %v7822_v52, %v6273_v51 }
 0x2aa   : > { %v6875_v23 = vld [vmem:[%s8692_s16 + $0xcb0] sm:$0xf0]  ;;  %v6241_v4 = vld [vmem:[%s8692_s16 + $0x798] sm:$0xf] }
 0x2ab   : > { %v8033_v1 = vld [vmem:[%s8692_s16 + $0xe94] sm:$0xf]  ;;  %v6878_v7 = vor.u32 %v7969_v61, %v6875_v23  ;;  %4082 = vmatpush.bf16.msrb.mxu1 %v6622_v6  ;;  %v7622_v61 = vld [vmem:[%s8692_s16 + $0x1b4] sm:$0xf0] }
 0x2ac   : > { %v7131_v3 = vld [vmem:[%s8692_s16 + $0xeb0] sm:$0xf0]  ;;  %v5729_v23 = vld [vmem:[%s8692_s16 + $0x398] sm:$0xf]  ;;  %v5474_v6 = vor.u32 %v7622_v61, %v5473_v60 }
 0x2ad   : > { %v7833_v9 = vld [vmem:[%s8692_s16 + $0x854] sm:$0xf]  ;;  %v7134_v13 = vor.u32 %v8033_v1, %v7131_v3  ;;  %4095 = vmatpush.bf16.msrb.mxu2 %v6878_v7  ;;  %v5985_v1 = vld [vmem:[%s8692_s16 + $0x598] sm:$0xf]  ;;  %v5730_v7 = vor.u32 %v7686_v0, %v5729_v23 }
 0x2ae   : > { %v6331_v10 = vld [vmem:[%s8692_s16 + $0x870] sm:$0xf0]  ;;  %v7750_v3 = vld [vmem:[%s8692_s16 + $0x5b4] sm:$0xf0] }
 0x2af   : > { %v7897_v11 = vld [vmem:[%s8692_s16 + $0xa54] sm:$0xf]  ;;  %v6334_v20 = vor.u32 %v7833_v9, %v6331_v10  ;;  %4108 = vmatpush.bf16.msrb.mxu3 %v7134_v13  ;;  %v5986_v9 = vor.u32 %v7750_v3, %v5985_v1  ;;  %v5441_v10 = vld [vmem:[%s8692_s16 + $0x158] sm:$0xf]  ;;  %v6242_v13 = vor.u32 %v7814_v5, %v6241_v4  ;;  %v3891_v1 = vpop.f32.mrf.mxu2 }
 0x2b0   : > { %v6587_v15 = vld [vmem:[%s8692_s16 + $0xa70] sm:$0xf0]  ;;  %v5633_v46 = vld [vmem:[%s8692_s16 + $0x2d8] sm:$0xf] }
 0x2b1   : > { %v7961_v16 = vld [vmem:[%s8692_s16 + $0xc54] sm:$0xf]  ;;  %v6590_v24 = vor.u32 %v7897_v11, %v6587_v15  ;;  %4070 = vmatpush.bf16.msrb.mxu0 %v6334_v20  ;;  %v7614_v11 = vld [vmem:[%s8692_s16 + $0x174] sm:$0xf0] }
 0x2b2   : > { %v6843_v17 = vld [vmem:[%s8692_s16 + $0xc70] sm:$0xf0]  ;;  %v7678_v15 = vld [vmem:[%s8692_s16 + $0x374] sm:$0xf0]  ;;  %v5442_v20 = vor.u32 %v7614_v11, %v5441_v10 }
 0x2b3   : > { %v8025_v18 = vld [vmem:[%s8692_s16 + $0xe54] sm:$0xf]  ;;  %v6846_v25 = vor.u32 %v7961_v16, %v6843_v17  ;;  %4083 = vmatpush.bf16.msrb.mxu1 %v6590_v24  ;;  %v5953_v16 = vld [vmem:[%s8692_s16 + $0x558] sm:$0xf] }
 0x2b4   : > { %v7099_v19 = vld [vmem:[%s8692_s16 + $0xe70] sm:$0xf0]  ;;  %v7742_v17 = vld [vmem:[%s8692_s16 + $0x574] sm:$0xf0] }
 0x2b5   : > { %v7825_v21 = vld [vmem:[%s8692_s16 + $0x814] sm:$0xf]  ;;  %v7102_v32 = vor.u32 %v8025_v18, %v7099_v19  ;;  %4096 = vmatpush.bf16.msrb.mxu2 %v6846_v25  ;;  %v6209_v18 = vld [vmem:[%s8692_s16 + $0x758] sm:$0xf] }
 0x2b6   : > { %v6299_v22 = vld [vmem:[%s8692_s16 + $0x830] sm:$0xf0]  ;;  %v7806_v19 = vld [vmem:[%s8692_s16 + $0x774] sm:$0xf0] }
 0x2b7   : > { %v7889_v26 = vld [vmem:[%s8692_s16 + $0xa14] sm:$0xf]  ;;  %v6302_v45 = vor.u32 %v7825_v21, %v6299_v22  ;;  %4109 = vmatpush.bf16.msrb.mxu3 %v7102_v32  ;;  %v5698_v21 = vor.u32 %v7678_v15, %v5697_v12  ;;  %v5954_v22 = vor.u32 %v7742_v17, %v5953_v16  ;;  %v5409_v24 = vld [vmem:[%s8692_s16 + $0x118] sm:$0xf]  ;;  %v4355_v15 = vperm.slane %v9485_v62, 3  ;;  %v3867_v16 = vpop.f32.mrf.mxu0 }
 0x2b8   : > { %v6555_v29 = vld [vmem:[%s8692_s16 + $0xa30] sm:$0xf0]  ;;  %v7606_v25 = vld [vmem:[%s8692_s16 + $0x134] sm:$0xf0] }
 0x2b9   : > { %v7953_v30 = vld [vmem:[%s8692_s16 + $0xc14] sm:$0xf]  ;;  %v6558_v49 = vor.u32 %v7889_v26, %v6555_v29  ;;  %4071 = vmatpush.bf16.msrb.mxu0 %v6302_v45  ;;  %v5665_v26 = vld [vmem:[%s8692_s16 + $0x318] sm:$0xf]  ;;  %v6210_v29 = vor.u32 %v7806_v19, %v6209_v18 }
 0x2ba   : > { %v6811_v35 = vld [vmem:[%s8692_s16 + $0xc30] sm:$0xf0]  ;;  %v7734_v32 = vld [vmem:[%s8692_s16 + $0x534] sm:$0xf0] }
 0x2bb   : > { %v8017_v37 = vld [vmem:[%s8692_s16 + $0xe14] sm:$0xf]  ;;  %v6814_v50 = vor.u32 %v7953_v30, %v6811_v35  ;;  %4084 = vmatpush.bf16.msrb.mxu1 %v6558_v49  ;;  %v7670_v30 = vld [vmem:[%s8692_s16 + $0x334] sm:$0xf0]  ;;  %v5922_v58 = vor.u32 %v7734_v32, %v5921_v31 }
 0x2bc   : > { %v7067_v53 = vld [vmem:[%s8692_s16 + $0xe30] sm:$0xf0]  ;;  %4072 = vmatmul.bf16.vlgmr.msrb.gmra.mxu0 %v8874_v41  ;;  %v6177_v35 = vld [vmem:[%s8692_s16 + $0x718] sm:$0xf]  ;;  %v5666_v40 = vor.u32 %v7670_v30, %v5665_v26 }
 0x2bd   : > { %v7070_v54 = vor.u32 %v8017_v37, %v7067_v53  ;;  %4097 = vmatpush.bf16.msrb.mxu2 %v6814_v50  ;;  %4116 = vmatpush.bf16.msra.mxu0 %v5506_v56  ;;  %v7798_v37 = vld [vmem:[%s8692_s16 + $0x734] sm:$0xf0]  ;;  %v5410_v53 = vor.u32 %v7606_v25, %v5409_v24 }
 0x2be   : > { %4085 = vmatmul.bf16.vlgmr.msrb.gmra.mxu1 %v8878_v44  ;;  %v7598_v45 = vld [vmem:[%s8692_s16 + $0xf4] sm:$0xf0]  ;;  %v6178_v49 = vor.u32 %v7798_v37, %v6177_v35 }
 0x2bf   : > { %4110 = vmatpush.bf16.msrb.mxu3 %v7070_v54  ;;  %4129 = vmatpush.bf16.msra.mxu1 %v5762_v57  ;;  %v7662_v50 = vld [vmem:[%s8692_s16 + $0x2f4] sm:$0xf0]  ;;  %v3879_v57 = vadd.f32 %v3878_v48, %v3866_v47 }
 0x2c0   : > { %4098 = vmatmul.bf16.vlgmr.msrb.gmra.mxu2 %v8870_v38  ;;  %v5889_v51 = vld [vmem:[%s8692_s16 + $0x4d8] sm:$0xf]  ;;  %v5634_v36 = vor.u32 %v7662_v50, %v5633_v46 }
 0x2c1   : > { %4142 = vmatpush.bf16.msra.mxu2 %v6018_v59  ;;  %4117 = vmatpush.bf16.msra.mxu0 %v5474_v6  ;;  %v7726_v52 = vld [vmem:[%s8692_s16 + $0x4f4] sm:$0xf0]  ;;  %v5378_v59 = vor.u32 %v7598_v45, %v5377_v43  ;;  %v3892_v6 = vadd.f32 %v3891_v1, %v3879_v57  ;;  %v3893_v45 = vpop.f32.mrf.mxu2 }
 0x2c2   : > { %4111 = vmatmul.bf16.vlgmr.msrb.gmra.mxu3 %v8876_v42  ;;  %v6145_v54 = vld [vmem:[%s8692_s16 + $0x6d8] sm:$0xf]  ;;  %v5890_v61 = vor.u32 %v7726_v52, %v5889_v51 }
 0x2c3   : > { %4155 = vmatpush.bf16.msra.mxu3 %v6274_v63  ;;  %4130 = vmatpush.bf16.msra.mxu1 %v5730_v7  ;;  %v7790_v56 = vld [vmem:[%s8692_s16 + $0x6f4] sm:$0xf0]  ;;  %v3904_v7 = vpop.f32.mrf.mxu3 }
 0x2c4   : > { %v5345_v60 = vld [vmem:[%s8692_s16 + $0x98] sm:$0xf]  ;;  %v6146_v3 = vor.u32 %v7790_v56, %v6145_v54 }
 0x2c5   : > { %4143 = vmatpush.bf16.msra.mxu2 %v5986_v9  ;;  %4118 = vmatpush.bf16.msra.mxu0 %v5442_v20  ;;  %v7590_v23 = vld [vmem:[%s8692_s16 + $0xb4] sm:$0xf0]  ;;  %v4329_v9 = vperm.slane %v9479_v55, 3 }
 0x2c6   : > { %v5601_v63 = vld [vmem:[%s8692_s16 + $0x298] sm:$0xf]  ;;  %v5346_v12 = vor.u32 %v7590_v23, %v5345_v60 }
 0x2c7   : > { %4156 = vmatpush.bf16.msra.mxu3 %v6242_v13  ;;  %4131 = vmatpush.bf16.msra.mxu1 %v5698_v21  ;;  %v7654_v0 = vld [vmem:[%s8692_s16 + $0x2b4] sm:$0xf0]  ;;  %v3905_v13 = vadd.f32 %v3904_v7, %v3892_v6  ;;  %v3880_v21 = vpop.f32.mrf.mxu1 }
 0x2c8   : > { %v5857_v4 = vld [vmem:[%s8692_s16 + $0x498] sm:$0xf]  ;;  %v5602_v17 = vor.u32 %v7654_v0, %v5601_v63 }
 0x2c9   : > { %4144 = vmatpush.bf16.msra.mxu2 %v5954_v22  ;;  %4119 = vmatpush.bf16.msra.mxu0 %v5410_v53  ;;  %v7718_v5 = vld [vmem:[%s8692_s16 + $0x4b4] sm:$0xf0]  ;;  %v4345_v24 = vmul.f32 %v4329_v9, %v3905_v13 }
 0x2ca   : > { %v6113_v10 = vld [vmem:[%s8692_s16 + $0x698] sm:$0xf]  ;;  %v5858_v18 = vor.u32 %v7718_v5, %v5857_v4 }
 0x2cb   : > { %4157 = vmatpush.bf16.msra.mxu3 %v6210_v29  ;;  %4132 = vmatpush.bf16.msra.mxu1 %v5666_v40  ;;  %v7782_v11 = vld [vmem:[%s8692_s16 + $0x6b4] sm:$0xf0]  ;;  %v9639_v31 = vadd.f32 %v4355_v15, %v4345_v24  ;;  %v3906_v50 = vpop.f32.mrf.mxu3 }
 0x2cc   : > { %v5313_v19 = vld [vmem:[%s8692_s16 + $0x58] sm:$0xf]  ;;  %v6114_v22 = vor.u32 %v7782_v11, %v6113_v10 }
 0x2cd   : > { %4145 = vmatpush.bf16.msra.mxu2 %v5922_v58  ;;  %4120 = vmatpush.bf16.msra.mxu0 %v5378_v59  ;;  %v7582_v55 = vld [vmem:[%s8692_s16 + $0x74] sm:$0xf0] }
 0x2ce   : > { %v5569_v20 = vld [vmem:[%s8692_s16 + $0x258] sm:$0xf]  ;;  %v5314_v32 = vor.u32 %v7582_v55, %v5313_v19 }
 0x2cf   : > { %4158 = vmatpush.bf16.msra.mxu3 %v6178_v49  ;;  %4133 = vmatpush.bf16.msra.mxu1 %v5634_v36  ;;  %v7646_v25 = vld [vmem:[%s8692_s16 + $0x274] sm:$0xf0] }
 0x2d0   : > { %v5825_v62 = vld [vmem:[%s8692_s16 + $0x458] sm:$0xf]  ;;  %v5570_v53 = vor.u32 %v7646_v25, %v5569_v20 }
 0x2d1   : > { %4146 = vmatpush.bf16.msra.mxu2 %v5890_v61  ;;  %v7710_v26 = vld [vmem:[%s8692_s16 + $0x474] sm:$0xf0]  ;;  %4121 = vmatpush.bf16.msra.mxu0 %v5346_v12 }
 0x2d2   : > { %v6081_v29 = vld [vmem:[%s8692_s16 + $0x658] sm:$0xf]  ;;  %v5826_v39 = vor.u32 %v7710_v26, %v5825_v62 }
 0x2d3   : > { %4159 = vmatpush.bf16.msra.mxu3 %v6146_v3  ;;  %v7774_v30 = vld [vmem:[%s8692_s16 + $0x674] sm:$0xf0]  ;;  %4134 = vmatpush.bf16.msra.mxu1 %v5602_v17 }
 0x2d4   : > { %v5281_v35 = vld [vmem:[%s8692_s16 + $0x18] sm:$0xf]  ;;  %v6082_v46 = vor.u32 %v7774_v30, %v6081_v29 }
 0x2d5   : > { %v7574_v37 = vld [vmem:[%s8692_s16 + $0x34] sm:$0xf0]  ;;  %4147 = vmatpush.bf16.msra.mxu2 %v5858_v18  ;;  %4122 = vmatpush.bf16.msra.mxu0 %v5314_v32 }
 0x2d6   : > { %v5537_v40 = vld [vmem:[%s8692_s16 + $0x218] sm:$0xf]  ;;  %v5282_v56 = vor.u32 %v7574_v37, %v5281_v35 }
 0x2d7   : > { %v7638_v58 = vld [vmem:[%s8692_s16 + $0x234] sm:$0xf0]  ;;  %4160 = vmatpush.bf16.msra.mxu3 %v6114_v22  ;;  %4135 = vmatpush.bf16.msra.mxu1 %v5570_v53 }
 0x2d8   : > { %v5793_v43 = vld [vmem:[%s8692_s16 + $0x418] sm:$0xf]  ;;  %v5538_v36 = vor.u32 %v7638_v58, %v5537_v40 }
 0x2d9   : > { %v7702_v47 = vld [vmem:[%s8692_s16 + $0x434] sm:$0xf0]  ;;  %4148 = vmatpush.bf16.msra.mxu2 %v5826_v39  ;;  %4123 = vmatpush.bf16.msra.mxu0 %v5282_v56  ;;  %v3930_v56 = vpop.f32.mrf.mxu1 }
 0x2da   : > { %v6049_v48 = vld [vmem:[%s8692_s16 + $0x618] sm:$0xf]  ;;  %v5794_v61 = vor.u32 %v7702_v47, %v5793_v43 }
 0x2db   : > { %v7766_v49 = vld [vmem:[%s8692_s16 + $0x634] sm:$0xf0]  ;;  %4161 = vmatpush.bf16.msra.mxu3 %v6082_v46  ;;  %4136 = vmatpush.bf16.msra.mxu1 %v5538_v36 }
 0x2dc   : > { %v6529_v51 = vld [vmem:[%s8692_s16 + $0x9d8] sm:$0xf]  ;;  %v6050_v0 = vor.u32 %v7766_v49, %v6049_v48  ;;  %4124 = vmatmul.bf16.vlgmr.msra.gmra.mxu0 %v8820_v28  ;;  %v3917_v48 = vpop.f32.mrf.mxu0 }
 0x2dd   : > { %v7886_v52 = vld [vmem:[%s8692_s16 + $0x9f4] sm:$0xf0]  ;;  %4149 = vmatpush.bf16.msra.mxu2 %v5794_v61  ;;  %v3931_v61 = vadd.f32 %v3930_v56, %v3917_v48  ;;  %v7626_v56 = vld [vmem:[%s8692_s16 + $0x1dc] sm:$0xf] }
 0x2de   : > { %v6785_v54 = vld [vmem:[%s8692_s16 + $0xbd8] sm:$0xf]  ;;  %v6530_v1 = vor.u32 %v7886_v52, %v6529_v51  ;;  %4137 = vmatmul.bf16.vlgmr.msra.gmra.mxu1 %v8826_v34 }
 0x2df   : > { %v7950_v57 = vld [vmem:[%s8692_s16 + $0xbf4] sm:$0xf0]  ;;  %4162 = vmatpush.bf16.msra.mxu3 %v6050_v0 }
 0x2e0   : > { %v7041_v59 = vld [vmem:[%s8692_s16 + $0xdd8] sm:$0xf]  ;;  %v6786_v3 = vor.u32 %v7950_v57, %v6785_v54  ;;  %4168 = vmatpush.bf16.msrb.mxu0 %v6530_v1  ;;  %4150 = vmatmul.bf16.vlgmr.msra.gmra.mxu2 %v8818_v27 }
 0x2e1   : > { %v8014_v60 = vld [vmem:[%s8692_s16 + $0xdf4] sm:$0xf0] }
 0x2e2   : > { %v7297_v23 = vld [vmem:[%s8692_s16 + $0xfd8] sm:$0xf]  ;;  %v7042_v4 = vor.u32 %v8014_v60, %v7041_v59  ;;  %4181 = vmatpush.bf16.msrb.mxu1 %v6786_v3  ;;  %4163 = vmatmul.bf16.vlgmr.msra.gmra.mxu3 %v8824_v33 }
 0x2e3   : > { %v8078_v63 = vld [vmem:[%s8692_s16 + $0xff4] sm:$0xf0] }
 0x2e4   : > { %v6497_v5 = vld [vmem:[%s8692_s16 + $0x998] sm:$0xf]  ;;  %v7298_v9 = vor.u32 %v8078_v63, %v7297_v23  ;;  %4194 = vmatpush.bf16.msrb.mxu2 %v7042_v4 }
 0x2e5   : > { %v7878_v6 = vld [vmem:[%s8692_s16 + $0x9b4] sm:$0xf0] }
 0x2e6   : > { %v6753_v7 = vld [vmem:[%s8692_s16 + $0xb98] sm:$0xf]  ;;  %v6498_v16 = vor.u32 %v7878_v6, %v6497_v5  ;;  %4207 = vmatpush.bf16.msrb.mxu3 %v7298_v9 }
 0x2e7   : > { %v7942_v10 = vld [vmem:[%s8692_s16 + $0xbb4] sm:$0xf0] }
 0x2e8   : > { %v7009_v11 = vld [vmem:[%s8692_s16 + $0xd98] sm:$0xf]  ;;  %v6754_v17 = vor.u32 %v7942_v10, %v6753_v7  ;;  %4169 = vmatpush.bf16.msrb.mxu0 %v6498_v16  ;;  %v3943_v7 = vpop.f32.mrf.mxu2 }
 0x2e9   : > { %v8006_v12 = vld [vmem:[%s8692_s16 + $0xdb4] sm:$0xf0] }
 0x2ea   : > { %v7265_v13 = vld [vmem:[%s8692_s16 + $0xf98] sm:$0xf]  ;;  %v7010_v18 = vor.u32 %v8006_v12, %v7009_v11  ;;  %4182 = vmatpush.bf16.msrb.mxu1 %v6754_v17 }
 0x2eb   : > { %v8070_v15 = vld [vmem:[%s8692_s16 + $0xfb4] sm:$0xf0] }
 0x2ec   : > { %v6465_v19 = vld [vmem:[%s8692_s16 + $0x958] sm:$0xf]  ;;  %v7266_v21 = vor.u32 %v8070_v15, %v7265_v13  ;;  %4195 = vmatpush.bf16.msrb.mxu2 %v7010_v18  ;;  %v3944_v13 = vadd.f32 %v3943_v7, %v3931_v61  ;;  %v3956_v15 = vpop.f32.mrf.mxu3  ;;  %v7754_v61 = vld [vmem:[%s8692_s16 + $0x5dc] sm:$0xf] }
 0x2ed   : > { %v7870_v55 = vld [vmem:[%s8692_s16 + $0x974] sm:$0xf0] }
 0x2ee   : > { %v6721_v20 = vld [vmem:[%s8692_s16 + $0xb58] sm:$0xf]  ;;  %v6466_v29 = vor.u32 %v7870_v55, %v6465_v19  ;;  %4208 = vmatpush.bf16.msrb.mxu3 %v7266_v21  ;;  %v9701_v19 = vadd.f32 %v3956_v15, %v3944_v13  ;;  %v3919_v55 = vpop.f32.mrf.mxu0  ;;  %v5731_v13 = vld [vmem:[%s8692_s16 + $0x3b8] sm:$0xf0] }
 0x2ef   : > { %v7934_v22 = vld [vmem:[%s8692_s16 + $0xb74] sm:$0xf0]  ;;  %v7746_v15 = vld [vmem:[%s8692_s16 + $0x59c] sm:$0xf] }
 0x2f0   : > { %v6977_v24 = vld [vmem:[%s8692_s16 + $0xd58] sm:$0xf]  ;;  %v6722_v30 = vor.u32 %v7934_v22, %v6721_v20  ;;  %4170 = vmatpush.bf16.msrb.mxu0 %v6466_v29  ;;  %v3945_v48 = vpop.f32.mrf.mxu2 }
 0x2f1   : > { %v7998_v25 = vld [vmem:[%s8692_s16 + $0xd74] sm:$0xf0]  ;;  %v5923_v48 = vld [vmem:[%s8692_s16 + $0x538] sm:$0xf0] }
 0x2f2   : > { %v7233_v62 = vld [vmem:[%s8692_s16 + $0xf58] sm:$0xf]  ;;  %v6978_v32 = vor.u32 %v7998_v25, %v6977_v24  ;;  %4183 = vmatpush.bf16.msrb.mxu1 %v6722_v30 }
 0x2f3   : > { %v8062_v26 = vld [vmem:[%s8692_s16 + $0xf74] sm:$0xf0] }
 0x2f4   : > { %v6433_v35 = vld [vmem:[%s8692_s16 + $0x918] sm:$0xf]  ;;  %v7234_v39 = vor.u32 %v8062_v26, %v7233_v62  ;;  %4196 = vmatpush.bf16.msrb.mxu2 %v6978_v32  ;;  %v3932_v62 = vpop.f32.mrf.mxu1 }
 0x2f5   : > { %v7862_v37 = vld [vmem:[%s8692_s16 + $0x934] sm:$0xf0] }
 0x2f6   : > { %v6689_v53 = vld [vmem:[%s8692_s16 + $0xb18] sm:$0xf]  ;;  %v6434_v47 = vor.u32 %v7862_v37, %v6433_v35  ;;  %4209 = vmatpush.bf16.msrb.mxu3 %v7234_v39 }
 0x2f7   : > { %v7926_v40 = vld [vmem:[%s8692_s16 + $0xb34] sm:$0xf0] }
 0x2f8   : > { %v6945_v58 = vld [vmem:[%s8692_s16 + $0xd18] sm:$0xf]  ;;  %v6690_v49 = vor.u32 %v7926_v40, %v6689_v53  ;;  %4171 = vmatpush.bf16.msrb.mxu0 %v6434_v47 }
 0x2f9   : > { %v7990_v43 = vld [vmem:[%s8692_s16 + $0xd34] sm:$0xf0] }
 0x2fa   : > { %v7201_v45 = vld [vmem:[%s8692_s16 + $0xf18] sm:$0xf]  ;;  %v6946_v50 = vor.u32 %v7990_v43, %v6945_v58  ;;  %4184 = vmatpush.bf16.msrb.mxu1 %v6690_v49 }
 0x2fb   : > { %v8054_v46 = vld [vmem:[%s8692_s16 + $0xf34] sm:$0xf0] }
 0x2fc   : > { %v6401_v51 = vld [vmem:[%s8692_s16 + $0x8d8] sm:$0xf]  ;;  %v7202_v57 = vor.u32 %v8054_v46, %v7201_v45  ;;  %4197 = vmatpush.bf16.msrb.mxu2 %v6946_v50 }
 0x2fd   : > { %v7854_v52 = vld [vmem:[%s8692_s16 + $0x8f4] sm:$0xf0] }
 0x2fe   : > { %v6657_v54 = vld [vmem:[%s8692_s16 + $0xad8] sm:$0xf]  ;;  %v6402_v0 = vor.u32 %v7854_v52, %v6401_v51  ;;  %4210 = vmatpush.bf16.msrb.mxu3 %v7202_v57  ;;  %v5507_v57 = vld [vmem:[%s8692_s16 + $0x1f8] sm:$0xf0] }
 0x2ff   : > { %v7918_v59 = vld [vmem:[%s8692_s16 + $0xaf4] sm:$0xf0] }
 0x300   : > { %v6913_v60 = vld [vmem:[%s8692_s16 + $0xcd8] sm:$0xf]  ;;  %v6658_v1 = vor.u32 %v7918_v59, %v6657_v54  ;;  %4172 = vmatpush.bf16.msrb.mxu0 %v6402_v0  ;;  %v3958_v54 = vpop.f32.mrf.mxu3  ;;  %v7690_v59 = vld [vmem:[%s8692_s16 + $0x3dc] sm:$0xf] }
 0x301   : > { %v7982_v36 = vld [vmem:[%s8692_s16 + $0xcf4] sm:$0xf0] }
 0x302   : > { %v7169_v23 = vld [vmem:[%s8692_s16 + $0xed8] sm:$0xf]  ;;  %v6914_v3 = vor.u32 %v7982_v36, %v6913_v60  ;;  %4185 = vmatpush.bf16.msrb.mxu1 %v6658_v1  ;;  %v5763_v36 = vld [vmem:[%s8692_s16 + $0x3f8] sm:$0xf0] }
 0x303   : > { %v8046_v63 = vld [vmem:[%s8692_s16 + $0xef4] sm:$0xf0]  ;;  %v7818_v1 = vld [vmem:[%s8692_s16 + $0x7dc] sm:$0xf] }
 0x304   : > { %v6369_v4 = vld [vmem:[%s8692_s16 + $0x898] sm:$0xf]  ;;  %v7170_v9 = vor.u32 %v8046_v63, %v7169_v23  ;;  %4198 = vmatpush.bf16.msrb.mxu2 %v6914_v3  ;;  %v6019_v23 = vld [vmem:[%s8692_s16 + $0x5f8] sm:$0xf0] }
 0x305   : > { %v7846_v5 = vld [vmem:[%s8692_s16 + $0x8b4] sm:$0xf0]  ;;  %v6275_v3 = vld [vmem:[%s8692_s16 + $0x7f8] sm:$0xf0]  ;;  %v6022_v7 = vor.u32 %v7754_v61, %v6019_v23  ;;  %v3982_v61 = vpop.f32.mrf.mxu1 }
 0x306   : > { %v6625_v6 = vld [vmem:[%s8692_s16 + $0xa98] sm:$0xf]  ;;  %v6370_v18 = vor.u32 %v7846_v5, %v6369_v4  ;;  %4211 = vmatpush.bf16.msrb.mxu3 %v7170_v9  ;;  %v5510_v5 = vor.u32 %v7626_v56, %v5507_v57  ;;  %v7618_v9 = vld [vmem:[%s8692_s16 + $0x19c] sm:$0xf] }
 0x307   : > { %v7910_v10 = vld [vmem:[%s8692_s16 + $0xab4] sm:$0xf0]  ;;  %v7594_v57 = vld [vmem:[%s8692_s16 + $0xdc] sm:$0xf] }
 0x308   : > { %v6881_v11 = vld [vmem:[%s8692_s16 + $0xc98] sm:$0xf]  ;;  %v6626_v20 = vor.u32 %v7910_v10, %v6625_v6  ;;  %4173 = vmatpush.bf16.msrb.mxu0 %v6370_v18  ;;  %v5766_v6 = vor.u32 %v7690_v59, %v5763_v36  ;;  %v5475_v10 = vld [vmem:[%s8692_s16 + $0x1b8] sm:$0xf0] }
 0x309   : > { %v7974_v12 = vld [vmem:[%s8692_s16 + $0xcb4] sm:$0xf0]  ;;  %v6243_v18 = vld [vmem:[%s8692_s16 + $0x7b8] sm:$0xf0]  ;;  %v5478_v55 = vor.u32 %v7618_v9, %v5475_v10 }
 0x30a   : > { %v7137_v16 = vld [vmem:[%s8692_s16 + $0xe98] sm:$0xf]  ;;  %v6882_v21 = vor.u32 %v7974_v12, %v6881_v11  ;;  %4186 = vmatpush.bf16.msrb.mxu1 %v6626_v20  ;;  %v7682_v11 = vld [vmem:[%s8692_s16 + $0x39c] sm:$0xf]  ;;  %v6278_v12 = vor.u32 %v7818_v1, %v6275_v3 }
 0x30b   : > { %v8038_v17 = vld [vmem:[%s8692_s16 + $0xeb4] sm:$0xf0]  ;;  %v5734_v20 = vor.u32 %v7682_v11, %v5731_v13  ;;  %v5379_v59 = vld [vmem:[%s8692_s16 + $0xf8] sm:$0xf0]  ;;  %v3995_v13 = vpop.f32.mrf.mxu2 }
 0x30c   : > { %v6337_v22 = vld [vmem:[%s8692_s16 + $0x858] sm:$0xf]  ;;  %v7138_v26 = vor.u32 %v8038_v17, %v7137_v16  ;;  %4199 = vmatpush.bf16.msrb.mxu2 %v6882_v21  ;;  %v5987_v16 = vld [vmem:[%s8692_s16 + $0x5b8] sm:$0xf0] }
 0x30d   : > { %v7838_v24 = vld [vmem:[%s8692_s16 + $0x874] sm:$0xf0]  ;;  %v7810_v17 = vld [vmem:[%s8692_s16 + $0x79c] sm:$0xf]  ;;  %v5990_v21 = vor.u32 %v7746_v15, %v5987_v16 }
 0x30e   : > { %v6593_v25 = vld [vmem:[%s8692_s16 + $0xa58] sm:$0xf]  ;;  %v6338_v53 = vor.u32 %v7838_v24, %v6337_v22  ;;  %4212 = vmatpush.bf16.msrb.mxu3 %v7138_v26  ;;  %v7610_v22 = vld [vmem:[%s8692_s16 + $0x15c] sm:$0xf]  ;;  %v6246_v62 = vor.u32 %v7810_v17, %v6243_v18 }
 0x30f   : > { %v7902_v29 = vld [vmem:[%s8692_s16 + $0xa74] sm:$0xf0]  ;;  %v5443_v24 = vld [vmem:[%s8692_s16 + $0x178] sm:$0xf0] }
 0x310   : > { %v6849_v30 = vld [vmem:[%s8692_s16 + $0xc58] sm:$0xf]  ;;  %v6594_v58 = vor.u32 %v7902_v29, %v6593_v25  ;;  %4174 = vmatpush.bf16.msrb.mxu0 %v6338_v53  ;;  %v7674_v25 = vld [vmem:[%s8692_s16 + $0x35c] sm:$0xf] }
 0x311   : > { %v7966_v32 = vld [vmem:[%s8692_s16 + $0xc74] sm:$0xf0]  ;;  %v5699_v26 = vld [vmem:[%s8692_s16 + $0x378] sm:$0xf0] }
 0x312   : > { %v7105_v35 = vld [vmem:[%s8692_s16 + $0xe58] sm:$0xf]  ;;  %v6850_v43 = vor.u32 %v7966_v32, %v6849_v30  ;;  %4187 = vmatpush.bf16.msrb.mxu1 %v6594_v58  ;;  %v7738_v29 = vld [vmem:[%s8692_s16 + $0x55c] sm:$0xf]  ;;  %v5702_v53 = vor.u32 %v7674_v25, %v5699_v26 }
 0x313   : > { %v8030_v37 = vld [vmem:[%s8692_s16 + $0xe74] sm:$0xf0]  ;;  %v5955_v30 = vld [vmem:[%s8692_s16 + $0x578] sm:$0xf0] }
 0x314   : > { %v6305_v39 = vld [vmem:[%s8692_s16 + $0x818] sm:$0xf]  ;;  %v7106_v49 = vor.u32 %v8030_v37, %v7105_v35  ;;  %4200 = vmatpush.bf16.msrb.mxu2 %v6850_v43  ;;  %v7802_v32 = vld [vmem:[%s8692_s16 + $0x75c] sm:$0xf]  ;;  %v5446_v37 = vor.u32 %v7610_v22, %v5443_v24 }
 0x315   : > { %v7830_v40 = vld [vmem:[%s8692_s16 + $0x834] sm:$0xf0]  ;;  %v6211_v35 = vld [vmem:[%s8692_s16 + $0x778] sm:$0xf0] }
 0x316   : > { %v6561_v45 = vld [vmem:[%s8692_s16 + $0xa18] sm:$0xf]  ;;  %v6306_v60 = vor.u32 %v7830_v40, %v6305_v39  ;;  %4213 = vmatpush.bf16.msrb.mxu3 %v7106_v49  ;;  %v5958_v39 = vor.u32 %v7738_v29, %v5955_v30  ;;  %v7602_v40 = vld [vmem:[%s8692_s16 + $0x11c] sm:$0xf] }
 0x317   : > { %v7894_v46 = vld [vmem:[%s8692_s16 + $0xa34] sm:$0xf0]  ;;  %v5411_v58 = vld [vmem:[%s8692_s16 + $0x138] sm:$0xf0] }
 0x318   : > { %v6817_v47 = vld [vmem:[%s8692_s16 + $0xc18] sm:$0xf]  ;;  %v6562_v63 = vor.u32 %v7894_v46, %v6561_v45  ;;  %4175 = vmatpush.bf16.msrb.mxu0 %v6306_v60  ;;  %v7666_v43 = vld [vmem:[%s8692_s16 + $0x31c] sm:$0xf]  ;;  %v6214_v45 = vor.u32 %v7802_v32, %v6211_v35 }
 0x319   : > { %v7958_v50 = vld [vmem:[%s8692_s16 + $0xc34] sm:$0xf0]  ;;  %v5667_v46 = vld [vmem:[%s8692_s16 + $0x338] sm:$0xf0] }
 0x31a   : > { %v7073_v51 = vld [vmem:[%s8692_s16 + $0xe18] sm:$0xf]  ;;  %v6818_v0 = vor.u32 %v7958_v50, %v6817_v47  ;;  %4188 = vmatpush.bf16.msrb.mxu1 %v6562_v63  ;;  %v7730_v47 = vld [vmem:[%s8692_s16 + $0x51c] sm:$0xf]  ;;  %v5670_v54 = vor.u32 %v7666_v43, %v5667_v46 }
 0x31b   : > { %v8022_v52 = vld [vmem:[%s8692_s16 + $0xe34] sm:$0xf0]  ;;  %4176 = vmatmul.bf16.vlgmr.msrb.gmra.mxu0 %v8874_v41  ;;  %v7794_v49 = vld [vmem:[%s8692_s16 + $0x71c] sm:$0xf]  ;;  %v5926_v56 = vor.u32 %v7730_v47, %v5923_v48 }
 0x31c   : > { %v7074_v4 = vor.u32 %v8022_v52, %v7073_v51  ;;  %4201 = vmatpush.bf16.msrb.mxu2 %v6818_v0  ;;  %4220 = vmatpush.bf16.msra.mxu0 %v5510_v5  ;;  %v6179_v50 = vld [vmem:[%s8692_s16 + $0x738] sm:$0xf0]  ;;  %v5414_v51 = vor.u32 %v7602_v40, %v5411_v58  ;;  %v3969_v52 = vpop.f32.mrf.mxu0  ;;  %v3984_v40 = vpop.f32.mrf.mxu1 }
 0x31d   : > { %4189 = vmatmul.bf16.vlgmr.msrb.gmra.mxu1 %v8878_v44  ;;  %v7658_v60 = vld [vmem:[%s8692_s16 + $0x2dc] sm:$0xf]  ;;  %v3970_v36 = vadd.f32 %v3969_v52, %v9701_v19  ;;  %v6182_v23 = vor.u32 %v7794_v49, %v6179_v50 }
 0x31e   : > { %4214 = vmatpush.bf16.msrb.mxu3 %v7074_v4  ;;  %4233 = vmatpush.bf16.msra.mxu1 %v5766_v6  ;;  %v5635_v63 = vld [vmem:[%s8692_s16 + $0x2f8] sm:$0xf0]  ;;  %v5382_v6 = vor.u32 %v7594_v57, %v5379_v59 }
 0x31f   : > { %4202 = vmatmul.bf16.vlgmr.msrb.gmra.mxu2 %v8870_v38  ;;  %v7722_v0 = vld [vmem:[%s8692_s16 + $0x4dc] sm:$0xf]  ;;  %v3983_v5 = vadd.f32 %v3982_v61, %v3970_v36  ;;  %v5638_v19 = vor.u32 %v7658_v60, %v5635_v63  ;;  %v3997_v61 = vpop.f32.mrf.mxu2 }
 0x320   : > { %4246 = vmatpush.bf16.msra.mxu2 %v6022_v7  ;;  %4221 = vmatpush.bf16.msra.mxu0 %v5478_v55  ;;  %v5891_v1 = vld [vmem:[%s8692_s16 + $0x4f8] sm:$0xf0]  ;;  %v4008_v55 = vpop.f32.mrf.mxu3 }
 0x321   : > { %4215 = vmatmul.bf16.vlgmr.msrb.gmra.mxu3 %v8876_v42  ;;  %v7786_v3 = vld [vmem:[%s8692_s16 + $0x6dc] sm:$0xf]  ;;  %v5894_v9 = vor.u32 %v7722_v0, %v5891_v1  ;;  %v3996_v18 = vadd.f32 %v3995_v13, %v3983_v5 }
 0x322   : > { %4259 = vmatpush.bf16.msra.mxu3 %v6278_v12  ;;  %4234 = vmatpush.bf16.msra.mxu1 %v5734_v20  ;;  %v6147_v4 = vld [vmem:[%s8692_s16 + $0x6f8] sm:$0xf0]  ;;  %v9771_v20 = vld [vmem:[%s8698_s8] sm:$0xff] }
 0x323   : > { %v7586_v7 = vld [vmem:[%s8692_s16 + $0x9c] sm:$0xf]  ;;  %v6150_v15 = vor.u32 %v7786_v3, %v6147_v4 }
 0x324   : > { %4247 = vmatpush.bf16.msra.mxu2 %v5990_v21  ;;  %4222 = vmatpush.bf16.msra.mxu0 %v5446_v37  ;;  %v5347_v10 = vld [vmem:[%s8692_s16 + $0xb8] sm:$0xf0]  ;;  %v4330_v21 = vperm.slane %v9771_v20, 4  ;;  %v3971_v30 = vpop.f32.mrf.mxu0 }
 0x325   : > { %v7650_v11 = vld [vmem:[%s8692_s16 + $0x29c] sm:$0xf]  ;;  %v5350_v25 = vor.u32 %v7586_v7, %v5347_v10 }
 0x326   : > { %4260 = vmatpush.bf16.msra.mxu3 %v6246_v62  ;;  %4235 = vmatpush.bf16.msra.mxu1 %v5702_v53  ;;  %v5603_v12 = vld [vmem:[%s8692_s16 + $0x2b8] sm:$0xf0]  ;;  %v4009_v62 = vadd.f32 %v4008_v55, %v3996_v18 }
 0x327   : > { %v7714_v16 = vld [vmem:[%s8692_s16 + $0x49c] sm:$0xf]  ;;  %v5606_v32 = vor.u32 %v7650_v11, %v5603_v12 }
 0x328   : > { %4248 = vmatpush.bf16.msra.mxu2 %v5958_v39  ;;  %4223 = vmatpush.bf16.msra.mxu0 %v5414_v51  ;;  %v5859_v17 = vld [vmem:[%s8692_s16 + $0x4b8] sm:$0xf0]  ;;  %v4346_v43 = vmul.f32 %v4330_v21, %v4009_v62  ;;  %v4010_v3 = vpop.f32.mrf.mxu3 }
 0x329   : > { %v7778_v22 = vld [vmem:[%s8692_s16 + $0x69c] sm:$0xf]  ;;  %v5862_v35 = vor.u32 %v7714_v16, %v5859_v17 }
 0x32a   : > { %4261 = vmatpush.bf16.msra.mxu3 %v6214_v45  ;;  %4236 = vmatpush.bf16.msra.mxu1 %v5670_v54  ;;  %v6115_v24 = vld [vmem:[%s8692_s16 + $0x6b8] sm:$0xf0] }
 0x32b   : > { %v9777_v26 = vld [vmem:[%s8700_s12] sm:$0xff]  ;;  %v6118_v58 = vor.u32 %v7778_v22, %v6115_v24 }
 0x32c   : > { %4249 = vmatpush.bf16.msra.mxu2 %v5926_v56  ;;  %4224 = vmatpush.bf16.msra.mxu0 %v5382_v6  ;;  %v4356_v29 = vperm.slane %v9777_v26, 4  ;;  %v7578_v37 = vld [vmem:[%s8692_s16 + $0x5c] sm:$0xf] }
 0x32d   : > { %v5315_v53 = vld [vmem:[%s8692_s16 + $0x78] sm:$0xf0] }
 0x32e   : > { %4262 = vmatpush.bf16.msra.mxu3 %v6182_v23  ;;  %4237 = vmatpush.bf16.msra.mxu1 %v5638_v19  ;;  %v7642_v39 = vld [vmem:[%s8692_s16 + $0x25c] sm:$0xf]  ;;  %v9788_v50 = vadd.f32 %v4356_v29, %v4346_v43  ;;  %v5318_v51 = vor.u32 %v7578_v37, %v5315_v53 }
 0x32f   : > { %v5571_v45 = vld [vmem:[%s8692_s16 + $0x278] sm:$0xf0] }
 0x330   : > { %4250 = vmatpush.bf16.msra.mxu2 %v5894_v9  ;;  %v7706_v46 = vld [vmem:[%s8692_s16 + $0x45c] sm:$0xf]  ;;  %4225 = vmatpush.bf16.msra.mxu0 %v5350_v25  ;;  %v5574_v56 = vor.u32 %v7642_v39, %v5571_v45 }
 0x331   : > { %v5827_v47 = vld [vmem:[%s8692_s16 + $0x478] sm:$0xf0] }
 0x332   : > { %4263 = vmatpush.bf16.msra.mxu3 %v6150_v15  ;;  %v7770_v48 = vld [vmem:[%s8692_s16 + $0x65c] sm:$0xf]  ;;  %4238 = vmatpush.bf16.msra.mxu1 %v5606_v32  ;;  %v5830_v57 = vor.u32 %v7706_v46, %v5827_v47 }
 0x333   : > { %v6083_v49 = vld [vmem:[%s8692_s16 + $0x678] sm:$0xf0] }
 0x334   : > { %v7570_v52 = vld [vmem:[%s8692_s16 + $0x1c] sm:$0xf]  ;;  %4251 = vmatpush.bf16.msra.mxu2 %v5862_v35  ;;  %v6086_v23 = vor.u32 %v7770_v48, %v6083_v49  ;;  %4226 = vmatpush.bf16.msra.mxu0 %v5318_v51 }
 0x335   : > { %v5283_v54 = vld [vmem:[%s8692_s16 + $0x38] sm:$0xf0] }
 0x336   : > { %v7634_v59 = vld [vmem:[%s8692_s16 + $0x21c] sm:$0xf]  ;;  %4264 = vmatpush.bf16.msra.mxu3 %v6118_v58  ;;  %v5286_v7 = vor.u32 %v7570_v52, %v5283_v54  ;;  %4239 = vmatpush.bf16.msra.mxu1 %v5574_v56 }
 0x337   : > { %v5539_v60 = vld [vmem:[%s8692_s16 + $0x238] sm:$0xf0] }
 0x338   : > { %v7698_v36 = vld [vmem:[%s8692_s16 + $0x41c] sm:$0xf]  ;;  %4252 = vmatpush.bf16.msra.mxu2 %v5830_v57  ;;  %v5542_v11 = vor.u32 %v7634_v59, %v5539_v60  ;;  %4227 = vmatpush.bf16.msra.mxu0 %v5286_v7 }
 0x339   : > { %v5795_v63 = vld [vmem:[%s8692_s16 + $0x438] sm:$0xf0] }
 0x33a   : > { %v7762_v0 = vld [vmem:[%s8692_s16 + $0x61c] sm:$0xf]  ;;  %v5798_v12 = vor.u32 %v7698_v36, %v5795_v63  ;;  %4265 = vmatpush.bf16.msra.mxu3 %v6086_v23  ;;  %4240 = vmatpush.bf16.msra.mxu1 %v5542_v11  ;;  %v4021_v63 = vpop.f32.mrf.mxu0 }
 0x33b   : > { %v6051_v1 = vld [vmem:[%s8692_s16 + $0x638] sm:$0xf0]  ;;  %4228 = vmatmul.bf16.vlgmr.msra.gmra.mxu0 %v8820_v28 }
 0x33c   : > { %v7882_v4 = vld [vmem:[%s8692_s16 + $0x9dc] sm:$0xf]  ;;  %v6054_v16 = vor.u32 %v7762_v0, %v6051_v1  ;;  %4253 = vmatpush.bf16.msra.mxu2 %v5798_v12 }
 0x33d   : > { %v6531_v5 = vld [vmem:[%s8692_s16 + $0x9f8] sm:$0xf0]  ;;  %4241 = vmatmul.bf16.vlgmr.msra.gmra.mxu1 %v8826_v34 }
 0x33e   : > { %v7946_v6 = vld [vmem:[%s8692_s16 + $0xbdc] sm:$0xf]  ;;  %v6534_v17 = vor.u32 %v7882_v4, %v6531_v5  ;;  %4266 = vmatpush.bf16.msra.mxu3 %v6054_v16 }
 0x33f   : > { %v6787_v19 = vld [vmem:[%s8692_s16 + $0xbf8] sm:$0xf0]  ;;  %4254 = vmatmul.bf16.vlgmr.msra.gmra.mxu2 %v8818_v27 }
 0x340   : > { %v8010_v9 = vld [vmem:[%s8692_s16 + $0xddc] sm:$0xf]  ;;  %v6790_v18 = vor.u32 %v7946_v6, %v6787_v19  ;;  %4272 = vmatpush.bf16.msrb.mxu0 %v6534_v17  ;;  %v4034_v6 = vpop.f32.mrf.mxu1 }
 0x341   : > { %v7043_v10 = vld [vmem:[%s8692_s16 + $0xdf8] sm:$0xf0]  ;;  %4267 = vmatmul.bf16.vlgmr.msra.gmra.mxu3 %v8824_v33  ;;  %v4035_v11 = vadd.f32 %v4034_v6, %v4021_v63 }
 0x342   : > { %v8074_v13 = vld [vmem:[%s8692_s16 + $0xfdc] sm:$0xf]  ;;  %v7046_v55 = vor.u32 %v8010_v9, %v7043_v10  ;;  %4285 = vmatpush.bf16.msrb.mxu1 %v6790_v18 }
 0x343   : > { %v7299_v15 = vld [vmem:[%s8692_s16 + $0xff8] sm:$0xf0] }
 0x344   : > { %v7874_v21 = vld [vmem:[%s8692_s16 + $0x99c] sm:$0xf]  ;;  %v7302_v25 = vor.u32 %v8074_v13, %v7299_v15  ;;  %4298 = vmatpush.bf16.msrb.mxu2 %v7046_v55 }
 0x345   : > { %v6499_v22 = vld [vmem:[%s8692_s16 + $0x9b8] sm:$0xf0] }
 0x346   : > { %v7938_v24 = vld [vmem:[%s8692_s16 + $0xb9c] sm:$0xf]  ;;  %v6502_v37 = vor.u32 %v7874_v21, %v6499_v22  ;;  %4311 = vmatpush.bf16.msrb.mxu3 %v7302_v25  ;;  %v4047_v22 = vpop.f32.mrf.mxu2 }
 0x347   : > { %v6755_v62 = vld [vmem:[%s8692_s16 + $0xbb8] sm:$0xf0] }
 0x348   : > { %v8002_v29 = vld [vmem:[%s8692_s16 + $0xd9c] sm:$0xf]  ;;  %v6758_v53 = vor.u32 %v7938_v24, %v6755_v62  ;;  %4273 = vmatpush.bf16.msrb.mxu0 %v6502_v37 }
 0x349   : > { %v7011_v30 = vld [vmem:[%s8692_s16 + $0xdb8] sm:$0xf0] }
 0x34a   : > { %v8066_v32 = vld [vmem:[%s8692_s16 + $0xf9c] sm:$0xf]  ;;  %v7014_v39 = vor.u32 %v8002_v29, %v7011_v30  ;;  %4286 = vmatpush.bf16.msrb.mxu1 %v6758_v53  ;;  %v4048_v30 = vadd.f32 %v4047_v22, %v4035_v11 }
 0x34b   : > { %v7267_v35 = vld [vmem:[%s8692_s16 + $0xfb8] sm:$0xf0] }
 0x34c   : > { %v7866_v40 = vld [vmem:[%s8692_s16 + $0x95c] sm:$0xf]  ;;  %v7270_v45 = vor.u32 %v8066_v32, %v7267_v35  ;;  %4299 = vmatpush.bf16.msrb.mxu2 %v7014_v39  ;;  %v4060_v32 = vpop.f32.mrf.mxu3 }
 0x34d   : > { %v6467_v58 = vld [vmem:[%s8692_s16 + $0x978] sm:$0xf0]  ;;  %v4061_v39 = vadd.f32 %v4060_v32, %v4048_v30 }
 0x34e   : > { %v7930_v43 = vld [vmem:[%s8692_s16 + $0xb5c] sm:$0xf]  ;;  %v6470_v52 = vor.u32 %v7866_v40, %v6467_v58  ;;  %4312 = vmatpush.bf16.msrb.mxu3 %v7270_v45  ;;  %v4023_v40 = vpop.f32.mrf.mxu0 }
 0x34f   : > { %v6723_v46 = vld [vmem:[%s8692_s16 + $0xb78] sm:$0xf0] }
 0x350   : > { %v7994_v47 = vld [vmem:[%s8692_s16 + $0xd5c] sm:$0xf]  ;;  %v6726_v27 = vor.u32 %v7930_v43, %v6723_v46  ;;  %4274 = vmatpush.bf16.msrb.mxu0 %v6470_v52 }
 0x351   : > { %v6979_v48 = vld [vmem:[%s8692_s16 + $0xd78] sm:$0xf0] }
 0x352   : > { %v8058_v49 = vld [vmem:[%s8692_s16 + $0xf5c] sm:$0xf]  ;;  %v6982_v54 = vor.u32 %v7994_v47, %v6979_v48  ;;  %4287 = vmatpush.bf16.msrb.mxu1 %v6726_v27  ;;  %v4036_v48 = vpop.f32.mrf.mxu1 }
 0x353   : > { %v7235_v51 = vld [vmem:[%s8692_s16 + $0xf78] sm:$0xf0] }
 0x354   : > { %v7858_v56 = vld [vmem:[%s8692_s16 + $0x91c] sm:$0xf]  ;;  %v7238_v59 = vor.u32 %v8058_v49, %v7235_v51  ;;  %4300 = vmatpush.bf16.msrb.mxu2 %v6982_v54 }
 0x355   : > { %v6435_v57 = vld [vmem:[%s8692_s16 + $0x938] sm:$0xf0] }
 0x356   : > { %v7922_v33 = vld [vmem:[%s8692_s16 + $0xb1c] sm:$0xf]  ;;  %v6438_v34 = vor.u32 %v7858_v56, %v6435_v57  ;;  %4313 = vmatpush.bf16.msrb.mxu3 %v7238_v59 }
 0x357   : > { %v6691_v60 = vld [vmem:[%s8692_s16 + $0xb38] sm:$0xf0] }
 0x358   : > { %v7986_v28 = vld [vmem:[%s8692_s16 + $0xd1c] sm:$0xf]  ;;  %v6694_v0 = vor.u32 %v7922_v33, %v6691_v60  ;;  %4275 = vmatpush.bf16.msrb.mxu0 %v6438_v34 }
 0x359   : > { %v6947_v36 = vld [vmem:[%s8692_s16 + $0xd38] sm:$0xf0] }
 0x35a   : > { %v8050_v61 = vld [vmem:[%s8692_s16 + $0xf1c] sm:$0xf]  ;;  %v6950_v1 = vor.u32 %v7986_v28, %v6947_v36  ;;  %4288 = vmatpush.bf16.msrb.mxu1 %v6694_v0  ;;  %v4086_v11 = vpop.f32.mrf.mxu1 }
 0x35b   : > { %v7203_v23 = vld [vmem:[%s8692_s16 + $0xf38] sm:$0xf0] }
 0x35c   : > { %v7850_v3 = vld [vmem:[%s8692_s16 + $0x8dc] sm:$0xf]  ;;  %v7206_v7 = vor.u32 %v8050_v61, %v7203_v23  ;;  %4301 = vmatpush.bf16.msrb.mxu2 %v6950_v1  ;;  %v4049_v61 = vpop.f32.mrf.mxu2  ;;  %v4062_v1 = vpop.f32.mrf.mxu3 }
 0x35d   : > { %v6403_v4 = vld [vmem:[%s8692_s16 + $0x8f8] sm:$0xf0] }
 0x35e   : > { %v7914_v5 = vld [vmem:[%s8692_s16 + $0xadc] sm:$0xf]  ;;  %v6406_v15 = vor.u32 %v7850_v3, %v6403_v4  ;;  %4314 = vmatpush.bf16.msrb.mxu3 %v7206_v7 }
 0x35f   : > { %v6659_v19 = vld [vmem:[%s8692_s16 + $0xaf8] sm:$0xf0] }
 0x360   : > { %v7978_v9 = vld [vmem:[%s8692_s16 + $0xcdc] sm:$0xf]  ;;  %v6662_v16 = vor.u32 %v7914_v5, %v6659_v19  ;;  %4276 = vmatpush.bf16.msrb.mxu0 %v6406_v15 }
 0x361   : > { %v6915_v10 = vld [vmem:[%s8692_s16 + $0xcf8] sm:$0xf0] }
 0x362   : > { %v8042_v12 = vld [vmem:[%s8692_s16 + $0xedc] sm:$0xf]  ;;  %v6918_v17 = vor.u32 %v7978_v9, %v6915_v10  ;;  %4289 = vmatpush.bf16.msrb.mxu1 %v6662_v16  ;;  %v4073_v9 = vpop.f32.mrf.mxu0 }
 0x363   : > { %v7171_v13 = vld [vmem:[%s8692_s16 + $0xef8] sm:$0xf0]  ;;  %v4074_v10 = vadd.f32 %v4073_v9, %v4061_v39 }
 0x364   : > { %v7842_v18 = vld [vmem:[%s8692_s16 + $0x89c] sm:$0xf]  ;;  %v7174_v24 = vor.u32 %v8042_v12, %v7171_v13  ;;  %4302 = vmatpush.bf16.msrb.mxu2 %v6918_v17  ;;  %v4099_v13 = vpop.f32.mrf.mxu2  ;;  %v4112_v16 = vpop.f32.mrf.mxu3  ;;  %v4331_v17 = vperm.slane %v9771_v20, 5 }
 0x365   : > { %v6371_v55 = vld [vmem:[%s8692_s16 + $0x8b8] sm:$0xf0]  ;;  %v4087_v12 = vadd.f32 %v4086_v11, %v4074_v10 }
 0x366   : > { %v7906_v21 = vld [vmem:[%s8692_s16 + $0xa9c] sm:$0xf]  ;;  %v6374_v53 = vor.u32 %v7842_v18, %v6371_v55  ;;  %4315 = vmatpush.bf16.msrb.mxu3 %v7174_v24  ;;  %v4357_v55 = vperm.slane %v9777_v26, 5 }
 0x367   : > { %v6627_v25 = vld [vmem:[%s8692_s16 + $0xab8] sm:$0xf0]  ;;  %v4100_v15 = vadd.f32 %v4099_v13, %v4087_v12  ;;  %v4333_v13 = vperm.slane %v9771_v20, 7 }
 0x368   : > { %v7970_v62 = vld [vmem:[%s8692_s16 + $0xc9c] sm:$0xf]  ;;  %v6630_v58 = vor.u32 %v7906_v21, %v6627_v25  ;;  %4277 = vmatpush.bf16.msrb.mxu0 %v6374_v53 }
 0x369   : > { %v6883_v29 = vld [vmem:[%s8692_s16 + $0xcb8] sm:$0xf0]  ;;  %v4113_v18 = vadd.f32 %v4112_v16, %v4100_v15 }
 0x36a   : > { %v8034_v35 = vld [vmem:[%s8692_s16 + $0xe9c] sm:$0xf]  ;;  %v6886_v43 = vor.u32 %v7970_v62, %v6883_v29  ;;  %4290 = vmatpush.bf16.msrb.mxu1 %v6630_v58  ;;  %v4075_v21 = vpop.f32.mrf.mxu0 }
 0x36b   : > { %v7139_v37 = vld [vmem:[%s8692_s16 + $0xeb8] sm:$0xf0]  ;;  %v4347_v22 = vmul.f32 %v4331_v17, %v4113_v18  ;;  %v4359_v18 = vperm.slane %v9777_v26, 7 }
 0x36c   : > { %v7834_v45 = vld [vmem:[%s8692_s16 + $0x85c] sm:$0xf]  ;;  %v7142_v49 = vor.u32 %v8034_v35, %v7139_v37  ;;  %4303 = vmatpush.bf16.msrb.mxu2 %v6886_v43  ;;  %v4114_v24 = vpop.f32.mrf.mxu3 }
 0x36d   : > { %v6339_v46 = vld [vmem:[%s8692_s16 + $0x878] sm:$0xf0] }
 0x36e   : > { %v7898_v47 = vld [vmem:[%s8692_s16 + $0xa5c] sm:$0xf]  ;;  %v6342_v57 = vor.u32 %v7834_v45, %v6339_v46  ;;  %4316 = vmatpush.bf16.msrb.mxu3 %v7142_v49 }
 0x36f   : > { %v6595_v51 = vld [vmem:[%s8692_s16 + $0xa78] sm:$0xf0] }
 0x370   : > { %v7962_v52 = vld [vmem:[%s8692_s16 + $0xc5c] sm:$0xf]  ;;  %v6598_v33 = vor.u32 %v7898_v47, %v6595_v51  ;;  %4278 = vmatpush.bf16.msrb.mxu0 %v6342_v57  ;;  %v4332_v51 = vperm.slane %v9771_v20, 6 }
 0x371   : > { %v6851_v27 = vld [vmem:[%s8692_s16 + $0xc78] sm:$0xf0] }
 0x372   : > { %v8026_v54 = vld [vmem:[%s8692_s16 + $0xe5c] sm:$0xf]  ;;  %v6854_v59 = vor.u32 %v7962_v52, %v6851_v27  ;;  %4291 = vmatpush.bf16.msrb.mxu1 %v6598_v33  ;;  %v4358_v27 = vperm.slane %v9777_v26, 6 }
 0x373   : > { %v7107_v56 = vld [vmem:[%s8692_s16 + $0xe78] sm:$0xf0] }
 0x374   : > { %v7826_v60 = vld [vmem:[%s8692_s16 + $0x81c] sm:$0xf]  ;;  %v7110_v23 = vor.u32 %v8026_v54, %v7107_v56  ;;  %4304 = vmatpush.bf16.msrb.mxu2 %v6854_v59  ;;  %v4164_v32 = vpop.f32.mrf.mxu3 }
 0x375   : > { %v6307_v28 = vld [vmem:[%s8692_s16 + $0x838] sm:$0xf0] }
 0x376   : > { %v7890_v36 = vld [vmem:[%s8692_s16 + $0xa1c] sm:$0xf]  ;;  %v6310_v5 = vor.u32 %v7826_v60, %v6307_v28  ;;  %4317 = vmatpush.bf16.msrb.mxu3 %v7110_v23 }
 0x377   : > { %v6563_v34 = vld [vmem:[%s8692_s16 + $0xa38] sm:$0xf0] }
 0x378   : > { %v7954_v63 = vld [vmem:[%s8692_s16 + $0xc1c] sm:$0xf]  ;;  %v6566_v6 = vor.u32 %v7890_v36, %v6563_v34  ;;  %4279 = vmatpush.bf16.msrb.mxu0 %v6310_v5 }
 0x379   : > { %v6819_v0 = vld [vmem:[%s8692_s16 + $0xc38] sm:$0xf0] }
 0x37a   : > { %v8018_v3 = vld [vmem:[%s8692_s16 + $0xe1c] sm:$0xf]  ;;  %v6822_v7 = vor.u32 %v7954_v63, %v6819_v0  ;;  %4292 = vmatpush.bf16.msrb.mxu1 %v6566_v6 }
 0x37b   : > { %v7075_v4 = vld [vmem:[%s8692_s16 + $0xe38] sm:$0xf0]  ;;  %4280 = vmatmul.bf16.vlgmr.msrb.gmra.mxu0 %v8874_v41  ;;  %v4088_v41 = vpop.f32.mrf.mxu1 }
 0x37c   : > { %v7078_v19 = vor.u32 %v8018_v3, %v7075_v4  ;;  %4305 = vmatpush.bf16.msrb.mxu2 %v6822_v7  ;;  %v4166_v40 = vpop.f32.mrf.mxu3 }
 0x37d   : > { %4293 = vmatmul.bf16.vlgmr.msrb.gmra.mxu1 %v8878_v44  ;;  %v9872_v44 = vadd.f32 %v4357_v55, %v4347_v22 }
 0x37e   : > { %4318 = vmatpush.bf16.msrb.mxu3 %v7078_v19 }
 0x37f   : > { %4306 = vmatmul.bf16.vlgmr.msrb.gmra.mxu2 %v8870_v38  ;;  %v4101_v38 = vpop.f32.mrf.mxu2 }
 0x381   : > { %4319 = vmatmul.bf16.vlgmr.msrb.gmra.mxu3 %v8876_v42  ;;  %v4125_v42 = vpop.f32.mrf.mxu0 }
 0x383   : > { %v4138_v25 = vpop.f32.mrf.mxu1 }
 0x384   : > { %v4139_v62 = vadd.f32 %v4138_v25, %v4125_v42 }
 0x387   : > { %v4151_v29 = vpop.f32.mrf.mxu2 }
 0x388   : > { %v4152_v30 = vadd.f32 %v4151_v29, %v4139_v62 }
 0x389   : > { %v4127_v37 = vpop.f32.mrf.mxu0 }
 0x38a   : > { %v4165_v35 = vadd.f32 %v4164_v32, %v4152_v30 }
 0x38b   : > { %v4140_v53 = vpop.f32.mrf.mxu1 }
 0x38f   : > { %v4153_v39 = vpop.f32.mrf.mxu2 }
 0x398   : > { %v4177_v58 = vpop.f32.mrf.mxu0 }
 0x399   : > { %v4178_v43 = vadd.f32 %v4177_v58, %v4165_v35 }
 0x39a   : > { %v4190_v45 = vpop.f32.mrf.mxu1 }
 0x39b   : > { %v4191_v46 = vadd.f32 %v4190_v45, %v4178_v43 }
 0x3a0   : > { %v4179_v54 = vpop.f32.mrf.mxu0 }
 0x3a2   : > { %v4203_v47 = vpop.f32.mrf.mxu2  ;;  %v4192_v56 = vpop.f32.mrf.mxu1 }
 0x3a3   : > { %v4204_v48 = vadd.f32 %v4203_v47, %v4191_v46 }
 0x3a4   : > { %v4216_v49 = vpop.f32.mrf.mxu3 }
 0x3a5   : > { %v4217_v52 = vadd.f32 %v4216_v49, %v4204_v48 }
 0x3a7   : > { %v4348_v57 = vmul.f32 %v4332_v51, %v4217_v52 }
 0x3a9   : > { %v9876_v33 = vadd.f32 %v4358_v27, %v4348_v57 }
 0x3aa   : > { %v4205_v59 = vpop.f32.mrf.mxu2 }
 0x3ac   : > { %v4218_v60 = vpop.f32.mrf.mxu3 }
 0x3b8   : > { %v4229_v28 = vpop.f32.mrf.mxu0 }
 0x3ba   : > { %v4242_v36 = vpop.f32.mrf.mxu1 }
 0x3bb   : > { %v4243_v3 = vadd.f32 %v4242_v36, %v4229_v28 }
 0x3c0   : > { %v4231_v34 = vpop.f32.mrf.mxu0 }
 0x3c2   : > { %v4255_v61 = vpop.f32.mrf.mxu2  ;;  %v4244_v63 = vpop.f32.mrf.mxu1 }
 0x3c3   : > { %v4256_v4 = vadd.f32 %v4255_v61, %v4243_v3 }
 0x3c4   : > { %v4268_v23 = vpop.f32.mrf.mxu3 }
 0x3c5   : > { %v4269_v5 = vadd.f32 %v4268_v23, %v4256_v4 }
 0x3ca   : > { %v4257_v0 = vpop.f32.mrf.mxu2 }
 0x3cc   : > { %v4270_v1 = vpop.f32.mrf.mxu3 }
 0x3f8   : > { %v4281_v6 = vpop.f32.mrf.mxu0 }
 0x3f9   : > { %v4282_v19 = vadd.f32 %v4281_v6, %v4269_v5 }
 0x3fa   : > { %v4294_v7 = vpop.f32.mrf.mxu1 }
 0x3fb   : > { %v4295_v9 = vadd.f32 %v4294_v7, %v4282_v19 }
 0x400   : > { %v4283_v15 = vpop.f32.mrf.mxu0 }
 0x402   : > { %v4307_v10 = vpop.f32.mrf.mxu2  ;;  %v4296_v16 = vpop.f32.mrf.mxu1 }
 0x403   : > { %v4308_v11 = vadd.f32 %v4307_v10, %v4295_v9 }
 0x404   : > { %v4320_v12 = vpop.f32.mrf.mxu3 }
 0x405   : > { %v4321_v17 = vadd.f32 %v4320_v12, %v4308_v11 }
 0x407   : > { %v4349_v55 = vmul.f32 %v4333_v13, %v4321_v17 }
 0x408   : > { %4378 = sbr.rel (%p5236_p4) target bundleno = 1044 (0x414), region = 76 }
 0x409   : > { %v4375_v21 = vadd.f32 %v4359_v18, %v4349_v55 }
 0x40a   : > { %v4309_v41 = vpop.f32.mrf.mxu2 }
 0x40c   : > { %v4322_v22 = vpop.f32.mrf.mxu3 }
 0x40d   : > { %v4387_v38 = vrot.slane %v9347_v8, 6  ;;  %v4388_v24 = vrot.slane %v9496_v14, 4  ;;  %v4389_v42 = vrot.slane %v9639_v31, 2  ;;  %vm4393_vm0 = vcmask 1041408  }
 0x40e   : > { %vm4395_vm1 = vcmask 1045508   ;;  %vm4397_vm2 = vcmask 1043456   ;;  %v4390_v20 = vrot.slane %v9872_v44, 6  ;;  %v4391_v26 = vrot.slane %v9876_v33, 4 }
 0x40f   : > { %v4394_v25 = vsel %vm4393_vm0, %v9204_v2, %v4387_v38  ;;  %v4396_v62 = vsel %vm4395_vm1, %v4388_v24, %v4389_v42  ;;  %v4392_v29 = vrot.slane %v4375_v21, 2 }
 0x410   : > { %v4398_v30 = vsel %vm4397_vm2, %v4394_v25, %v4396_v62  ;;  %v4399_v32 = vsel %vm4393_vm0, %v9788_v50, %v4390_v20 }
 0x411   : > { %4404 = vst [vmem:[#allocation2] sm:$0xff] %v4398_v30  ;;  %v4400_v35 = vsel %vm4395_vm1, %v4391_v26, %v4392_v29 }
 0x412   : > { %v4401_v37 = vsel %vm4397_vm2, %v4399_v32, %v4400_v35 }
 0x413   : > { %4405 = vst [vmem:[#allocation2 + $0x8] sm:$0xff] %v4401_v37 }
 0x414 PF: > { %p7304_p1 = scmp.le.s32.totalorder %s8565_s25, 0 }
 0x416   : > { %4409 = sbr.rel (%p7304_p1) target bundleno = 1061 (0x425), region = 80 }
 0x41b   : > { %v4410_v53 = vmax.f32 %v9204_v2, 0.0  ;;  %v4411_v39 = vmax.f32 %v9347_v8, 0.0  ;;  %v4412_v40 = vmax.f32 %v9496_v14, 0.0  ;;  %v4413_v58 = vmax.f32 %v9639_v31, 0.0 }
 0x41c   : > { %vm4432_vm3 = vcmask 1041408   ;;  %vm4434_vm4 = vcmask 1045508   ;;  %vm4436_vm5 = vcmask 1043456   ;;  %v4414_v43 = vmax.f32 %v9788_v50, 0.0 }
 0x41d   : > { %v4426_v45 = vrot.slane %v4411_v39, 6  ;;  %v4427_v46 = vrot.slane %v4412_v40, 4  ;;  %v4428_v47 = vrot.slane %v4413_v58, 2  ;;  %v4415_v48 = vmax.f32 %v9872_v44, 0.0 }
 0x41e   : > { %v4416_v49 = vmax.f32 %v9876_v33, 0.0  ;;  %v4417_v51 = vmax.f32 %v4375_v21, 0.0 }
 0x41f   : > { %v4433_v2 = vsel %vm4432_vm3, %v4410_v53, %v4426_v45  ;;  %v4435_v8 = vsel %vm4434_vm4, %v4427_v46, %v4428_v47  ;;  %v4429_v14 = vrot.slane %v4415_v48, 6 }
 0x420   : > { %v4437_v31 = vsel %vm4436_vm5, %v4433_v2, %v4435_v8  ;;  %v4430_v52 = vrot.slane %v4416_v49, 4  ;;  %v4431_v27 = vrot.slane %v4417_v51, 2 }
 0x421   : > { %4443 = vst [vmem:[#allocation2] sm:$0xff] %v4437_v31  ;;  %v4438_v50 = vsel %vm4432_vm3, %v4414_v43, %v4429_v14 }
 0x422   : > { %v4439_v54 = vsel %vm4434_vm4, %v4430_v52, %v4431_v27 }
 0x423   : > { %v4440_v56 = vsel %vm4436_vm5, %v4438_v50, %v4439_v54 }
 0x424   : > { %4444 = vst [vmem:[#allocation2 + $0x8] sm:$0xff] %v4440_v56 }
 0x425 PF: > { %p7305_p4 = scmp.ne.s32.totalorder %s8565_s25, 8 }
 0x427   : > { %4448 = sbr.rel (%p7305_p4) target bundleno = 1275 (0x4fb), region = 84 }
 0x42c   : > { %v8086_v44 = vld [vmem:[#allocation11 + $0x38] sm:$0xff]  ;;  %v8085_v60 = vld [vmem:[#allocation11 + $0x30] sm:$0xff]  ;;  %v8084_v23 = vld [vmem:[#allocation11 + $0x28] sm:$0xff] }
 0x42d   : > { %v8094_v57 = vld [vmem:[#allocation11 + $0x78] sm:$0xff]  ;;  %4996 = vmatpush.bf16.msra.mxu0 %v8086_v44  ;;  %v8093_v28 = vld [vmem:[#allocation11 + $0x70] sm:$0xff]  ;;  %v8092_v34 = vld [vmem:[#allocation11 + $0x68] sm:$0xff] }
 0x42e   : > { %v8102_v33 = vld [vmem:[#allocation11 + $0xb8] sm:$0xff]  ;;  %5009 = vmatpush.bf16.msra.mxu1 %v8094_v57  ;;  %v8101_v36 = vld [vmem:[#allocation11 + $0xb0] sm:$0xff]  ;;  %v8100_v63 = vld [vmem:[#allocation11 + $0xa8] sm:$0xff] }
 0x42f   : > { %v8110_v59 = vld [vmem:[#allocation11 + $0xf8] sm:$0xff]  ;;  %5022 = vmatpush.bf16.msra.mxu2 %v8102_v33  ;;  %v8109_v61 = vld [vmem:[#allocation11 + $0xf0] sm:$0xff]  ;;  %v8108_v0 = vld [vmem:[#allocation11 + $0xe8] sm:$0xff] }
 0x430   : > { %5035 = vmatpush.bf16.msra.mxu3 %v8110_v59  ;;  %v8083_v1 = vld [vmem:[#allocation11 + $0x20] sm:$0xff]  ;;  %v8082_v7 = vld [vmem:[#allocation11 + $0x18] sm:$0xff]  ;;  %v8081_v11 = vld [vmem:[#allocation11 + $0x10] sm:$0xff] }
 0x431   : > { %4997 = vmatpush.bf16.msra.mxu0 %v8085_v60  ;;  %v8091_v3 = vld [vmem:[#allocation11 + $0x60] sm:$0xff]  ;;  %v8090_v19 = vld [vmem:[#allocation11 + $0x58] sm:$0xff]  ;;  %v8089_v12 = vld [vmem:[#allocation11 + $0x50] sm:$0xff] }
 0x432   : > { %5010 = vmatpush.bf16.msra.mxu1 %v8093_v28  ;;  %v8099_v4 = vld [vmem:[#allocation11 + $0xa0] sm:$0xff]  ;;  %v8098_v9 = vld [vmem:[#allocation11 + $0x98] sm:$0xff]  ;;  %v8097_v13 = vld [vmem:[#allocation11 + $0x90] sm:$0xff] }
 0x433   : > { %5023 = vmatpush.bf16.msra.mxu2 %v8101_v36  ;;  %v8107_v5 = vld [vmem:[#allocation11 + $0xe0] sm:$0xff]  ;;  %v8106_v10 = vld [vmem:[#allocation11 + $0xd8] sm:$0xff]  ;;  %v8105_v15 = vld [vmem:[#allocation11 + $0xd0] sm:$0xff] }
 0x434   : > { %5036 = vmatpush.bf16.msra.mxu3 %v8109_v61  ;;  %v4449_v6 = vld [vmem:[#allocation2] sm:$0xff]  ;;  %v8080_v16 = vld [vmem:[#allocation11 + $0x8] sm:$0xff]  ;;  %v8118_v42 = vld [vmem:[#allocation11 + $0x138] sm:$0xff] }
 0x435   : > { %4998 = vmatpush.bf16.msra.mxu0 %v8084_v23  ;;  %4453 = vst [vmem:[#allocation1] ss:$4 sm:$0xff] %v4449_v6  ;;  %v8088_v17 = vld [vmem:[#allocation11 + $0x48] sm:$0xff]  ;;  %v8079_v41 = vld [vmem:[#allocation11] sm:$0xff]  ;;  %v8126_v20 = vld [vmem:[#allocation11 + $0x178] sm:$0xff] }
 0x436   : > { %5011 = vmatpush.bf16.msra.mxu1 %v8092_v34  ;;  %v8096_v18 = vld [vmem:[#allocation11 + $0x88] sm:$0xff]  ;;  %v8087_v22 = vld [vmem:[#allocation11 + $0x40] sm:$0xff]  ;;  %v8134_v30 = vld [vmem:[#allocation11 + $0x1b8] sm:$0xff] }
 0x437   : > { %5024 = vmatpush.bf16.msra.mxu2 %v8100_v63  ;;  %v8104_v55 = vld [vmem:[#allocation11 + $0xc8] sm:$0xff]  ;;  %v8095_v38 = vld [vmem:[#allocation11 + $0x80] sm:$0xff]  ;;  %v8142_v32 = vld [vmem:[#allocation11 + $0x1f8] sm:$0xff] }
 0x438   : > { %5037 = vmatpush.bf16.msra.mxu3 %v8108_v0  ;;  %v4450_v21 = vld [vmem:[#allocation2 + $0x8] sm:$0xff]  ;;  %v8103_v24 = vld [vmem:[#allocation11 + $0xc0] sm:$0xff]  ;;  %v8117_v40 = vld [vmem:[#allocation11 + $0x130] sm:$0xff] }
 0x439   : > { %4999 = vmatpush.bf16.msra.mxu0 %v8083_v1  ;;  %4455 = vst [vmem:[#allocation1 + $0x20] ss:$4 sm:$0xff] %v4450_v21  ;;  %v8125_v58 = vld [vmem:[#allocation11 + $0x170] sm:$0xff]  ;;  %v8116_v46 = vld [vmem:[#allocation11 + $0x128] sm:$0xff]  ;;  %v8115_v51 = vld [vmem:[#allocation11 + $0x120] sm:$0xff] }
 0x43a   : > { %5012 = vmatpush.bf16.msra.mxu1 %v8091_v3  ;;  %v8133_v43 = vld [vmem:[#allocation11 + $0x1b0] sm:$0xff]  ;;  %v8124_v47 = vld [vmem:[#allocation11 + $0x168] sm:$0xff]  ;;  %v8123_v2 = vld [vmem:[#allocation11 + $0x160] sm:$0xff] }
 0x43b   : > { %5025 = vmatpush.bf16.msra.mxu2 %v8099_v4  ;;  %v8141_v45 = vld [vmem:[#allocation11 + $0x1f0] sm:$0xff]  ;;  %v8132_v48 = vld [vmem:[#allocation11 + $0x1a8] sm:$0xff]  ;;  %v8131_v8 = vld [vmem:[#allocation11 + $0x1a0] sm:$0xff] }
 0x43c   : > { %5038 = vmatpush.bf16.msra.mxu3 %v8107_v5  ;;  %v4458_v26 = vld.sshfl [vmem:[#allocation1 + $0x10] sm:$0xff pattern:$0x73625140]  ;;  %v4459_v25 = vld.sshfl [vmem:[#allocation1 + $0x18] sm:$0xff pattern:$0x73625140] }
 0x43d   : > { %5000 = vmatpush.bf16.msra.mxu0 %v8082_v7  ;;  %v4456_v62 = vld.sshfl [vmem:[#allocation1] sm:$0xff pattern:$0x73625140]  ;;  %v4457_v29 = vld.sshfl [vmem:[#allocation1 + $0x8] sm:$0xff pattern:$0x73625140]  ;;  %v4474_v35 = vpack.c.bf16 %v4458_v26, %v4458_v26  ;;  %v4475_v37 = vpack.c.bf16 %v4459_v25, %v4459_v25 }
 0x43e   : > { %5013 = vmatpush.bf16.msra.mxu1 %v8090_v19  ;;  %v4472_v53 = vpack.c.bf16 %v4456_v62, %v4456_v62  ;;  %v4473_v39 = vpack.c.bf16 %v4457_v29, %v4457_v29  ;;  %v8140_v49 = vld [vmem:[#allocation11 + $0x1e8] sm:$0xff]  ;;  %v8139_v14 = vld [vmem:[#allocation11 + $0x1e0] sm:$0xff]  ;;  %v8114_v31 = vld [vmem:[#allocation11 + $0x118] sm:$0xff] }
 0x43f   : > { %5026 = vmatpush.bf16.msra.mxu2 %v8098_v9  ;;  %v8122_v52 = vld [vmem:[#allocation11 + $0x158] sm:$0xff]  ;;  %v8113_v54 = vld [vmem:[#allocation11 + $0x110] sm:$0xff]  ;;  %v8112_v33 = vld [vmem:[#allocation11 + $0x108] sm:$0xff] }
 0x440   : > { %5039 = vmatpush.bf16.msra.mxu3 %v8106_v10  ;;  %v8130_v27 = vld [vmem:[#allocation11 + $0x198] sm:$0xff]  ;;  %v8121_v56 = vld [vmem:[#allocation11 + $0x150] sm:$0xff]  ;;  %v8120_v59 = vld [vmem:[#allocation11 + $0x148] sm:$0xff] }
 0x441   : > { %5001 = vmatpush.bf16.msra.mxu0 %v8081_v11  ;;  %v8138_v50 = vld [vmem:[#allocation11 + $0x1d8] sm:$0xff]  ;;  %v8129_v44 = vld [vmem:[#allocation11 + $0x190] sm:$0xff]  ;;  %v8128_v60 = vld [vmem:[#allocation11 + $0x188] sm:$0xff] }
 0x442   : > { %5014 = vmatpush.bf16.msra.mxu1 %v8089_v12  ;;  %v8137_v57 = vld [vmem:[#allocation11 + $0x1d0] sm:$0xff]  ;;  %v8136_v28 = vld [vmem:[#allocation11 + $0x1c8] sm:$0xff]  ;;  %v8111_v36 = vld [vmem:[#allocation11 + $0x100] sm:$0xff] }
 0x443   : > { %5027 = vmatpush.bf16.msra.mxu2 %v8097_v13  ;;  %v8119_v61 = vld [vmem:[#allocation11 + $0x140] sm:$0xff]  ;;  %v4460_v63 = vld.sshfl [vmem:[#allocation1 + $0x20] sm:$0xff pattern:$0x73625140] }
 0x444   : > { %5040 = vmatpush.bf16.msra.mxu3 %v8105_v15  ;;  %v8127_v23 = vld [vmem:[#allocation11 + $0x180] sm:$0xff]  ;;  %v4462_v1 = vld.sshfl [vmem:[#allocation1 + $0x30] sm:$0xff pattern:$0x73625140]  ;;  %v4476_v4 = vpack.c.bf16 %v4460_v63, %v4460_v63 }
 0x445   : > { %5002 = vmatpush.bf16.msra.mxu0 %v8080_v16  ;;  %v8135_v34 = vld [vmem:[#allocation11 + $0x1c0] sm:$0xff]  ;;  %v4463_v3 = vld.sshfl [vmem:[#allocation1 + $0x38] sm:$0xff pattern:$0x73625140]  ;;  %v4478_v6 = vpack.c.bf16 %v4462_v1, %v4462_v1 }
 0x446   : > { %5015 = vmatpush.bf16.msra.mxu1 %v8088_v17  ;;  %v4461_v0 = vld.sshfl [vmem:[#allocation1 + $0x28] sm:$0xff pattern:$0x73625140]  ;;  %v4479_v7 = vpack.c.bf16 %v4463_v3, %v4463_v3 }
 0x447   : > { %5028 = vmatpush.bf16.msra.mxu2 %v8096_v18  ;;  %v4477_v5 = vpack.c.bf16 %v4461_v0, %v4461_v0  ;;  %v8238_v15 = vld [vmem:[#allocation12] ss:$0 sm:$0xff] }
 0x448   : > { %5041 = vmatpush.bf16.msra.mxu3 %v8104_v55 }
 0x449   : > { %5003 = vmatpush.bf16.msra.mxu0 %v8079_v41 }
 0x44a   : > { %5016 = vmatpush.bf16.msra.mxu1 %v8087_v22 }
 0x44b   : > { %5029 = vmatpush.bf16.msra.mxu2 %v8095_v38 }
 0x44c   : > { %5042 = vmatpush.bf16.msra.mxu3 %v8103_v24  ;;  %5004 = vmatmul.bf16.vlgmr.msra.gmra.mxu0 %v4472_v53 }
 0x44d   : > { %5048 = vmatpush.bf16.msrb.mxu0 %v8118_v42  ;;  %5017 = vmatmul.bf16.vlgmr.msra.gmra.mxu1 %v4473_v39 }
 0x44e   : > { %5061 = vmatpush.bf16.msrb.mxu1 %v8126_v20  ;;  %5030 = vmatmul.bf16.vlgmr.msra.gmra.mxu2 %v4474_v35 }
 0x44f   : > { %5074 = vmatpush.bf16.msrb.mxu2 %v8134_v30  ;;  %5043 = vmatmul.bf16.vlgmr.msra.gmra.mxu3 %v4475_v37 }
 0x450   : > { %5087 = vmatpush.bf16.msrb.mxu3 %v8142_v32 }
 0x451   : > { %5049 = vmatpush.bf16.msrb.mxu0 %v8117_v40 }
 0x452   : > { %5062 = vmatpush.bf16.msrb.mxu1 %v8125_v58 }
 0x453   : > { %5075 = vmatpush.bf16.msrb.mxu2 %v8133_v43 }
 0x454   : > { %5088 = vmatpush.bf16.msrb.mxu3 %v8141_v45 }
 0x455   : > { %5050 = vmatpush.bf16.msrb.mxu0 %v8116_v46 }
 0x456   : > { %5063 = vmatpush.bf16.msrb.mxu1 %v8124_v47 }
 0x457   : > { %5076 = vmatpush.bf16.msrb.mxu2 %v8132_v48 }
 0x458   : > { %5089 = vmatpush.bf16.msrb.mxu3 %v8140_v49 }
 0x459   : > { %5051 = vmatpush.bf16.msrb.mxu0 %v8115_v51 }
 0x45a   : > { %5064 = vmatpush.bf16.msrb.mxu1 %v8123_v2 }
 0x45b   : > { %5077 = vmatpush.bf16.msrb.mxu2 %v8131_v8 }
 0x45c   : > { %5090 = vmatpush.bf16.msrb.mxu3 %v8139_v14 }
 0x45d   : > { %5052 = vmatpush.bf16.msrb.mxu0 %v8114_v31 }
 0x45e   : > { %5065 = vmatpush.bf16.msrb.mxu1 %v8122_v52 }
 0x45f   : > { %5078 = vmatpush.bf16.msrb.mxu2 %v8130_v27 }
 0x460   : > { %5091 = vmatpush.bf16.msrb.mxu3 %v8138_v50 }
 0x461   : > { %5053 = vmatpush.bf16.msrb.mxu0 %v8113_v54 }
 0x462   : > { %5066 = vmatpush.bf16.msrb.mxu1 %v8121_v56 }
 0x463   : > { %5079 = vmatpush.bf16.msrb.mxu2 %v8129_v44 }
 0x464   : > { %5092 = vmatpush.bf16.msrb.mxu3 %v8137_v57 }
 0x465   : > { %5054 = vmatpush.bf16.msrb.mxu0 %v8112_v33 }
 0x466   : > { %5067 = vmatpush.bf16.msrb.mxu1 %v8120_v59 }
 0x467   : > { %5080 = vmatpush.bf16.msrb.mxu2 %v8128_v60 }
 0x468   : > { %5093 = vmatpush.bf16.msrb.mxu3 %v8136_v28 }
 0x469   : > { %5055 = vmatpush.bf16.msrb.mxu0 %v8111_v36 }
 0x46a   : > { %5068 = vmatpush.bf16.msrb.mxu1 %v8119_v61 }
 0x46b   : > { %5081 = vmatpush.bf16.msrb.mxu2 %v8127_v23 }
 0x46c   : > { %5094 = vmatpush.bf16.msrb.mxu3 %v8135_v34  ;;  %5056 = vmatmul.bf16.vlgmr.msrb.gmra.mxu0 %v4476_v4 }
 0x46d   : > { %5069 = vmatmul.bf16.vlgmr.msrb.gmra.mxu1 %v4477_v5 }
 0x46e   : > { %5082 = vmatmul.bf16.vlgmr.msrb.gmra.mxu2 %v4478_v6 }
 0x46f   : > { %5095 = vmatmul.bf16.vlgmr.msrb.gmra.mxu3 %v4479_v7 }
 0x4c9   : > { %v5005_v19 = vpop.f32.mrf.mxu0 }
 0x4ca   : > { %v5018_v9 = vpop.f32.mrf.mxu1  ;;  %v5006_v18 = vadd.f32 %v8238_v15, %v5005_v19 }
 0x4cc   : > { %v5019_v55 = vadd.f32 %v5018_v9, %v5006_v18 }
 0x4d1   : > { %v5031_v10 = vpop.f32.mrf.mxu2  ;;  %v5007_v12 = vpop.f32.mrf.mxu0 }
 0x4d2   : > { %v5044_v11 = vpop.f32.mrf.mxu3  ;;  %v5020_v13 = vpop.f32.mrf.mxu1  ;;  %v5032_v21 = vadd.f32 %v5031_v10, %v5019_v55 }
 0x4d4   : > { %v5045_v41 = vadd.f32 %v5044_v11, %v5032_v21 }
 0x4d9   : > { %v5033_v16 = vpop.f32.mrf.mxu2 }
 0x4da   : > { %v5046_v17 = vpop.f32.mrf.mxu3 }
 0x4e9   : > { %v5057_v22 = vpop.f32.mrf.mxu0 }
 0x4ea   : > { %v5070_v38 = vpop.f32.mrf.mxu1  ;;  %v5058_v24 = vadd.f32 %v5057_v22, %v5045_v41 }
 0x4ec   : > { %v5071_v42 = vadd.f32 %v5070_v38, %v5058_v24 }
 0x4f1   : > { %v5083_v20 = vpop.f32.mrf.mxu2  ;;  %v5059_v62 = vpop.f32.mrf.mxu0 }
 0x4f2   : > { %v5096_v26 = vpop.f32.mrf.mxu3  ;;  %v5084_v25 = vadd.f32 %v5083_v20, %v5071_v42  ;;  %v5072_v29 = vpop.f32.mrf.mxu1 }
 0x4f4   : > { %v5097_v30 = vadd.f32 %v5096_v26, %v5084_v25 }
 0x4f6   : > { %5100 = vst [vmem:[#allocation14] sm:$0x3] %v5097_v30 }
 0x4f9   : > { %v5085_v32 = vpop.f32.mrf.mxu2 }
 0x4fa   : > { %v5098_v35 = vpop.f32.mrf.mxu3 }
 0x4fb PF: > { %p8192_p5 = scmp.eq.s32.totalorder %s8565_s25, 8  ;;  %s8510_s26 = smov [#allocation14]  }
 0x4fc   : > { %s5107_s20 = sshll.u32 %s8510_s26, 4  ;;  %s5109_s13 = sshll.u32 %s9927_s6, 4  ;;  %s5108_s20 = int_to_ptr.vmem [resolvable:$true] %s5107_s20  ;;  %s5110_s13 = int_to_ptr.hbm [resolvable:$true] %s5109_s13 }
 0x4fd   : > { %8162 = dma.vmem_to_hbm [thread:$0]  (%p8192_p5), %s5108_s20, 32, %s5110_s13, [#allocation5]  }
 0x4fe   : > { %8484 = dma.done.wait (%p8192_p5), [#allocation5], 32  }
 0x4ff   : > { %8486 = vsyncadd (%p8192_p5), [#allocation5], 4294967264 }
 0x500 PF: > { %p22_p6 = scmp.ge.s32.totalorder %s8594_s10, 11   ;;  %s9940_s21 = smov %s8493_s22 }
 0x501   : > { %s9941_s22 = smov %s8497_s23  ;;  %s9942_s23 = smov %s8606_s15 }
 0x502   : > { %s9943_s24 = smov %s8594_s10  ;;  %24 = sbr.rel (!%p22_p6) target bundleno = 11 (0xb), region = 136 }
 0x507   :  { %5123 = vsyncpa [#allocation4], 1 }
 0x508   :  { %5125 = vsyncpa [#allocation4 + $0x1], 1 }
 0x509   :  { %5126 = vsyncpa [#allocation7], 1 }
 0x50a   :  { %5128 = vsyncpa [#allocation7 + $0x1], 1 }
 0x50b   :  { %5129 = vsyncpa [#allocation10], 1 }
 0x50c   :  { %5131 = vsyncpa [#allocation10 + $0x1], 1 }
 0x50d   :  { %5132 = vsyncpa [#allocation13], 1 }
 0x50e   :  { %5133 = vsyncpa [#allocation5], 1 }
 0x50f   :  { %5135 = vsyncpa [#allocation5 + $0x1], 1 }

</bundles_post_ra>
